<compile_context>
chip_gen: v5e
topology: v5e:2x2
jax: 0.10.0
libtpu: 0.0.40
codegen_flags: <defaults>
</compile_context>

<pallas_src>
import functools
import numpy as np

import jax
import jax.numpy as jnp
from jax.experimental import pallas as pl
from jax.experimental.pallas import tpu as pltpu

_LOG2 = 0.6931471805599453


def _ssp(x):
    # Shifted softplus, numerically stable, kept in f32 (no bf16 EUP on v5e).
    # (log1p would be marginally more accurate; this form is kept for
    #  guaranteed Mosaic lowering and matches the previously validated kernel.)
    return jnp.maximum(x, 0.0) + jnp.log(1.0 + jnp.exp(-jnp.abs(x))) - _LOG2


def _mdot(a, b):
    # MXU matmul with bf16 operands and f32 accumulation.
    return jnp.dot(a.astype(jnp.bfloat16), b.astype(jnp.bfloat16),
                   preferred_element_type=jnp.float32)


def _residual(x, w1, b1, w2, b2):
    # PhysNet residual block: x + W2 ssp(W1 ssp(x) + b1) + b2
    h = _ssp(x)
    h = _mdot(h, w1) + b1
    h = _ssp(h)
    h = _mdot(h, w2) + b2
    return x + h


# ---------------------------------------------------------------------------
# Packed-parameter layout (shared between wrapper packing and kernel indexing)
# ---------------------------------------------------------------------------
def _weight_layout(n_int, n_atomic, n_out):
    names = ["wi", "wj"]
    for r in range(n_int):
        names += [f"int{r}_w1", f"int{r}_w2"]
    names += ["wgate"]
    for r in range(n_atomic):
        names += [f"atom{r}_w1", f"atom{r}_w2"]
    for r in range(n_out):
        names += [f"out{r}_w1", f"out{r}_w2"]
    names += ["wo"]
    return {n: i for i, n in enumerate(names)}


def _bias_layout(n_int, n_atomic, n_out):
    names = ["bi", "bj"]
    for r in range(n_int):
        names += [f"int{r}_b1", f"int{r}_b2"]
    names += ["u", "bgate"]
    for r in range(n_atomic):
        names += [f"atom{r}_b1", f"atom{r}_b2"]
    for r in range(n_out):
        names += [f"out{r}_b1", f"out{r}_b2"]
    names += ["bo"]
    return {n: i for i, n in enumerate(names)}


# ---------------------------------------------------------------------------
# Fused PhysNet kernel: one grid step == one PhysNet module
# ---------------------------------------------------------------------------
def _physnet_kernel(d_ref, cen_ref, sc_ref, gt_ref, x0_ref,
                    wg_ref, w_ref, b_ref,
                    out_ref,
                    g_sc, x_sc, *,
                    coeff, cutoff, n_int, n_atomic, n_out):
    m = pl.program_id(0)
    widx = _weight_layout(n_int, n_atomic, n_out)
    bidx = _bias_layout(n_int, n_atomic, n_out)

    def W(name):                       # (F, F) bf16 weight slab entry
        return w_ref[0, widx[name]]

    def B(name):                       # (1, F) f32 bias slab entry
        k = bidx[name]
        return b_ref[0, k:k + 1, :]

    # --- first grid step: edge featurization + residency init --------------
    @pl.when(m == 0)
    def _():
        d = d_ref[...]                                          # (P, 1) f32
        diff = d - cen_ref[...]                                 # (P, R)
        phi = jnp.exp(coeff * diff * diff)                      # Gaussian RBF
        fc = 0.5 * (jnp.cos(jnp.pi * d / cutoff) + 1.0)         # cosine cutoff
        fc = jnp.where(d < cutoff, fc, 0.0)
        g_sc[...] = phi * fc                                    # g_ij, VMEM-resident
        x_sc[...] = x0_ref[...]                                 # embedded x, carried

    x = x_sc[...]                                               # (N, F) f32
    g = g_sc[...]                                               # (P, R) f32

    # --- interaction: gather / scatter-add via one-hot bf16 matmuls (MXU) --
    xa = _ssp(x)
    # Wi / Wj + bias applied on the atom axis (commute with the row gather).
    xi_w = _mdot(xa, W("wi")) + B("bi")                         # (N, F)
    xj_w = _mdot(xa, W("wj")) + B("bj")                         # (N, F)
    xj = _mdot(gt_ref[...], xj_w)                               # gather x[idx_j] -> (P, F)
    gm = _mdot(g, wg_ref[0])                                    # filter G(g_ij) -> (P, F)
    msg = gm * xj
    agg = _mdot(sc_ref[...], msg)                               # index_add over idx_i -> (N, F)
    v = xi_w + agg

    # --- interaction residual stack ----------------------------------------
    for r in range(n_int):
        v = _residual(v, W(f"int{r}_w1"), B(f"int{r}_b1"),
                      W(f"int{r}_w2"), B(f"int{r}_b2"))

    # --- gated update --------------------------------------------------------
    x = B("u") * x + _mdot(_ssp(v), W("wgate")) + B("bgate")

    # --- atomic residual stack ----------------------------------------------
    for r in range(n_atomic):
        x = _residual(x, W(f"atom{r}_w1"), B(f"atom{r}_b1"),
                      W(f"atom{r}_w2"), B(f"atom{r}_b2"))

    x_sc[...] = x                      # carry x to the next module (next grid step)

    # --- output residual stack + output dense --------------------------------
    xo = x
    for r in range(n_out):
        xo = _residual(xo, W(f"out{r}_w1"), B(f"out{r}_b1"),
                       W(f"out{r}_w2"), B(f"out{r}_b2"))
    out_ref[0] = _mdot(_ssp(xo), W("wo")) + B("bo")


# ---------------------------------------------------------------------------
# Parameter init (matches the torch module layout; synthetic weights)
# ---------------------------------------------------------------------------
def init_params(key, *, n_atom_basis, n_rbf, n_interactions,
                n_atomic_residual, n_output_residual, n_modules, max_z):
    F, R = n_atom_basis, n_rbf

    def dense_w(k, fan_in, fan_out):
        return (jax.random.normal(k, (fan_in, fan_out), jnp.float32)
                / jnp.sqrt(jnp.float32(fan_in)))

    def res_block(k):
        k1, k2 = jax.random.split(k)
        return {"w1": dense_w(k1, F, F), "b1": jnp.zeros((1, F), jnp.float32),
                "w2": dense_w(k2, F, F), "b2": jnp.zeros((1, F), jnp.float32)}

    key, ek = jax.random.split(key)
    emb = jax.random.normal(ek, (max_z, F), jnp.float32)
    emb = emb.at[0].set(0.0)  # padding_idx=0

    modules = []
    for _ in range(n_modules):
        key, *ks = jax.random.split(key, 8 + n_interactions + n_atomic_residual
                                    + n_output_residual)
        ks = list(ks)
        mp = {
            "wg": dense_w(ks.pop(), R, F),
            "wi": dense_w(ks.pop(), F, F), "bi": jnp.zeros((1, F), jnp.float32),
            "wj": dense_w(ks.pop(), F, F), "bj": jnp.zeros((1, F), jnp.float32),
            "int_res": [res_block(ks.pop()) for _ in range(n_interactions)],
            "u": jnp.ones((1, F), jnp.float32),
            "wgate": dense_w(ks.pop(), F, F), "bgate": jnp.zeros((1, F), jnp.float32),
            "atom_res": [res_block(ks.pop()) for _ in range(n_atomic_residual)],
            "out_res": [res_block(ks.pop()) for _ in range(n_output_residual)],
            "wo": dense_w(ks.pop(), F, F), "bo": jnp.zeros((1, F), jnp.float32),
        }
        modules.append(mp)
    return {"embedding": emb, "modules": modules}


# ---------------------------------------------------------------------------
# Parameter packing: per-module slabs, unpadded; weights in bf16, biases f32
# ---------------------------------------------------------------------------
def pack_params(params, *, n_int, n_atomic, n_out):
    widx = _weight_layout(n_int, n_atomic, n_out)
    bidx = _bias_layout(n_int, n_atomic, n_out)

    def module_slabs(mp):
        w = {"wi": mp["wi"], "wj": mp["wj"], "wgate": mp["wgate"], "wo": mp["wo"]}
        b = {"bi": mp["bi"], "bj": mp["bj"], "u": mp["u"],
             "bgate": mp["bgate"], "bo": mp["bo"]}
        for tag, blocks in (("int", mp["int_res"]), ("atom", mp["atom_res"]),
                            ("out", mp["out_res"])):
            for r, rb in enumerate(blocks):
                w[f"{tag}{r}_w1"] = rb["w1"]
                w[f"{tag}{r}_w2"] = rb["w2"]
                b[f"{tag}{r}_b1"] = rb["b1"]
                b[f"{tag}{r}_b2"] = rb["b2"]
        wl = [None] * len(widx)
        for name, i in widx.items():
            wl[i] = w[name].astype(jnp.bfloat16)
        bl = [None] * len(bidx)
        for name, i in bidx.items():
            bl[i] = b[name][0].astype(jnp.float32)          # (F,)
        return (mp["wg"].astype(jnp.bfloat16), jnp.stack(wl), jnp.stack(bl))

    wg_s, w_s, b_s = zip(*[module_slabs(mp) for mp in params["modules"]])
    return jnp.stack(wg_s), jnp.stack(w_s), jnp.stack(b_s)


def _nbytes(shape, dtype):
    return int(np.prod(shape)) * jnp.dtype(dtype).itemsize


# ---------------------------------------------------------------------------
# Full PhysNet forward (one pallas_call)
# ---------------------------------------------------------------------------
def physnet_forward(params, Z, r_ij, idx_i, idx_j, *, centers, coeff, cutoff):
    n_atoms = int(Z.shape[0])
    n_pairs = int(r_ij.shape[0])
    F = int(params["embedding"].shape[1])
    R = int(centers.shape[1])
    n_modules = len(params["modules"])
    mp0 = params["modules"][0]
    n_int = len(mp0["int_res"])
    n_atomic = len(mp0["atom_res"])
    n_out = len(mp0["out_res"])

    # --- XLA glue: edge distance, embedding gather, one-hot operators -------
    d_ij = jnp.sqrt(jnp.sum(r_ij * r_ij, axis=1, keepdims=True))          # (P, 1)
    cen = centers.astype(jnp.float32)                                     # (1, R)
    x0 = jnp.take(params["embedding"], Z, axis=0).astype(jnp.float32)     # (N, F)
    sc_i = (idx_i[None, :] == jnp.arange(n_atoms)[:, None]).astype(jnp.bfloat16)  # (N, P)
    gt_j = (idx_j[:, None] == jnp.arange(n_atoms)[None, :]).astype(jnp.bfloat16)  # (P, N)

    wg_s, w_s, b_s = pack_params(params, n_int=n_int, n_atomic=n_atomic, n_out=n_out)
    NW, NB = int(w_s.shape[1]), int(b_s.shape[1])

    kernel = functools.partial(
        _physnet_kernel, coeff=float(coeff), cutoff=float(cutoff),
        n_int=n_int, n_atomic=n_atomic, n_out=n_out)

    # --- VMEM budget (double-buffered blocks + scratch) + cost estimate ------
    in_blocks = [((n_pairs, 1), jnp.float32), ((1, R), jnp.float32),
                 ((n_atoms, n_pairs), jnp.bfloat16), ((n_pairs, n_atoms), jnp.bfloat16),
                 ((n_atoms, F), jnp.float32),
                 ((1, R, F), jnp.bfloat16), ((1, NW, F, F), jnp.bfloat16),
                 ((1, NB, F), jnp.float32)]
    block_bytes = (sum(_nbytes(s, d) for s, d in in_blocks)
                   + _nbytes((1, n_atoms, F), jnp.float32))
    scratch_bytes = _nbytes((n_pairs, R), jnp.float32) + _nbytes((n_atoms, F), jnp.float32)
    vmem_limit = int(min(max(2 * block_bytes + scratch_bytes + (2 << 20), 4 << 20),
                         64 << 20))

    n_res = n_int + n_atomic + n_out
    flops = 2 * n_modules * (n_atoms * F * F * (4 + 2 * n_res)
                             + 2 * n_pairs * n_atoms * F
                             + n_pairs * R * F)
    transcendentals = (n_modules * (2 + 2 * n_res) * n_atoms * F
                       + n_pairs * (R + 1))
    bytes_accessed = (sum(int(a.size) * a.dtype.itemsize
                          for a in (d_ij, cen, sc_i, gt_j, x0, wg_s, w_s, b_s))
                      + n_modules * n_atoms * F * 4)
    cost = pl.CostEstimate(flops=int(flops), transcendentals=int(transcendentals),
                           bytes_accessed=int(bytes_accessed))

    out = pl.pallas_call(
        kernel,
        out_shape=jax.ShapeDtypeStruct((n_modules, n_atoms, F), jnp.float32),
        grid_spec=pltpu.PrefetchScalarGridSpec(
            num_scalar_prefetch=0,
            grid=(n_modules,),
            in_specs=[
                # resident (constant index_map -> fetched once, reused each step)
                pl.BlockSpec((n_pairs, 1), lambda m: (0, 0)),            # d_ij
                pl.BlockSpec((1, R), lambda m: (0, 0)),                  # rbf centers
                pl.BlockSpec((n_atoms, n_pairs), lambda m: (0, 0)),      # scatter one-hot (bf16)
                pl.BlockSpec((n_pairs, n_atoms), lambda m: (0, 0)),      # gather one-hot (bf16)
                pl.BlockSpec((n_atoms, F), lambda m: (0, 0)),            # embedded x0
                # per-module stacked bf16 weights (pipelined prefetch over grid)
                pl.BlockSpec((1, R, F), lambda m: (m, 0, 0)),            # Wg
                pl.BlockSpec((1, NW, F, F), lambda m: (m, 0, 0, 0)),     # weight slab
                pl.BlockSpec((1, NB, F), lambda m: (m, 0, 0)),           # bias slab (f32)
            ],
            out_specs=pl.BlockSpec((1, n_atoms, F), lambda m: (m, 0, 0)),
            scratch_shapes=[
                pltpu.VMEM((n_pairs, R), jnp.float32),   # g_ij, resident all modules
                pltpu.VMEM((n_atoms, F), jnp.float32),   # x, carried across modules
            ]),
        compiler_params=pltpu.CompilerParams(
            dimension_semantics=("arbitrary",),          # x/g carry -> sequential grid
            vmem_limit_bytes=vmem_limit),
        cost_estimate=cost,
    )(d_ij, cen, sc_i, gt_j, x0, wg_s, w_s, b_s)

    return {"scalar_representation": out}


# ---------------------------------------------------------------------------
if __name__ == "__main__":
    key = jax.random.PRNGKey(0)

    n_atoms = 8
    n_atom_basis = 32
    n_rbf = 16
    n_interactions = 2
    n_atomic_residual = 2
    n_output_residual = 1
    n_modules = 5
    max_z = 200
    cutoff = 5.0

    # Deterministic synthetic "molecule": random positions, full neighbor list.
    key, kz, kp = jax.random.split(key, 3)
    Z = jax.random.randint(kz, (n_atoms,), 1, 50, dtype=jnp.int32)
    pos = jax.random.uniform(kp, (n_atoms, 3), jnp.float32) * 3.0

    pairs = np.array([(a, b) for a in range(n_atoms) for b in range(n_atoms) if a != b],
                     dtype=np.int32)
    idx_i = jnp.asarray(pairs[:, 0])
    idx_j = jnp.asarray(pairs[:, 1])
    r_ij = pos[idx_j] - pos[idx_i]                                      # (P, 3)

    centers = jnp.linspace(0.0, cutoff, n_rbf, dtype=jnp.float32).reshape(1, n_rbf)
    width = float(centers[0, 1] - centers[0, 0])
    coeff = -0.5 / (width * width)

    params = init_params(key,
                         n_atom_basis=n_atom_basis, n_rbf=n_rbf,
                         n_interactions=n_interactions,
                         n_atomic_residual=n_atomic_residual,
                         n_output_residual=n_output_residual,
                         n_modules=n_modules, max_z=max_z)

    out = physnet_forward(params, Z, r_ij, idx_i, idx_j,
                          centers=centers, coeff=coeff, cutoff=cutoff)
    rep = jax.block_until_ready(out["scalar_representation"])

    assert rep.shape == (n_modules, n_atoms, n_atom_basis)
    assert bool(jnp.all(jnp.isfinite(rep)))
    print("KERNEL_OK")
</pallas_src>

<mosaic_0001>
module attributes {stable_mosaic.version = 11 : i64} {
  func.func @_physnet_kernel(%arg0: i32, %arg1: memref<56x1xf32, #tpu.memory_space<vmem>>, %arg2: memref<1x16xf32, #tpu.memory_space<vmem>>, %arg3: memref<8x56xbf16, #tpu.memory_space<vmem>>, %arg4: memref<56x8xbf16, #tpu.memory_space<vmem>>, %arg5: memref<8x32xf32, #tpu.memory_space<vmem>>, %arg6: memref<1x16x32xbf16, #tpu.memory_space<vmem>>, %arg7: memref<1x14x32x32xbf16, #tpu.memory_space<vmem>>, %arg8: memref<1x15x32xf32, #tpu.memory_space<vmem>>, %arg9: memref<1x8x32xf32, #tpu.memory_space<vmem>>, %arg10: memref<56x16xf32, #tpu.memory_space<vmem>>, %arg11: memref<8x32xf32, #tpu.memory_space<vmem>>) attributes {dimension_semantics = [#tpu.dimension_semantics<arbitrary>], iteration_bounds = array<i64: 5>, scalar_prefetch = 0 : i64, scratch_operands = 2 : i64, tpu.core_type = #tpu.core_type<tc>, window_params = [{pipeline_mode = #tpu.pipeline_mode<synchronous>, transform_indices = @transform_0, window_bounds = array<i64: 56, 1>}, {pipeline_mode = #tpu.pipeline_mode<synchronous>, transform_indices = @transform_1, window_bounds = array<i64: 1, 16>}, {pipeline_mode = #tpu.pipeline_mode<synchronous>, transform_indices = @transform_2, window_bounds = array<i64: 8, 56>}, {pipeline_mode = #tpu.pipeline_mode<synchronous>, transform_indices = @transform_3, window_bounds = array<i64: 56, 8>}, {pipeline_mode = #tpu.pipeline_mode<synchronous>, transform_indices = @transform_4, window_bounds = array<i64: 8, 32>}, {transform_indices = @transform_5, window_bounds = array<i64: 1, 16, 32>}, {transform_indices = @transform_6, window_bounds = array<i64: 1, 14, 32, 32>}, {transform_indices = @transform_7, window_bounds = array<i64: 1, 15, 32>}, {transform_indices = @transform_8, window_bounds = array<i64: 1, 8, 32>}]} {
    %c0_i32 = arith.constant 0 : i32
    %0 = arith.cmpi eq, %arg0, %c0_i32 : i32
    %1 = arith.extui %0 : i1 to i32
    %c0_i32_0 = arith.constant 0 : i32
    %2 = arith.cmpi ne, %1, %c0_i32_0 : i32
    scf.if %2 {
      %c0_171 = arith.constant 0 : index
      %c0_172 = arith.constant 0 : index
      %299 = vector.load %arg1[%c0_171, %c0_172] : memref<56x1xf32, #tpu.memory_space<vmem>>, vector<56x1xf32>
      %c0_173 = arith.constant 0 : index
      %c0_174 = arith.constant 0 : index
      %300 = vector.load %arg2[%c0_173, %c0_174] : memref<1x16xf32, #tpu.memory_space<vmem>>, vector<1x16xf32>
      %301 = vector.broadcast %299 : vector<56x1xf32> to vector<56x16xf32>
      %302 = vector.broadcast %300 : vector<1x16xf32> to vector<56x16xf32>
      %303 = arith.subf %301, %302 : vector<56x16xf32>
      %cst_175 = arith.constant -4.49999952 : f32
      %304 = vector.broadcast %cst_175 : f32 to vector<56x16xf32>
      %305 = arith.mulf %304, %303 : vector<56x16xf32>
      %306 = arith.mulf %305, %303 : vector<56x16xf32>
      %307 = math.exp %306 : vector<56x16xf32>
      %cst_176 = arith.constant 3.14159274 : f32
      %308 = vector.broadcast %cst_176 : f32 to vector<56x1xf32>
      %309 = arith.mulf %308, %299 : vector<56x1xf32>
      %cst_177 = arith.constant 5.000000e+00 : f32
      %310 = vector.broadcast %cst_177 : f32 to vector<56x1xf32>
      %311 = arith.divf %309, %310 : vector<56x1xf32>
      %312 = math.cos %311 : vector<56x1xf32>
      %cst_178 = arith.constant 1.000000e+00 : f32
      %313 = vector.broadcast %cst_178 : f32 to vector<56x1xf32>
      %314 = arith.addf %312, %313 : vector<56x1xf32>
      %cst_179 = arith.constant 5.000000e-01 : f32
      %315 = vector.broadcast %cst_179 : f32 to vector<56x1xf32>
      %316 = arith.mulf %315, %314 : vector<56x1xf32>
      %cst_180 = arith.constant 5.000000e+00 : f32
      %317 = vector.broadcast %cst_180 : f32 to vector<56x1xf32>
      %318 = arith.cmpf olt, %299, %317 : vector<56x1xf32>
      %cst_181 = arith.constant 0.000000e+00 : f32
      %319 = vector.broadcast %cst_181 : f32 to vector<56x1xf32>
      %320 = arith.select %318, %316, %319 : vector<56x1xi1>, vector<56x1xf32>
      %321 = vector.broadcast %320 : vector<56x1xf32> to vector<56x16xf32>
      %322 = arith.mulf %307, %321 : vector<56x16xf32>
      %c0_182 = arith.constant 0 : index
      %c0_183 = arith.constant 0 : index
      %323 = vector.load %arg10[%c0_182, %c0_183] : memref<56x16xf32, #tpu.memory_space<vmem>>, vector<56x16xf32>
      tpu.vector_store %arg10[%c0_182, %c0_183], %322 {strides = array<i32>} : memref<56x16xf32, #tpu.memory_space<vmem>>, vector<56x16xf32>,
      %c0_184 = arith.constant 0 : index
      %c0_185 = arith.constant 0 : index
      %324 = vector.load %arg5[%c0_184, %c0_185] : memref<8x32xf32, #tpu.memory_space<vmem>>, vector<8x32xf32>
      %c0_186 = arith.constant 0 : index
      %c0_187 = arith.constant 0 : index
      %325 = vector.load %arg11[%c0_186, %c0_187] : memref<8x32xf32, #tpu.memory_space<vmem>>, vector<8x32xf32>
      tpu.vector_store %arg11[%c0_186, %c0_187], %324 {strides = array<i32>} : memref<8x32xf32, #tpu.memory_space<vmem>>, vector<8x32xf32>,
    } else {
    }
    %c0 = arith.constant 0 : index
    %c0_1 = arith.constant 0 : index
    %3 = vector.load %arg11[%c0, %c0_1] : memref<8x32xf32, #tpu.memory_space<vmem>>, vector<8x32xf32>
    %c0_2 = arith.constant 0 : index
    %c0_3 = arith.constant 0 : index
    %4 = vector.load %arg10[%c0_2, %c0_3] : memref<56x16xf32, #tpu.memory_space<vmem>>, vector<56x16xf32>
    %cst = arith.constant 0.000000e+00 : f32
    %5 = vector.broadcast %cst : f32 to vector<8x32xf32>
    %6 = arith.maximumf %3, %5 : vector<8x32xf32>
    %7 = math.absf %3 : vector<8x32xf32>
    %cst_4 = arith.constant 0.000000e+00 : f32
    %8 = vector.broadcast %cst_4 : f32 to vector<8x32xf32>
    %9 = arith.subf %8, %7 : vector<8x32xf32>
    %10 = math.exp %9 : vector<8x32xf32>
    %cst_5 = arith.constant 1.000000e+00 : f32
    %11 = vector.broadcast %cst_5 : f32 to vector<8x32xf32>
    %12 = arith.addf %11, %10 : vector<8x32xf32>
    %13 = math.log %12 : vector<8x32xf32>
    %14 = arith.addf %6, %13 : vector<8x32xf32>
    %cst_6 = arith.constant 0.693147182 : f32
    %15 = vector.broadcast %cst_6 : f32 to vector<8x32xf32>
    %16 = arith.subf %14, %15 : vector<8x32xf32>
    %c0_7 = arith.constant 0 : index
    %c0_8 = arith.constant 0 : index
    %c0_9 = arith.constant 0 : index
    %c0_10 = arith.constant 0 : index
    %17 = vector.load %arg7[%c0_7, %c0_8, %c0_9, %c0_10] : memref<1x14x32x32xbf16, #tpu.memory_space<vmem>>, vector<1x1x32x32xbf16>
    %18 = vector.shape_cast %17 : vector<1x1x32x32xbf16> to vector<32x32xbf16>
    %19 = arith.truncf %16 : vector<8x32xf32> to vector<8x32xbf16>
    %cst_11 = arith.constant dense<0.000000e+00> : vector<8x32xf32>
    %20 = tpu.matmul %19, %18, %cst_11 {dimension_numbers = #tpu.dot_dimension_numbers<[1], [0], [0], [1], [0, 0, 1, 1], [], []>} : vector<8x32xbf16>, vector<32x32xbf16>, vector<8x32xf32> -> vector<8x32xf32>
    %c0_12 = arith.constant 0 : index
    %c0_13 = arith.constant 0 : index
    %c0_14 = arith.constant 0 : index
    %21 = vector.load %arg8[%c0_12, %c0_13, %c0_14] : memref<1x15x32xf32, #tpu.memory_space<vmem>>, vector<1x1x32xf32>
    %22 = vector.shape_cast %21 : vector<1x1x32xf32> to vector<1x32xf32>
    %23 = vector.broadcast %22 : vector<1x32xf32> to vector<8x32xf32>
    %24 = arith.addf %20, %23 : vector<8x32xf32>
    %c0_15 = arith.constant 0 : index
    %c1 = arith.constant 1 : index
    %c0_16 = arith.constant 0 : index
    %c0_17 = arith.constant 0 : index
    %25 = vector.load %arg7[%c0_15, %c1, %c0_16, %c0_17] : memref<1x14x32x32xbf16, #tpu.memory_space<vmem>>, vector<1x1x32x32xbf16>
    %26 = vector.shape_cast %25 : vector<1x1x32x32xbf16> to vector<32x32xbf16>
    %27 = arith.truncf %16 : vector<8x32xf32> to vector<8x32xbf16>
    %cst_18 = arith.constant dense<0.000000e+00> : vector<8x32xf32>
    %28 = tpu.matmul %27, %26, %cst_18 {dimension_numbers = #tpu.dot_dimension_numbers<[1], [0], [0], [1], [0, 0, 1, 1], [], []>} : vector<8x32xbf16>, vector<32x32xbf16>, vector<8x32xf32> -> vector<8x32xf32>
    %c0_19 = arith.constant 0 : index
    %c1_20 = arith.constant 1 : index
    %c0_21 = arith.constant 0 : index
    %29 = vector.load %arg8[%c0_19, %c1_20, %c0_21] : memref<1x15x32xf32, #tpu.memory_space<vmem>>, vector<1x1x32xf32>
    %30 = vector.shape_cast %29 : vector<1x1x32xf32> to vector<1x32xf32>
    %31 = vector.broadcast %30 : vector<1x32xf32> to vector<8x32xf32>
    %32 = arith.addf %28, %31 : vector<8x32xf32>
    %c0_22 = arith.constant 0 : index
    %c0_23 = arith.constant 0 : index
    %33 = vector.load %arg4[%c0_22, %c0_23] : memref<56x8xbf16, #tpu.memory_space<vmem>>, vector<56x8xbf16>
    %34 = arith.truncf %32 : vector<8x32xf32> to vector<8x32xbf16>
    %cst_24 = arith.constant dense<0.000000e+00> : vector<56x32xf32>
    %35 = tpu.matmul %33, %34, %cst_24 {dimension_numbers = #tpu.dot_dimension_numbers<[1], [0], [0], [1], [0, 0, 1, 1], [], []>} : vector<56x8xbf16>, vector<8x32xbf16>, vector<56x32xf32> -> vector<56x32xf32>
    %c0_25 = arith.constant 0 : index
    %c0_26 = arith.constant 0 : index
    %c0_27 = arith.constant 0 : index
    %36 = vector.load %arg6[%c0_25, %c0_26, %c0_27] : memref<1x16x32xbf16, #tpu.memory_space<vmem>>, vector<1x16x32xbf16>
    %37 = vector.shape_cast %36 : vector<1x16x32xbf16> to vector<16x32xbf16>
    %38 = arith.truncf %4 : vector<56x16xf32> to vector<56x16xbf16>
    %cst_28 = arith.constant dense<0.000000e+00> : vector<56x32xf32>
    %39 = tpu.matmul %38, %37, %cst_28 {dimension_numbers = #tpu.dot_dimension_numbers<[1], [0], [0], [1], [0, 0, 1, 1], [], []>} : vector<56x16xbf16>, vector<16x32xbf16>, vector<56x32xf32> -> vector<56x32xf32>
    %40 = arith.mulf %39, %35 : vector<56x32xf32>
    %c0_29 = arith.constant 0 : index
    %c0_30 = arith.constant 0 : index
    %41 = vector.load %arg3[%c0_29, %c0_30] : memref<8x56xbf16, #tpu.memory_space<vmem>>, vector<8x56xbf16>
    %42 = arith.truncf %40 : vector<56x32xf32> to vector<56x32xbf16>
    %cst_31 = arith.constant dense<0.000000e+00> : vector<8x32xf32>
    %43 = tpu.matmul %41, %42, %cst_31 {dimension_numbers = #tpu.dot_dimension_numbers<[1], [0], [0], [1], [0, 0, 1, 1], [], []>} : vector<8x56xbf16>, vector<56x32xbf16>, vector<8x32xf32> -> vector<8x32xf32>
    %44 = arith.addf %24, %43 : vector<8x32xf32>
    %c0_32 = arith.constant 0 : index
    %c2 = arith.constant 2 : index
    %c0_33 = arith.constant 0 : index
    %c0_34 = arith.constant 0 : index
    %45 = vector.load %arg7[%c0_32, %c2, %c0_33, %c0_34] : memref<1x14x32x32xbf16, #tpu.memory_space<vmem>>, vector<1x1x32x32xbf16>
    %46 = vector.shape_cast %45 : vector<1x1x32x32xbf16> to vector<32x32xbf16>
    %c0_35 = arith.constant 0 : index
    %c2_36 = arith.constant 2 : index
    %c0_37 = arith.constant 0 : index
    %47 = vector.load %arg8[%c0_35, %c2_36, %c0_37] : memref<1x15x32xf32, #tpu.memory_space<vmem>>, vector<1x1x32xf32>
    %48 = vector.shape_cast %47 : vector<1x1x32xf32> to vector<1x32xf32>
    %c0_38 = arith.constant 0 : index
    %c3 = arith.constant 3 : index
    %c0_39 = arith.constant 0 : index
    %c0_40 = arith.constant 0 : index
    %49 = vector.load %arg7[%c0_38, %c3, %c0_39, %c0_40] : memref<1x14x32x32xbf16, #tpu.memory_space<vmem>>, vector<1x1x32x32xbf16>
    %50 = vector.shape_cast %49 : vector<1x1x32x32xbf16> to vector<32x32xbf16>
    %c0_41 = arith.constant 0 : index
    %c3_42 = arith.constant 3 : index
    %c0_43 = arith.constant 0 : index
    %51 = vector.load %arg8[%c0_41, %c3_42, %c0_43] : memref<1x15x32xf32, #tpu.memory_space<vmem>>, vector<1x1x32xf32>
    %52 = vector.shape_cast %51 : vector<1x1x32xf32> to vector<1x32xf32>
    %cst_44 = arith.constant 0.000000e+00 : f32
    %53 = vector.broadcast %cst_44 : f32 to vector<8x32xf32>
    %54 = arith.maximumf %44, %53 : vector<8x32xf32>
    %55 = math.absf %44 : vector<8x32xf32>
    %cst_45 = arith.constant 0.000000e+00 : f32
    %56 = vector.broadcast %cst_45 : f32 to vector<8x32xf32>
    %57 = arith.subf %56, %55 : vector<8x32xf32>
    %58 = math.exp %57 : vector<8x32xf32>
    %cst_46 = arith.constant 1.000000e+00 : f32
    %59 = vector.broadcast %cst_46 : f32 to vector<8x32xf32>
    %60 = arith.addf %59, %58 : vector<8x32xf32>
    %61 = math.log %60 : vector<8x32xf32>
    %62 = arith.addf %54, %61 : vector<8x32xf32>
    %cst_47 = arith.constant 0.693147182 : f32
    %63 = vector.broadcast %cst_47 : f32 to vector<8x32xf32>
    %64 = arith.subf %62, %63 : vector<8x32xf32>
    %65 = arith.truncf %64 : vector<8x32xf32> to vector<8x32xbf16>
    %cst_48 = arith.constant dense<0.000000e+00> : vector<8x32xf32>
    %66 = tpu.matmul %65, %46, %cst_48 {dimension_numbers = #tpu.dot_dimension_numbers<[1], [0], [0], [1], [0, 0, 1, 1], [], []>} : vector<8x32xbf16>, vector<32x32xbf16>, vector<8x32xf32> -> vector<8x32xf32>
    %67 = vector.broadcast %48 : vector<1x32xf32> to vector<8x32xf32>
    %68 = arith.addf %66, %67 : vector<8x32xf32>
    %cst_49 = arith.constant 0.000000e+00 : f32
    %69 = vector.broadcast %cst_49 : f32 to vector<8x32xf32>
    %70 = arith.maximumf %68, %69 : vector<8x32xf32>
    %71 = math.absf %68 : vector<8x32xf32>
    %cst_50 = arith.constant 0.000000e+00 : f32
    %72 = vector.broadcast %cst_50 : f32 to vector<8x32xf32>
    %73 = arith.subf %72, %71 : vector<8x32xf32>
    %74 = math.exp %73 : vector<8x32xf32>
    %cst_51 = arith.constant 1.000000e+00 : f32
    %75 = vector.broadcast %cst_51 : f32 to vector<8x32xf32>
    %76 = arith.addf %75, %74 : vector<8x32xf32>
    %77 = math.log %76 : vector<8x32xf32>
    %78 = arith.addf %70, %77 : vector<8x32xf32>
    %cst_52 = arith.constant 0.693147182 : f32
    %79 = vector.broadcast %cst_52 : f32 to vector<8x32xf32>
    %80 = arith.subf %78, %79 : vector<8x32xf32>
    %81 = arith.truncf %80 : vector<8x32xf32> to vector<8x32xbf16>
    %cst_53 = arith.constant dense<0.000000e+00> : vector<8x32xf32>
    %82 = tpu.matmul %81, %50, %cst_53 {dimension_numbers = #tpu.dot_dimension_numbers<[1], [0], [0], [1], [0, 0, 1, 1], [], []>} : vector<8x32xbf16>, vector<32x32xbf16>, vector<8x32xf32> -> vector<8x32xf32>
    %83 = vector.broadcast %52 : vector<1x32xf32> to vector<8x32xf32>
    %84 = arith.addf %82, %83 : vector<8x32xf32>
    %85 = arith.addf %44, %84 : vector<8x32xf32>
    %c0_54 = arith.constant 0 : index
    %c4 = arith.constant 4 : index
    %c0_55 = arith.constant 0 : index
    %c0_56 = arith.constant 0 : index
    %86 = vector.load %arg7[%c0_54, %c4, %c0_55, %c0_56] : memref<1x14x32x32xbf16, #tpu.memory_space<vmem>>, vector<1x1x32x32xbf16>
    %87 = vector.shape_cast %86 : vector<1x1x32x32xbf16> to vector<32x32xbf16>
    %c0_57 = arith.constant 0 : index
    %c4_58 = arith.constant 4 : index
    %c0_59 = arith.constant 0 : index
    %88 = vector.load %arg8[%c0_57, %c4_58, %c0_59] : memref<1x15x32xf32, #tpu.memory_space<vmem>>, vector<1x1x32xf32>
    %89 = vector.shape_cast %88 : vector<1x1x32xf32> to vector<1x32xf32>
    %c0_60 = arith.constant 0 : index
    %c5 = arith.constant 5 : index
    %c0_61 = arith.constant 0 : index
    %c0_62 = arith.constant 0 : index
    %90 = vector.load %arg7[%c0_60, %c5, %c0_61, %c0_62] : memref<1x14x32x32xbf16, #tpu.memory_space<vmem>>, vector<1x1x32x32xbf16>
    %91 = vector.shape_cast %90 : vector<1x1x32x32xbf16> to vector<32x32xbf16>
    %c0_63 = arith.constant 0 : index
    %c5_64 = arith.constant 5 : index
    %c0_65 = arith.constant 0 : index
    %92 = vector.load %arg8[%c0_63, %c5_64, %c0_65] : memref<1x15x32xf32, #tpu.memory_space<vmem>>, vector<1x1x32xf32>
    %93 = vector.shape_cast %92 : vector<1x1x32xf32> to vector<1x32xf32>
    %cst_66 = arith.constant 0.000000e+00 : f32
    %94 = vector.broadcast %cst_66 : f32 to vector<8x32xf32>
    %95 = arith.maximumf %85, %94 : vector<8x32xf32>
    %96 = math.absf %85 : vector<8x32xf32>
    %cst_67 = arith.constant 0.000000e+00 : f32
    %97 = vector.broadcast %cst_67 : f32 to vector<8x32xf32>
    %98 = arith.subf %97, %96 : vector<8x32xf32>
    %99 = math.exp %98 : vector<8x32xf32>
    %cst_68 = arith.constant 1.000000e+00 : f32
    %100 = vector.broadcast %cst_68 : f32 to vector<8x32xf32>
    %101 = arith.addf %100, %99 : vector<8x32xf32>
    %102 = math.log %101 : vector<8x32xf32>
    %103 = arith.addf %95, %102 : vector<8x32xf32>
    %cst_69 = arith.constant 0.693147182 : f32
    %104 = vector.broadcast %cst_69 : f32 to vector<8x32xf32>
    %105 = arith.subf %103, %104 : vector<8x32xf32>
    %106 = arith.truncf %105 : vector<8x32xf32> to vector<8x32xbf16>
    %cst_70 = arith.constant dense<0.000000e+00> : vector<8x32xf32>
    %107 = tpu.matmul %106, %87, %cst_70 {dimension_numbers = #tpu.dot_dimension_numbers<[1], [0], [0], [1], [0, 0, 1, 1], [], []>} : vector<8x32xbf16>, vector<32x32xbf16>, vector<8x32xf32> -> vector<8x32xf32>
    %108 = vector.broadcast %89 : vector<1x32xf32> to vector<8x32xf32>
    %109 = arith.addf %107, %108 : vector<8x32xf32>
    %cst_71 = arith.constant 0.000000e+00 : f32
    %110 = vector.broadcast %cst_71 : f32 to vector<8x32xf32>
    %111 = arith.maximumf %109, %110 : vector<8x32xf32>
    %112 = math.absf %109 : vector<8x32xf32>
    %cst_72 = arith.constant 0.000000e+00 : f32
    %113 = vector.broadcast %cst_72 : f32 to vector<8x32xf32>
    %114 = arith.subf %113, %112 : vector<8x32xf32>
    %115 = math.exp %114 : vector<8x32xf32>
    %cst_73 = arith.constant 1.000000e+00 : f32
    %116 = vector.broadcast %cst_73 : f32 to vector<8x32xf32>
    %117 = arith.addf %116, %115 : vector<8x32xf32>
    %118 = math.log %117 : vector<8x32xf32>
    %119 = arith.addf %111, %118 : vector<8x32xf32>
    %cst_74 = arith.constant 0.693147182 : f32
    %120 = vector.broadcast %cst_74 : f32 to vector<8x32xf32>
    %121 = arith.subf %119, %120 : vector<8x32xf32>
    %122 = arith.truncf %121 : vector<8x32xf32> to vector<8x32xbf16>
    %cst_75 = arith.constant dense<0.000000e+00> : vector<8x32xf32>
    %123 = tpu.matmul %122, %91, %cst_75 {dimension_numbers = #tpu.dot_dimension_numbers<[1], [0], [0], [1], [0, 0, 1, 1], [], []>} : vector<8x32xbf16>, vector<32x32xbf16>, vector<8x32xf32> -> vector<8x32xf32>
    %124 = vector.broadcast %93 : vector<1x32xf32> to vector<8x32xf32>
    %125 = arith.addf %123, %124 : vector<8x32xf32>
    %126 = arith.addf %85, %125 : vector<8x32xf32>
    %c0_76 = arith.constant 0 : index
    %c6 = arith.constant 6 : index
    %c0_77 = arith.constant 0 : index
    %127 = vector.load %arg8[%c0_76, %c6, %c0_77] : memref<1x15x32xf32, #tpu.memory_space<vmem>>, vector<1x1x32xf32>
    %128 = vector.shape_cast %127 : vector<1x1x32xf32> to vector<1x32xf32>
    %129 = vector.broadcast %128 : vector<1x32xf32> to vector<8x32xf32>
    %130 = arith.mulf %129, %3 : vector<8x32xf32>
    %cst_78 = arith.constant 0.000000e+00 : f32
    %131 = vector.broadcast %cst_78 : f32 to vector<8x32xf32>
    %132 = arith.maximumf %126, %131 : vector<8x32xf32>
    %133 = math.absf %126 : vector<8x32xf32>
    %cst_79 = arith.constant 0.000000e+00 : f32
    %134 = vector.broadcast %cst_79 : f32 to vector<8x32xf32>
    %135 = arith.subf %134, %133 : vector<8x32xf32>
    %136 = math.exp %135 : vector<8x32xf32>
    %cst_80 = arith.constant 1.000000e+00 : f32
    %137 = vector.broadcast %cst_80 : f32 to vector<8x32xf32>
    %138 = arith.addf %137, %136 : vector<8x32xf32>
    %139 = math.log %138 : vector<8x32xf32>
    %140 = arith.addf %132, %139 : vector<8x32xf32>
    %cst_81 = arith.constant 0.693147182 : f32
    %141 = vector.broadcast %cst_81 : f32 to vector<8x32xf32>
    %142 = arith.subf %140, %141 : vector<8x32xf32>
    %c0_82 = arith.constant 0 : index
    %c6_83 = arith.constant 6 : index
    %c0_84 = arith.constant 0 : index
    %c0_85 = arith.constant 0 : index
    %143 = vector.load %arg7[%c0_82, %c6_83, %c0_84, %c0_85] : memref<1x14x32x32xbf16, #tpu.memory_space<vmem>>, vector<1x1x32x32xbf16>
    %144 = vector.shape_cast %143 : vector<1x1x32x32xbf16> to vector<32x32xbf16>
    %145 = arith.truncf %142 : vector<8x32xf32> to vector<8x32xbf16>
    %cst_86 = arith.constant dense<0.000000e+00> : vector<8x32xf32>
    %146 = tpu.matmul %145, %144, %cst_86 {dimension_numbers = #tpu.dot_dimension_numbers<[1], [0], [0], [1], [0, 0, 1, 1], [], []>} : vector<8x32xbf16>, vector<32x32xbf16>, vector<8x32xf32> -> vector<8x32xf32>
    %147 = arith.addf %130, %146 : vector<8x32xf32>
    %c0_87 = arith.constant 0 : index
    %c7 = arith.constant 7 : index
    %c0_88 = arith.constant 0 : index
    %148 = vector.load %arg8[%c0_87, %c7, %c0_88] : memref<1x15x32xf32, #tpu.memory_space<vmem>>, vector<1x1x32xf32>
    %149 = vector.shape_cast %148 : vector<1x1x32xf32> to vector<1x32xf32>
    %150 = vector.broadcast %149 : vector<1x32xf32> to vector<8x32xf32>
    %151 = arith.addf %147, %150 : vector<8x32xf32>
    %c0_89 = arith.constant 0 : index
    %c7_90 = arith.constant 7 : index
    %c0_91 = arith.constant 0 : index
    %c0_92 = arith.constant 0 : index
    %152 = vector.load %arg7[%c0_89, %c7_90, %c0_91, %c0_92] : memref<1x14x32x32xbf16, #tpu.memory_space<vmem>>, vector<1x1x32x32xbf16>
    %153 = vector.shape_cast %152 : vector<1x1x32x32xbf16> to vector<32x32xbf16>
    %c0_93 = arith.constant 0 : index
    %c8 = arith.constant 8 : index
    %c0_94 = arith.constant 0 : index
    %154 = vector.load %arg8[%c0_93, %c8, %c0_94] : memref<1x15x32xf32, #tpu.memory_space<vmem>>, vector<1x1x32xf32>
    %155 = vector.shape_cast %154 : vector<1x1x32xf32> to vector<1x32xf32>
    %c0_95 = arith.constant 0 : index
    %c8_96 = arith.constant 8 : index
    %c0_97 = arith.constant 0 : index
    %c0_98 = arith.constant 0 : index
    %156 = vector.load %arg7[%c0_95, %c8_96, %c0_97, %c0_98] : memref<1x14x32x32xbf16, #tpu.memory_space<vmem>>, vector<1x1x32x32xbf16>
    %157 = vector.shape_cast %156 : vector<1x1x32x32xbf16> to vector<32x32xbf16>
    %c0_99 = arith.constant 0 : index
    %c9 = arith.constant 9 : index
    %c0_100 = arith.constant 0 : index
    %158 = vector.load %arg8[%c0_99, %c9, %c0_100] : memref<1x15x32xf32, #tpu.memory_space<vmem>>, vector<1x1x32xf32>
    %159 = vector.shape_cast %158 : vector<1x1x32xf32> to vector<1x32xf32>
    %cst_101 = arith.constant 0.000000e+00 : f32
    %160 = vector.broadcast %cst_101 : f32 to vector<8x32xf32>
    %161 = arith.maximumf %151, %160 : vector<8x32xf32>
    %162 = math.absf %151 : vector<8x32xf32>
    %cst_102 = arith.constant 0.000000e+00 : f32
    %163 = vector.broadcast %cst_102 : f32 to vector<8x32xf32>
    %164 = arith.subf %163, %162 : vector<8x32xf32>
    %165 = math.exp %164 : vector<8x32xf32>
    %cst_103 = arith.constant 1.000000e+00 : f32
    %166 = vector.broadcast %cst_103 : f32 to vector<8x32xf32>
    %167 = arith.addf %166, %165 : vector<8x32xf32>
    %168 = math.log %167 : vector<8x32xf32>
    %169 = arith.addf %161, %168 : vector<8x32xf32>
    %cst_104 = arith.constant 0.693147182 : f32
    %170 = vector.broadcast %cst_104 : f32 to vector<8x32xf32>
    %171 = arith.subf %169, %170 : vector<8x32xf32>
    %172 = arith.truncf %171 : vector<8x32xf32> to vector<8x32xbf16>
    %cst_105 = arith.constant dense<0.000000e+00> : vector<8x32xf32>
    %173 = tpu.matmul %172, %153, %cst_105 {dimension_numbers = #tpu.dot_dimension_numbers<[1], [0], [0], [1], [0, 0, 1, 1], [], []>} : vector<8x32xbf16>, vector<32x32xbf16>, vector<8x32xf32> -> vector<8x32xf32>
    %174 = vector.broadcast %155 : vector<1x32xf32> to vector<8x32xf32>
    %175 = arith.addf %173, %174 : vector<8x32xf32>
    %cst_106 = arith.constant 0.000000e+00 : f32
    %176 = vector.broadcast %cst_106 : f32 to vector<8x32xf32>
    %177 = arith.maximumf %175, %176 : vector<8x32xf32>
    %178 = math.absf %175 : vector<8x32xf32>
    %cst_107 = arith.constant 0.000000e+00 : f32
    %179 = vector.broadcast %cst_107 : f32 to vector<8x32xf32>
    %180 = arith.subf %179, %178 : vector<8x32xf32>
    %181 = math.exp %180 : vector<8x32xf32>
    %cst_108 = arith.constant 1.000000e+00 : f32
    %182 = vector.broadcast %cst_108 : f32 to vector<8x32xf32>
    %183 = arith.addf %182, %181 : vector<8x32xf32>
    %184 = math.log %183 : vector<8x32xf32>
    %185 = arith.addf %177, %184 : vector<8x32xf32>
    %cst_109 = arith.constant 0.693147182 : f32
    %186 = vector.broadcast %cst_109 : f32 to vector<8x32xf32>
    %187 = arith.subf %185, %186 : vector<8x32xf32>
    %188 = arith.truncf %187 : vector<8x32xf32> to vector<8x32xbf16>
    %cst_110 = arith.constant dense<0.000000e+00> : vector<8x32xf32>
    %189 = tpu.matmul %188, %157, %cst_110 {dimension_numbers = #tpu.dot_dimension_numbers<[1], [0], [0], [1], [0, 0, 1, 1], [], []>} : vector<8x32xbf16>, vector<32x32xbf16>, vector<8x32xf32> -> vector<8x32xf32>
    %190 = vector.broadcast %159 : vector<1x32xf32> to vector<8x32xf32>
    %191 = arith.addf %189, %190 : vector<8x32xf32>
    %192 = arith.addf %151, %191 : vector<8x32xf32>
    %c0_111 = arith.constant 0 : index
    %c9_112 = arith.constant 9 : index
    %c0_113 = arith.constant 0 : index
    %c0_114 = arith.constant 0 : index
    %193 = vector.load %arg7[%c0_111, %c9_112, %c0_113, %c0_114] : memref<1x14x32x32xbf16, #tpu.memory_space<vmem>>, vector<1x1x32x32xbf16>
    %194 = vector.shape_cast %193 : vector<1x1x32x32xbf16> to vector<32x32xbf16>
    %c0_115 = arith.constant 0 : index
    %c10 = arith.constant 10 : index
    %c0_116 = arith.constant 0 : index
    %195 = vector.load %arg8[%c0_115, %c10, %c0_116] : memref<1x15x32xf32, #tpu.memory_space<vmem>>, vector<1x1x32xf32>
    %196 = vector.shape_cast %195 : vector<1x1x32xf32> to vector<1x32xf32>
    %c0_117 = arith.constant 0 : index
    %c10_118 = arith.constant 10 : index
    %c0_119 = arith.constant 0 : index
    %c0_120 = arith.constant 0 : index
    %197 = vector.load %arg7[%c0_117, %c10_118, %c0_119, %c0_120] : memref<1x14x32x32xbf16, #tpu.memory_space<vmem>>, vector<1x1x32x32xbf16>
    %198 = vector.shape_cast %197 : vector<1x1x32x32xbf16> to vector<32x32xbf16>
    %c0_121 = arith.constant 0 : index
    %c11 = arith.constant 11 : index
    %c0_122 = arith.constant 0 : index
    %199 = vector.load %arg8[%c0_121, %c11, %c0_122] : memref<1x15x32xf32, #tpu.memory_space<vmem>>, vector<1x1x32xf32>
    %200 = vector.shape_cast %199 : vector<1x1x32xf32> to vector<1x32xf32>
    %cst_123 = arith.constant 0.000000e+00 : f32
    %201 = vector.broadcast %cst_123 : f32 to vector<8x32xf32>
    %202 = arith.maximumf %192, %201 : vector<8x32xf32>
    %203 = math.absf %192 : vector<8x32xf32>
    %cst_124 = arith.constant 0.000000e+00 : f32
    %204 = vector.broadcast %cst_124 : f32 to vector<8x32xf32>
    %205 = arith.subf %204, %203 : vector<8x32xf32>
    %206 = math.exp %205 : vector<8x32xf32>
    %cst_125 = arith.constant 1.000000e+00 : f32
    %207 = vector.broadcast %cst_125 : f32 to vector<8x32xf32>
    %208 = arith.addf %207, %206 : vector<8x32xf32>
    %209 = math.log %208 : vector<8x32xf32>
    %210 = arith.addf %202, %209 : vector<8x32xf32>
    %cst_126 = arith.constant 0.693147182 : f32
    %211 = vector.broadcast %cst_126 : f32 to vector<8x32xf32>
    %212 = arith.subf %210, %211 : vector<8x32xf32>
    %213 = arith.truncf %212 : vector<8x32xf32> to vector<8x32xbf16>
    %cst_127 = arith.constant dense<0.000000e+00> : vector<8x32xf32>
    %214 = tpu.matmul %213, %194, %cst_127 {dimension_numbers = #tpu.dot_dimension_numbers<[1], [0], [0], [1], [0, 0, 1, 1], [], []>} : vector<8x32xbf16>, vector<32x32xbf16>, vector<8x32xf32> -> vector<8x32xf32>
    %215 = vector.broadcast %196 : vector<1x32xf32> to vector<8x32xf32>
    %216 = arith.addf %214, %215 : vector<8x32xf32>
    %cst_128 = arith.constant 0.000000e+00 : f32
    %217 = vector.broadcast %cst_128 : f32 to vector<8x32xf32>
    %218 = arith.maximumf %216, %217 : vector<8x32xf32>
    %219 = math.absf %216 : vector<8x32xf32>
    %cst_129 = arith.constant 0.000000e+00 : f32
    %220 = vector.broadcast %cst_129 : f32 to vector<8x32xf32>
    %221 = arith.subf %220, %219 : vector<8x32xf32>
    %222 = math.exp %221 : vector<8x32xf32>
    %cst_130 = arith.constant 1.000000e+00 : f32
    %223 = vector.broadcast %cst_130 : f32 to vector<8x32xf32>
    %224 = arith.addf %223, %222 : vector<8x32xf32>
    %225 = math.log %224 : vector<8x32xf32>
    %226 = arith.addf %218, %225 : vector<8x32xf32>
    %cst_131 = arith.constant 0.693147182 : f32
    %227 = vector.broadcast %cst_131 : f32 to vector<8x32xf32>
    %228 = arith.subf %226, %227 : vector<8x32xf32>
    %229 = arith.truncf %228 : vector<8x32xf32> to vector<8x32xbf16>
    %cst_132 = arith.constant dense<0.000000e+00> : vector<8x32xf32>
    %230 = tpu.matmul %229, %198, %cst_132 {dimension_numbers = #tpu.dot_dimension_numbers<[1], [0], [0], [1], [0, 0, 1, 1], [], []>} : vector<8x32xbf16>, vector<32x32xbf16>, vector<8x32xf32> -> vector<8x32xf32>
    %231 = vector.broadcast %200 : vector<1x32xf32> to vector<8x32xf32>
    %232 = arith.addf %230, %231 : vector<8x32xf32>
    %233 = arith.addf %192, %232 : vector<8x32xf32>
    %c0_133 = arith.constant 0 : index
    %c0_134 = arith.constant 0 : index
    %234 = vector.load %arg11[%c0_133, %c0_134] : memref<8x32xf32, #tpu.memory_space<vmem>>, vector<8x32xf32>
    tpu.vector_store %arg11[%c0_133, %c0_134], %233 {strides = array<i32>} : memref<8x32xf32, #tpu.memory_space<vmem>>, vector<8x32xf32>,
    %c0_135 = arith.constant 0 : index
    %c11_136 = arith.constant 11 : index
    %c0_137 = arith.constant 0 : index
    %c0_138 = arith.constant 0 : index
    %235 = vector.load %arg7[%c0_135, %c11_136, %c0_137, %c0_138] : memref<1x14x32x32xbf16, #tpu.memory_space<vmem>>, vector<1x1x32x32xbf16>
    %236 = vector.shape_cast %235 : vector<1x1x32x32xbf16> to vector<32x32xbf16>
    %c0_139 = arith.constant 0 : index
    %c12 = arith.constant 12 : index
    %c0_140 = arith.constant 0 : index
    %237 = vector.load %arg8[%c0_139, %c12, %c0_140] : memref<1x15x32xf32, #tpu.memory_space<vmem>>, vector<1x1x32xf32>
    %238 = vector.shape_cast %237 : vector<1x1x32xf32> to vector<1x32xf32>
    %c0_141 = arith.constant 0 : index
    %c12_142 = arith.constant 12 : index
    %c0_143 = arith.constant 0 : index
    %c0_144 = arith.constant 0 : index
    %239 = vector.load %arg7[%c0_141, %c12_142, %c0_143, %c0_144] : memref<1x14x32x32xbf16, #tpu.memory_space<vmem>>, vector<1x1x32x32xbf16>
    %240 = vector.shape_cast %239 : vector<1x1x32x32xbf16> to vector<32x32xbf16>
    %c0_145 = arith.constant 0 : index
    %c13 = arith.constant 13 : index
    %c0_146 = arith.constant 0 : index
    %241 = vector.load %arg8[%c0_145, %c13, %c0_146] : memref<1x15x32xf32, #tpu.memory_space<vmem>>, vector<1x1x32xf32>
    %242 = vector.shape_cast %241 : vector<1x1x32xf32> to vector<1x32xf32>
    %cst_147 = arith.constant 0.000000e+00 : f32
    %243 = vector.broadcast %cst_147 : f32 to vector<8x32xf32>
    %244 = arith.maximumf %233, %243 : vector<8x32xf32>
    %245 = math.absf %233 : vector<8x32xf32>
    %cst_148 = arith.constant 0.000000e+00 : f32
    %246 = vector.broadcast %cst_148 : f32 to vector<8x32xf32>
    %247 = arith.subf %246, %245 : vector<8x32xf32>
    %248 = math.exp %247 : vector<8x32xf32>
    %cst_149 = arith.constant 1.000000e+00 : f32
    %249 = vector.broadcast %cst_149 : f32 to vector<8x32xf32>
    %250 = arith.addf %249, %248 : vector<8x32xf32>
    %251 = math.log %250 : vector<8x32xf32>
    %252 = arith.addf %244, %251 : vector<8x32xf32>
    %cst_150 = arith.constant 0.693147182 : f32
    %253 = vector.broadcast %cst_150 : f32 to vector<8x32xf32>
    %254 = arith.subf %252, %253 : vector<8x32xf32>
    %255 = arith.truncf %254 : vector<8x32xf32> to vector<8x32xbf16>
    %cst_151 = arith.constant dense<0.000000e+00> : vector<8x32xf32>
    %256 = tpu.matmul %255, %236, %cst_151 {dimension_numbers = #tpu.dot_dimension_numbers<[1], [0], [0], [1], [0, 0, 1, 1], [], []>} : vector<8x32xbf16>, vector<32x32xbf16>, vector<8x32xf32> -> vector<8x32xf32>
    %257 = vector.broadcast %238 : vector<1x32xf32> to vector<8x32xf32>
    %258 = arith.addf %256, %257 : vector<8x32xf32>
    %cst_152 = arith.constant 0.000000e+00 : f32
    %259 = vector.broadcast %cst_152 : f32 to vector<8x32xf32>
    %260 = arith.maximumf %258, %259 : vector<8x32xf32>
    %261 = math.absf %258 : vector<8x32xf32>
    %cst_153 = arith.constant 0.000000e+00 : f32
    %262 = vector.broadcast %cst_153 : f32 to vector<8x32xf32>
    %263 = arith.subf %262, %261 : vector<8x32xf32>
    %264 = math.exp %263 : vector<8x32xf32>
    %cst_154 = arith.constant 1.000000e+00 : f32
    %265 = vector.broadcast %cst_154 : f32 to vector<8x32xf32>
    %266 = arith.addf %265, %264 : vector<8x32xf32>
    %267 = math.log %266 : vector<8x32xf32>
    %268 = arith.addf %260, %267 : vector<8x32xf32>
    %cst_155 = arith.constant 0.693147182 : f32
    %269 = vector.broadcast %cst_155 : f32 to vector<8x32xf32>
    %270 = arith.subf %268, %269 : vector<8x32xf32>
    %271 = arith.truncf %270 : vector<8x32xf32> to vector<8x32xbf16>
    %cst_156 = arith.constant dense<0.000000e+00> : vector<8x32xf32>
    %272 = tpu.matmul %271, %240, %cst_156 {dimension_numbers = #tpu.dot_dimension_numbers<[1], [0], [0], [1], [0, 0, 1, 1], [], []>} : vector<8x32xbf16>, vector<32x32xbf16>, vector<8x32xf32> -> vector<8x32xf32>
    %273 = vector.broadcast %242 : vector<1x32xf32> to vector<8x32xf32>
    %274 = arith.addf %272, %273 : vector<8x32xf32>
    %275 = arith.addf %233, %274 : vector<8x32xf32>
    %cst_157 = arith.constant 0.000000e+00 : f32
    %276 = vector.broadcast %cst_157 : f32 to vector<8x32xf32>
    %277 = arith.maximumf %275, %276 : vector<8x32xf32>
    %278 = math.absf %275 : vector<8x32xf32>
    %cst_158 = arith.constant 0.000000e+00 : f32
    %279 = vector.broadcast %cst_158 : f32 to vector<8x32xf32>
    %280 = arith.subf %279, %278 : vector<8x32xf32>
    %281 = math.exp %280 : vector<8x32xf32>
    %cst_159 = arith.constant 1.000000e+00 : f32
    %282 = vector.broadcast %cst_159 : f32 to vector<8x32xf32>
    %283 = arith.addf %282, %281 : vector<8x32xf32>
    %284 = math.log %283 : vector<8x32xf32>
    %285 = arith.addf %277, %284 : vector<8x32xf32>
    %cst_160 = arith.constant 0.693147182 : f32
    %286 = vector.broadcast %cst_160 : f32 to vector<8x32xf32>
    %287 = arith.subf %285, %286 : vector<8x32xf32>
    %c0_161 = arith.constant 0 : index
    %c13_162 = arith.constant 13 : index
    %c0_163 = arith.constant 0 : index
    %c0_164 = arith.constant 0 : index
    %288 = vector.load %arg7[%c0_161, %c13_162, %c0_163, %c0_164] : memref<1x14x32x32xbf16, #tpu.memory_space<vmem>>, vector<1x1x32x32xbf16>
    %289 = vector.shape_cast %288 : vector<1x1x32x32xbf16> to vector<32x32xbf16>
    %290 = arith.truncf %287 : vector<8x32xf32> to vector<8x32xbf16>
    %cst_165 = arith.constant dense<0.000000e+00> : vector<8x32xf32>
    %291 = tpu.matmul %290, %289, %cst_165 {dimension_numbers = #tpu.dot_dimension_numbers<[1], [0], [0], [1], [0, 0, 1, 1], [], []>} : vector<8x32xbf16>, vector<32x32xbf16>, vector<8x32xf32> -> vector<8x32xf32>
    %c0_166 = arith.constant 0 : index
    %c14 = arith.constant 14 : index
    %c0_167 = arith.constant 0 : index
    %292 = vector.load %arg8[%c0_166, %c14, %c0_167] : memref<1x15x32xf32, #tpu.memory_space<vmem>>, vector<1x1x32xf32>
    %293 = vector.shape_cast %292 : vector<1x1x32xf32> to vector<1x32xf32>
    %294 = vector.broadcast %293 : vector<1x32xf32> to vector<8x32xf32>
    %295 = arith.addf %291, %294 : vector<8x32xf32>
    %c0_168 = arith.constant 0 : index
    %c0_169 = arith.constant 0 : index
    %c0_170 = arith.constant 0 : index
    %296 = vector.load %arg9[%c0_168, %c0_169, %c0_170] : memref<1x8x32xf32, #tpu.memory_space<vmem>>, vector<1x8x32xf32>
    %297 = vector.shape_cast %296 : vector<1x8x32xf32> to vector<8x32xf32>
    %298 = vector.shape_cast %295 : vector<8x32xf32> to vector<1x8x32xf32>
    tpu.vector_store %arg9[%c0_168, %c0_169, %c0_170], %298 {strides = array<i32>} : memref<1x8x32xf32, #tpu.memory_space<vmem>>, vector<1x8x32xf32>,
    return
  }
  func.func @transform_0(%arg0: i32) -> (i32, i32) {
    %c0_i32 = arith.constant 0 : i32
    %c0_i32_0 = arith.constant 0 : i32
    %c0_i32_1 = arith.constant 0 : i32
    return %c0_i32, %c0_i32_0 : i32, i32
  }
  func.func @transform_1(%arg0: i32) -> (i32, i32) {
    %c0_i32 = arith.constant 0 : i32
    %c0_i32_0 = arith.constant 0 : i32
    %c0_i32_1 = arith.constant 0 : i32
    return %c0_i32, %c0_i32_0 : i32, i32
  }
  func.func @transform_2(%arg0: i32) -> (i32, i32) {
    %c0_i32 = arith.constant 0 : i32
    %c0_i32_0 = arith.constant 0 : i32
    %c0_i32_1 = arith.constant 0 : i32
    return %c0_i32, %c0_i32_0 : i32, i32
  }
  func.func @transform_3(%arg0: i32) -> (i32, i32) {
    %c0_i32 = arith.constant 0 : i32
    %c0_i32_0 = arith.constant 0 : i32
    %c0_i32_1 = arith.constant 0 : i32
    return %c0_i32, %c0_i32_0 : i32, i32
  }
  func.func @transform_4(%arg0: i32) -> (i32, i32) {
    %c0_i32 = arith.constant 0 : i32
    %c0_i32_0 = arith.constant 0 : i32
    %c0_i32_1 = arith.constant 0 : i32
    return %c0_i32, %c0_i32_0 : i32, i32
  }
  func.func @transform_5(%arg0: i32) -> (i32, i32, i32) {
    %c0_i32 = arith.constant 0 : i32
    %c0_i32_0 = arith.constant 0 : i32
    %c0_i32_1 = arith.constant 0 : i32
    return %arg0, %c0_i32, %c0_i32_0 : i32, i32, i32
  }
  func.func @transform_6(%arg0: i32) -> (i32, i32, i32, i32) {
    %c0_i32 = arith.constant 0 : i32
    %c0_i32_0 = arith.constant 0 : i32
    %c0_i32_1 = arith.constant 0 : i32
    %c0_i32_2 = arith.constant 0 : i32
    return %arg0, %c0_i32, %c0_i32_0, %c0_i32_1 : i32, i32, i32, i32
  }
  func.func @transform_7(%arg0: i32) -> (i32, i32, i32) {
    %c0_i32 = arith.constant 0 : i32
    %c0_i32_0 = arith.constant 0 : i32
    %c0_i32_1 = arith.constant 0 : i32
    return %arg0, %c0_i32, %c0_i32_0 : i32, i32, i32
  }
  func.func @transform_8(%arg0: i32) -> (i32, i32, i32) {
    %c0_i32 = arith.constant 0 : i32
    %c0_i32_0 = arith.constant 0 : i32
    %c0_i32_1 = arith.constant 0 : i32
    return %arg0, %c0_i32, %c0_i32_0 : i32, i32, i32
  }
}

</mosaic_0001>

<bundles_post_ra>
// kernel: tpu_custom_call.1
= control target key start
LH: loop header
LB: loop body
LE: loop exit
PB: predicated region body
PF: predicated region fallthrough
CT: control target
= control target key end

     0   :  { %s4456_s0 = inlined_call_operand.vmem [shape: f32[56,1], index: 0, kind: input, shape index: {}]   ;;  %s4457_s1 = inlined_call_operand.vmem [shape: f32[1,16], index: 1, kind: input, shape index: {}]   ;;  %s4458_s2 = inlined_call_operand.vmem [shape: bf16[8,56], index: 2, kind: input, shape index: {}]   ;;  %s4459_s3 = inlined_call_operand.vmem [shape: bf16[56,8], index: 3, kind: input, shape index: {}]   ;;  %s4460_s4 = inlined_call_operand.vmem [shape: f32[8,32], index: 4, kind: input, shape index: {}]   ;;  %s4461_s5 = inlined_call_operand.hbm [shape: bf16[5,16,32], index: 5, kind: input, shape index: {}]   ;;  %s4462_s6 = inlined_call_operand.hbm [shape: bf16[5,14,32,32], index: 6, kind: input, shape index: {}]   ;;  %s4463_s7 = inlined_call_operand.vmem [shape: f32[5,15,32], index: 7, kind: input, shape index: {}]   ;;  %s4464_s8 = inlined_call_operand.hbm [shape: f32[5,8,32], index: 8, kind: output, shape index: {}]  }
   0x1   :  { %4471 = sst [smem:[#allocation19_spill]] %s4461_s5 }
   0x2   :  { %13 = vsyncpa [#allocation5], 0 }
   0x3   :  { %15 = vsyncpa [#allocation5 + $0x1], 0 }
   0x4   :  { %16 = vsyncpa [#allocation8], 0 }
   0x5   :  { %18 = vsyncpa [#allocation8 + $0x1], 0 }
   0x6   :  { %19 = vsyncpa [#allocation6], 0 }
   0x7   :  { %21 = vsyncpa [#allocation6 + $0x1], 0  ;;  %s3213_s27 = smov 0   ;;  %s3215_s28 = smov 0  }
   0x8   :  { %s3217_s29 = smov 0   ;;  %s3219_s30 = smov 0  }
   0x9 LB: > { %4472 = sst [smem:[#allocation13_spill]] %s3144_s27  ;;  %s3234_s9 = sadd.s32 4294967295, %s3156_s30   ;;  %s3156_s30 = sphi %s3219_s30, %s4502_s30   ;;  %s3152_s29 = sphi %s3217_s29, %s4504_s29   ;;  %s3148_s28 = sphi %s3215_s28, %s4506_s28   ;;  %s3144_s27 = sphi %s3213_s27, %s4505_s27  }
   0xa   : > { %4473 = sst [smem:[#allocation14_spill]] %s3152_s29  ;;  %s2582_s10 = sadd.s32 4294967294, %s3156_s30  }
   0xb   : > { %4474 = sst [smem:[#allocation15_spill]] %s3156_s30  ;;  %s3238_s11 = sadd.s32 1, %s3156_s30  }
   0xc   : > { %4475 = sst [smem:[#allocation16_spill]] %s3238_s11  ;;  %s139_s12 = sadd.s32 1, %s3152_s29 }
   0xd   : > { %s136_s13 = ssub.s32 %s3156_s30, %s3238_s11  ;;  %p146_p0 = scmp.ne.s32.totalorder %s3152_s29, %s3148_s28 }
   0xe   : > { %p137_p1 = scmp.eq.s32.totalorder %s136_s13, 0  ;;  %p147_p2 = scmp.eq.s32.totalorder %s3156_s30, 0 }
   0xf   : > { %p152_p3 = scmp.ne.s32.totalorder %s3148_s28, %s3144_s27  ;;  %p153_p4 = scmp.eq.s32.totalorder %s3234_s9, 0 }
  0x10   : > { %s3250_s14 = scalar_select %p137_p1, %s3152_s29, %s139_s12  }
  0x11   : > { %p3252_p5 = por %p147_p2, %p146_p0  ;;  %p3256_p6 = por %p153_p4, %p152_p3 }
  0x12   : > { %4476 = sst [smem:[#allocation17_spill]] %s3250_s14  ;;  %p228_p7 = scmp.eq.s32.totalorder %s3234_s9, 4 }
  0x13   : > { %p234_p8 = scmp.eq.s32.totalorder %s2582_s10, 4  ;;  %p2890_p9 = scmp.lt.s32.totalorder %s3156_s30, 5 }
  0x14   : > { %p3262_p10 = por %p228_p7, %p146_p0  ;;  %s3271_s19 = sand.u32 1, %s3152_s29  }
  0x15   : > { %p3266_p11 = por %p234_p8, %p152_p3  ;;  %s2836_s20 = sshll.u32 %s3156_s30, 3 }
  0x16   : > { %s2585_s21 = sshll.u32 %s3271_s19, 3  ;;  %s4482_s5 = sld [smem:[#allocation19_spill]] }
  0x17   : > { %s4480_s18 = scalar_select %p3266_p11, 1, 0 }
  0x18   : > { %s273_s26 = scalar_lea.vmem [#allocation4], %s2585_s21  ;;  %p3280_p12 = pnand %p2890_p9, %p3252_p5 }
  0x19   : > { %4481 = sst [smem:[#allocation18_spill]] %s4480_s18  ;;  %s281_s10 = sshll.u32 %s273_s26, 4  ;;  %s282_s10 = int_to_ptr.vmem [resolvable:$true] %s281_s10 }
  0x1a   : > { %p2589_p13 = scmp.ge.s32.totalorder %s3156_s30, 1  ;;  %p319_p0 = scmp.lt.s32.totalorder %s3156_s30, 6 }
  0x1b   : > { %s270_s13 = scalar_lea.sflag [#allocation5], %s3271_s19  ;;  %p3030_p2 = pneg %p3280_p12 }
  0x1c   : > { %s278_s24 = scalar_lea.hbm %s4482_s5, %s2836_s20  ;;  %s3033_s21 = scalar_lea.hbm %s4482_s5, 40 }
  0x1d   : > { %s279_s25 = sshll.u32 %s278_s24, 4  ;;  %s280_s25 = int_to_ptr.hbm [resolvable:$true] %s279_s25 }
  0x1e   : > { %s3026_s14 = sshra.s32 %s280_s25, 4  ;;  %s3027_s14 = int_to_ptr.hbm [resolvable:$true] %s3026_s14 }
  0x1f   : > { %s3028_s29 = scalar_lea.hbm %s3027_s14, 8  ;;  %p3034_p5 = scmp.lt.s32.totalorder %s3027_s14, %s4482_s5 }
  0x20   : > { %p3029_p1 = scmp.ne.s32.totalorder %s3027_s14, %s3028_s29  ;;  %p3035_p7 = scmp.lt.s32.totalorder %s3033_s21, %s3028_s29 }
  0x22   : > { %p3031_p3 = pnand %p3030_p2, %p3029_p1  ;;  %p3036_p8 = por %p3035_p7, %p3034_p5 }
  0x24   : > { %p3032_p4 = pneg %p3031_p3 }
  0x26   : > { %p3037_p9 = pnand %p3036_p8, %p3032_p4 }
  0x28   : > { %3040 = shalt.err (!%p3037_p9)
}
  0x29   : > { %s3158_s24 = smov 64   ;;  %s3159_s26 = smov 4  }
  0x2a   : > { %2882 = dma.hbm_to_vmem [thread:$0]  (!%p3280_p12), %s280_s25, 128, %s282_s10, %s270_s13, %s3158_s24, %s3158_s24, %s3159_s26  }
  0x2b   : > { %p3304_p1 = pnand %p2589_p13, %p319_p0  ;;  %s2870_s29 = smul.u32 224, %s3271_s19 }
  0x2c   : > { %s2871_s14 = smul.u32 224, %s3156_s30  ;;  %s292_s18 = scalar_lea.sflag [#allocation8], %s3271_s19 }
  0x2d   : > { %s295_s23 = scalar_lea.vmem [#allocation7], %s2870_s29  ;;  %s3063_s30 = scalar_lea.hbm %s4462_s6, 1120 }
  0x2e   : > { %s300_s22 = scalar_lea.hbm %s4462_s6, %s2871_s14  ;;  %s303_s5 = sshll.u32 %s295_s23, 4  ;;  %s304_s5 = int_to_ptr.vmem [resolvable:$true] %s303_s5 }
  0x2f   : > { %s301_s11 = sshll.u32 %s300_s22, 4  ;;  %s302_s11 = int_to_ptr.hbm [resolvable:$true] %s301_s11 }
  0x30   : > { %s3056_s27 = sshra.s32 %s302_s11, 4  ;;  %s3057_s27 = int_to_ptr.hbm [resolvable:$true] %s3056_s27 }
  0x31   : > { %s3058_s25 = scalar_lea.hbm %s3057_s27, 224  ;;  %p3064_p4 = scmp.lt.s32.totalorder %s3057_s27, %s4462_s6 }
  0x32   : > { %p3059_p3 = scmp.ne.s32.totalorder %s3057_s27, %s3058_s25  ;;  %p3065_p5 = scmp.lt.s32.totalorder %s3063_s30, %s3058_s25 }
  0x34   : > { %p3061_p13 = pnand %p3059_p3, %p3030_p2  ;;  %p3066_p7 = por %p3065_p5, %p3064_p4 }
  0x36   : > { %p3062_p0 = pneg %p3061_p13 }
  0x38   : > { %p3067_p8 = pnand %p3066_p7, %p3062_p0 }
  0x3a   : > { %3070 = shalt.err (!%p3067_p8)
}
  0x3b   : > { %2885 = dma.hbm_to_vmem [thread:$0]  (!%p3280_p12), %s302_s11, 3584, %s304_s5, %s292_s18, %s3158_s24, %s3158_s24, %s3159_s26  }
  0x3c   : > { %323 = sbr.rel (%p3304_p1) target bundleno = 2954 (0xb8a), region = 52  ;;  %s3328_s19 = sand.u32 (!%p3304_p1), 1, %s3148_s28  }
  0x3d   : > { %s2590_s29 = sshll.u32 (!%p3304_p1), %s3328_s19, 3  ;;  %s326_s21 = scalar_lea.sflag (!%p3304_p1), [#allocation5], %s3328_s19 }
  0x3e   : > { %s3332_s22 = scalar_lea.vmem (!%p3304_p1), [#allocation4], %s2590_s29 }
  0x41   : > { %3131 = dma.done.wait (%p3256_p6), %s326_s21, 128  }
  0x42   : > { %3133 = vsyncadd (%p3256_p6), %s326_s21, 4294967168  ;;  %s2872_s5 = smul.u32 224, %s3328_s19  ;;  %s336_s27 = scalar_lea.sflag [#allocation8], %s3328_s19 }
  0x44   : > { %s3340_s30 = scalar_lea.vmem [#allocation7], %s2872_s5 }
  0x45   : > { %3135 = dma.done.wait (%p3256_p6), %s336_s27, 3584  }
  0x46   : > { %3137 = vsyncadd (%p3256_p6), %s336_s27, 4294963712  ;;  %p383_p12 = scmp.lt.s32.totalorder %s3234_s9, 4  ;;  %s3353_s15 = scalar_lea.vmem [#allocation9], %s2590_s29 }
  0x47   : > { %p2594_p2 = scmp.ne.s32.totalorder %s3234_s9, 0 }
  0x48   : > { %s384_s11 = scalar_select %p383_p12, %s3234_s9, 4 }
  0x49   : > { %392 = sbr.rel (%p2594_p2) target bundleno = 523 (0x20b), region = 64 }
  0x4a   : > { %s2837_s18 = sshll.u32 %s384_s11, 4 }
  0x4b   : > { %s3351_s26 = scalar_lea.vmem %s4463_s7, %s2837_s18 }
  0x4e   : > { %v3160_v0 = vmov 0   ;;  %v3360_v1 = vld [vmem:[%s4456_s0] sm:$0xff]  ;;  %v3161_v2 = vmov 5.0   ;;  %v3366_v3 = vld [vmem:[%s4456_s0 + $0x10] sm:$0xff]  ;;  %v394_v7 = vld [vmem:[%s4456_s0 + $0x8] sm:$0xff] }
  0x4f   : > { %2934 = vset.pattern.permute.xlu0 %v3160_v0  ;;  %2938 = vrcp.f32 %v3161_v2  ;;  %2935 = vset.pattern.permute.xlu1 %v3160_v0  ;;  %v397_v4 = vld [vmem:[%s4456_s0 + $0x20] sm:$0xff]  ;;  %v396_v8 = vld [vmem:[%s4456_s0 + $0x18] sm:$0xff]  ;;  %v398_v10 = vld [vmem:[%s4456_s0 + $0x28] sm:$0xff]  ;;  %v474_v12 = vmul.f32 3.1415927, %v3360_v1 }
  0x50   : > { %403 = vperm.xlu0 %2934, %v3360_v1   ;;  %413 = vperm.xlu1 %2935, %v3366_v3   ;;  %v476_v13 = vmul.f32 3.1415927, %v3366_v3  ;;  %v475_v15 = vmul.f32 3.1415927, %v394_v7  ;;  %v477_v16 = vmul.f32 3.1415927, %v396_v8 }
  0x51   : > { %2936 = vset.pattern.permute.xlu2 %v3160_v0  ;;  %v399_v17 = vld [vmem:[%s4456_s0 + $0x30] sm:$0xff]  ;;  %v478_v22 = vmul.f32 3.1415927, %v397_v4  ;;  %v479_v29 = vmul.f32 3.1415927, %v398_v10 }
  0x52   : > { %423 = vperm.xlu2 %2936, %v397_v4   ;;  %v480_v21 = vmul.f32 3.1415927, %v399_v17  ;;  %v3162_v57 = vmov 683565275   ;;  %v3163_v62 = vmov 2475754826  }
  0x55   : > { %v2939_v5 = vpop.eup %2938 }
  0x56   : > { %v482_v6 = vmul.f32 5.0, %v2939_v5  ;;  %vm486_vm0 = vweird.f32 %v2939_v5 }
  0x58   : > { %v483_v9 = vsub.f32 1.0, %v482_v6  ;;  %408 = vperm.xlu0 %2934, %v394_v7   ;;  %418 = vperm.xlu1 %2935, %v396_v8   ;;  %v3164_v6 = vmov 2131351028  }
  0x5a   : > { %v484_v11 = vmul.f32 %v2939_v5, %v483_v9  ;;  %428 = vperm.xlu2 %2936, %v398_v10   ;;  %v3165_v10 = vmov 2102212464  }
  0x5c   : > { %v485_v14 = vadd.f32 %v2939_v5, %v484_v11 }
  0x5e   : > { %v487_v18 = vsel %vm486_vm0, %v2939_v5, %v485_v14 }
  0x5f   : > { %v3388_v19 = vmul.f32 %v487_v18, %v474_v12  ;;  %v3390_v20 = vmul.f32 %v487_v18, %v476_v13  ;;  %v3394_v25 = vmul.f32 %v487_v18, %v475_v15  ;;  %v3396_v26 = vmul.f32 %v487_v18, %v477_v16 }
  0x60   : > { %433 = vperm.xlu0 %2934, %v399_v17   ;;  %v3398_v30 = vmul.f32 %v487_v18, %v480_v21  ;;  %v3400_v31 = vmul.f32 %v487_v18, %v478_v22  ;;  %v3404_v37 = vmul.f32 %v487_v18, %v479_v29  ;;  %v3166_v15 = vmov 920167782  }
  0x61   : > { %v498_v23 = vand.u32 2139095040, %v3388_v19  ;;  %v806_v24 = vand.u32 2139095040, %v3390_v20  ;;  %v652_v34 = vand.u32 2139095040, %v3394_v25  ;;  %v960_v35 = vand.u32 2139095040, %v3396_v26 }
  0x62   : > { %v1422_v39 = vand.u32 2139095040, %v3398_v30  ;;  %v1114_v40 = vand.u32 2139095040, %v3400_v31  ;;  %v1268_v45 = vand.u32 2139095040, %v3404_v37  ;;  %v803_v48 = vand.u32 2147483647, %v3390_v20 }
  0x63   : > { %v499_v27 = vshrl.u32 %v498_v23, 23  ;;  %v807_v28 = vshrl.u32 %v806_v24, 23  ;;  %v653_v41 = vshrl.u32 %v652_v34, 23  ;;  %v961_v42 = vshrl.u32 %v960_v35, 23 }
  0x64   : > { %v1423_v46 = vshrl.u32 %v1422_v39, 23  ;;  %v1115_v47 = vshrl.u32 %v1114_v40, 23  ;;  %v3410_v53 = vshrl.u32 %v1268_v45, 23  ;;  %v810_v56 = vand.u32 8388607, %v803_v48 }
  0x65   : > { %v2595_v32 = vadd.s32 4294967169, %v499_v27  ;;  %v2601_v33 = vadd.s32 4294967169, %v807_v28  ;;  %v2598_v50 = vadd.s32 4294967169, %v653_v41  ;;  %v2604_v51 = vadd.s32 4294967169, %v961_v42 }
  0x66   : > { %v3412_v54 = vadd.s32 4294967169, %v1423_v46  ;;  %v3414_v55 = vadd.s32 4294967169, %v1115_v47  ;;  %v811_v13 = vor.u32 8388608, %v810_v56  ;;  %v3167_v21 = vmov 1326507024  }
  0x67   : > { %v813_v36 = vadd.s32 1, %v2601_v33  ;;  %v505_v38 = vadd.s32 1, %v2595_v32  ;;  %v3419_v60 = vadd.s32 1, %v2598_v50  ;;  %v3421_v61 = vadd.s32 1, %v2604_v51 }
  0x68   : > { %v3436_v35 = vshll.u32 %v811_v13, 8 }
  0x69   : > { %vm814_vm1 = vcmp.gt.s32.totalorder %v813_v36, 0  ;;  %vm506_vm2 = vcmp.gt.s32.totalorder %v505_v38, 0  ;;  %vm660_vm15 = vcmp.gt.s32.totalorder %v3419_v60, 0 }
  0x6a   : > { %v815_v43 = vsel %vm814_vm1, %v813_v36, 0  ;;  %v507_v52 = vsel %vm506_vm2, %v505_v38, 0  ;;  %v495_v36 = vand.u32 2147483647, %v3388_v19  ;;  %v853_v45 = vshrl.u32 %v3436_v35, 16 }
  0x6b   : > { %v817_v44 = vand.u32 31, %v815_v43  ;;  %v816_v59 = vshrl.u32 %v815_v43, 5  ;;  %v3424_v2 = vand.u32 31, %v507_v52  ;;  %v3439_v38 = vshrl.u32 %v507_v52, 5 }
  0x6c   : > { %vm968_vm1 = vcmp.gt.s32.totalorder %v3421_v61, 0 }
  0x6d   : > { %v818_v49 = vsub.s32 32, %v817_v44  ;;  %v820_v58 = vshll.u32 %v3162_v57, %v817_v44  ;;  %v823_v5 = vshll.u32 %v3163_v62, %v817_v44  ;;  %v826_v9 = vshll.u32 %v3164_v6, %v817_v44 }
  0x6e   : > { %v829_v12 = vshll.u32 %v3165_v10, %v817_v44  ;;  %v832_v17 = vshll.u32 %v3166_v15, %v817_v44  ;;  %vm835_vm3 = vcmp.lt.s32.totalorder %v816_v59, 1  ;;  %vm836_vm4 = vcmp.lt.s32.totalorder %v816_v59, 2 }
  0x6f   : > { %v821_v63 = vshrl.u32 %v3163_v62, %v818_v49  ;;  %v819_v4 = vshrl.u32 %v3162_v57, %v818_v49  ;;  %v824_v7 = vshrl.u32 %v3164_v6, %v818_v49  ;;  %v827_v11 = vshrl.u32 %v3165_v10, %v818_v49 }
  0x70   : > { %v830_v16 = vshrl.u32 %v3166_v15, %v818_v49  ;;  %v833_v22 = vshrl.u32 %v3167_v21, %v818_v49  ;;  %vm837_vm5 = vcmp.lt.s32.totalorder %v816_v59, 3  ;;  %vm838_vm6 = vcmp.lt.s32.totalorder %v816_v59, 4 }
  0x71   : > { %v822_v8 = vor.u32 %v821_v63, %v820_v58  ;;  %v825_v14 = vor.u32 %v824_v7, %v823_v5  ;;  %v828_v18 = vor.u32 %v827_v11, %v826_v9  ;;  %v852_v44 = vand.u32 65535, %v3436_v35 }
  0x72   : > { %v831_v23 = vor.u32 %v830_v16, %v829_v12  ;;  %v834_v27 = vor.u32 %v833_v22, %v832_v17  ;;  %v3450_v46 = vsub.s32 32, %v3424_v2  ;;  %v3457_v58 = vand.u32 8388607, %v495_v36 }
  0x73   : > { %v839_v24 = vsel %vm835_vm3, %v819_v4, %v822_v8  ;;  %v840_v28 = vsel %vm838_vm6, %v828_v18, 2102212464  ;;  %v843_v29 = vsel %vm835_vm3, %v822_v8, %v825_v14  ;;  %v847_v32 = vsel %vm835_vm3, %v825_v14, %v828_v18 }
  0x74   : > { %v841_v33 = vsel %vm837_vm5, %v825_v14, %v840_v28  ;;  %v844_v34 = vsel %vm838_vm6, %v831_v23, 920167782  ;;  %v848_v41 = vsel %vm838_vm6, %v834_v27, 1326507024  ;;  %v512_v7 = vshll.u32 %v3162_v57, %v3424_v2 }
  0x75   : > { %v3442_v39 = vsel %vm836_vm4, %v839_v24, %v841_v33  ;;  %v845_v40 = vsel %vm837_vm5, %v828_v18, %v844_v34  ;;  %v849_v43 = vsel %vm837_vm5, %v831_v23, %v848_v41  ;;  %v513_v28 = vshrl.u32 %v3163_v62, %v3450_v46 }
  0x76   : > { %v846_v42 = vsel %vm836_vm4, %v843_v29, %v845_v40  ;;  %v850_v47 = vsel %vm836_vm4, %v847_v32, %v849_v43  ;;  %v896_v56 = vmul.u32 %v3436_v35, %v3442_v39  ;;  %v515_v33 = vshll.u32 %v3163_v62, %v3424_v2 }
  0x77   : > { %v876_v49 = vand.u32 65535, %v846_v42  ;;  %v877_v50 = vshrl.u32 %v846_v42, 16  ;;  %v854_v51 = vand.u32 65535, %v850_v47  ;;  %v855_v52 = vshrl.u32 %v850_v47, 16 }
  0x78   : > { %vm527_vm11 = vcmp.lt.s32.totalorder %v3439_v38, 1  ;;  %vm529_vm12 = vcmp.lt.s32.totalorder %v3439_v38, 3  ;;  %vm528_vm13 = vcmp.lt.s32.totalorder %v3439_v38, 2  ;;  %vm530_vm14 = vcmp.lt.s32.totalorder %v3439_v38, 4 }
  0x79   : > { %v878_v63 = vmul.u32 %v876_v49, %v852_v44  ;;  %v879_v4 = vmul.u32 %v877_v50, %v852_v44  ;;  %v880_v5 = vmul.u32 %v876_v49, %v853_v45  ;;  %v856_v8 = vmul.u32 %v854_v51, %v852_v44 }
  0x7a   : > { %v857_v59 = vmul.u32 %v855_v52, %v852_v44  ;;  %v858_v9 = vmul.u32 %v854_v51, %v853_v45  ;;  %v881_v11 = vmul.u32 %v877_v50, %v853_v45  ;;  %v859_v12 = vmul.u32 %v855_v52, %v853_v45 }
  0x7b   : > { %v882_v13 = vshll.u32 %v879_v4, 16  ;;  %v883_v14 = vshrl.u32 %v879_v4, 16  ;;  %v884_v16 = vshll.u32 %v880_v5, 16  ;;  %v885_v23 = vshrl.u32 %v880_v5, 16 }
  0x7c   : > { %v860_v17 = vshll.u32 %v857_v59, 16  ;;  %v861_v18 = vshrl.u32 %v857_v59, 16  ;;  %v862_v22 = vshll.u32 %v858_v9, 16  ;;  %v863_v24 = vshrl.u32 %v858_v9, 16 }
  0x7d   : > { %vm886_vm7 = vc.u32 %v878_v63, %v882_v13  ;;  %v888_v27 = vadd.s32 %v882_v13, %v878_v63  ;;  %v3470_v44 = vor.u32 %v513_v28, %v512_v7  ;;  %v516_v49 = vshrl.u32 %v3164_v6, %v3450_v46 }
  0x7e   : > { %vm864_vm8 = vc.u32 %v856_v8, %v860_v17  ;;  %v866_v29 = vadd.s32 %v860_v17, %v856_v8  ;;  %v887_v32 = vsel %vm886_vm7, 1, %v3160_v0  ;;  %v518_v50 = vshll.u32 %v3164_v6, %v3424_v2 }
  0x7f   : > { %v865_v34 = vsel %vm864_vm8, 1, %v3160_v0  ;;  %v889_v40 = vadd.s32 %v887_v32, %v881_v11  ;;  %vm890_vm9 = vc.u32 %v888_v27, %v884_v16  ;;  %v3467_v41 = vadd.s32 %v888_v27, %v884_v16 }
  0x80   : > { %v867_v42 = vadd.s32 %v865_v34, %v859_v12  ;;  %vm868_vm10 = vc.u32 %v866_v29, %v862_v22  ;;  %v891_v43 = vsel %vm890_vm9, 1, %v3160_v0  ;;  %v519_v52 = vshrl.u32 %v3165_v10, %v3450_v46 }
  0x81   : > { %v869_v45 = vsel %vm868_vm10, 1, %v3160_v0  ;;  %v893_v47 = vadd.s32 %v891_v43, %v889_v40  ;;  %v521_v63 = vshll.u32 %v3165_v10, %v3424_v2  ;;  %v522_v4 = vshrl.u32 %v3166_v15, %v3450_v46 }
  0x82   : > { %v871_v51 = vadd.s32 %v869_v45, %v867_v42  ;;  %v517_v7 = vor.u32 %v516_v49, %v515_v33  ;;  %v524_v8 = vshll.u32 %v3166_v15, %v3424_v2  ;;  %v525_v59 = vshrl.u32 %v3167_v21, %v3450_v46 }
  0x83   : > { %v894_v5 = vadd.s32 %v893_v47, %v883_v14  ;;  %v520_v11 = vor.u32 %v519_v52, %v518_v50  ;;  %v523_v12 = vor.u32 %v522_v4, %v521_v63  ;;  %v503_v16 = vor.u32 8388608, %v3457_v58 }
  0x84   : > { %v872_v9 = vadd.s32 %v871_v51, %v861_v18  ;;  %v526_v17 = vor.u32 %v525_v59, %v524_v8  ;;  %v535_v2 = vsel %vm527_vm11, %v3470_v44, %v517_v7  ;;  %v2610_v14 = vadd.s32 4294967169, %v3410_v53 }
  0x85   : > { %v895_v13 = vadd.s32 %v894_v5, %v885_v23  ;;  %v536_v58 = vsel %vm530_vm14, %v523_v12, 920167782  ;;  %v3502_v23 = vadd.s32 1, %v3412_v54  ;;  %v539_v27 = vsel %vm527_vm11, %v517_v7, %v520_v11 }
  0x86   : > { %v3490_v22 = vadd.s32 %v872_v9, %v863_v24  ;;  %v537_v24 = vsel %vm529_vm12, %v520_v11, %v536_v58  ;;  %v540_v29 = vsel %vm530_vm14, %v526_v17, 1326507024  ;;  %v661_v54 = vsel %vm660_vm15, %v3419_v60, 0 }
  0x87   : > { %v899_v18 = vadd.s32 1, %v895_v13  ;;  %v538_v53 = vsel %vm528_vm13, %v535_v2, %v537_v24  ;;  %v541_v33 = vsel %vm529_vm12, %v523_v12, %v540_v29  ;;  %v3521_v34 = vshll.u32 %v503_v16, 8 }
  0x88   : > { %vm898_vm0 = vc.u32 %v3490_v22, %v3467_v41  ;;  %v511_v40 = vshrl.u32 %v3162_v57, %v3450_v46  ;;  %v542_v42 = vsel %vm528_vm13, %v539_v27, %v541_v33  ;;  %v568_v43 = vand.u32 65535, %v538_v53 }
  0x89   : > { %v900_v28 = vsel %vm898_vm0, %v899_v18, %v895_v13  ;;  %v569_v45 = vshrl.u32 %v538_v53, 16  ;;  %v544_v60 = vand.u32 65535, %v3521_v34  ;;  %v545_v49 = vshrl.u32 %v3521_v34, 16 }
  0x8a   : > { %v901_v32 = vadd.s32 %v900_v28, %v896_v56  ;;  %v546_v35 = vand.u32 65535, %v542_v42  ;;  %v3530_v39 = vadd.s32 1, %v3414_v55  ;;  %v1275_v56 = vadd.s32 1, %v2610_v14 }
  0x8b   : > { %v532_v50 = vsel %vm530_vm14, %v520_v11, 2102212464  ;;  %v547_v51 = vshrl.u32 %v542_v42, 16  ;;  %v3534_v46 = vshrl.u32 %v661_v54, 5  ;;  %v3539_v52 = vsel %vm968_vm1, %v3421_v61, 0 }
  0x8c   : > { %v902_v47 = vadd.s32 536870912, %v901_v32  ;;  %v550_v4 = vmul.u32 %v546_v35, %v545_v49  ;;  %v3543_v5 = vand.u32 31, %v661_v54  ;;  %v548_v8 = vmul.u32 %v546_v35, %v544_v60 }
  0x8d   : > { %v549_v55 = vmul.u32 %v547_v51, %v544_v60  ;;  %v571_v59 = vmul.u32 %v569_v45, %v544_v60  ;;  %v531_v11 = vsel %vm527_vm11, %v511_v40, %v3470_v44  ;;  %v533_v12 = vsel %vm529_vm12, %v517_v7, %v532_v50 }
  0x8e   : > { %v3541_v63 = vshrl.u32 %v902_v47, 30  ;;  %v570_v13 = vmul.u32 %v568_v43, %v544_v60  ;;  %v551_v61 = vmul.u32 %v547_v51, %v545_v49  ;;  %v554_v17 = vshll.u32 %v550_v4, 16 }
  0x8f   : > { %v552_v16 = vshll.u32 %v549_v55, 16  ;;  %v572_v2 = vmul.u32 %v568_v43, %v545_v49  ;;  %v3552_v14 = vshrl.u32 %v3539_v52, 5  ;;  %vm1276_vm2 = vcmp.gt.s32.totalorder %v1275_v56, 0 }
  0x90   : > { %v904_v9 = vshll.u32 %v3541_v63, 30  ;;  %v574_v58 = vshll.u32 %v571_v59, 16  ;;  %v3556_v24 = vsel %vm528_vm13, %v531_v11, %v533_v12  ;;  %v573_v27 = vmul.u32 %v569_v45, %v545_v49 }
  0x91   : > { %vm556_vm3 = vc.u32 %v548_v8, %v552_v16  ;;  %v558_v44 = vadd.s32 %v552_v16, %v548_v8  ;;  %v576_v53 = vshll.u32 %v572_v2, 16  ;;  %v553_v29 = vshrl.u32 %v549_v55, 16 }
  0x92   : > { %v905_v18 = vsub.s32 %v901_v32, %v904_v9  ;;  %v557_v28 = vsel %vm556_vm3, 1, %v3160_v0  ;;  %vm578_vm6 = vc.u32 %v570_v13, %v574_v58  ;;  %v580_v38 = vadd.s32 %v574_v58, %v570_v13 }
  0x93   : > { %v559_v54 = vadd.s32 %v557_v28, %v551_v61  ;;  %vm560_vm5 = vc.u32 %v558_v44, %v554_v17  ;;  %v579_v40 = vsel %vm578_vm6, 1, %v3160_v0  ;;  %v555_v43 = vshrl.u32 %v550_v4, 16 }
  0x94   : > { %vm906_vm4 = vcmp.lt.s32.totalorder %v905_v18, 0  ;;  %v907_v7 = vsub.s32 0, %v905_v18  ;;  %v561_v32 = vsel %vm560_vm5, 1, %v3160_v0  ;;  %v581_v60 = vadd.s32 %v579_v40, %v573_v27 }
  0x95   : > { %v563_v47 = vadd.s32 %v561_v32, %v559_v54  ;;  %v3562_v45 = vsub.s32 32, %v3543_v5  ;;  %v1277_v49 = vsel %vm1276_vm2, %v1275_v56, 0  ;;  %v575_v35 = vshrl.u32 %v571_v59, 16 }
  0x96   : > { %v908_v33 = vsel %vm906_vm4, %v907_v7, %v905_v18  ;;  %vm582_vm7 = vc.u32 %v580_v38, %v576_v53  ;;  %v897_v50 = vadd.s32 %v3467_v41, %v3490_v22  ;;  %v577_v9 = vshrl.u32 %v572_v2, 16 }
  0x97   : > { %v909_v42 = vclz %v908_v33  ;;  %v564_v8 = vadd.s32 %v563_v47, %v553_v29  ;;  %v583_v55 = vsel %vm582_vm7, 1, %v3160_v0  ;;  %v588_v4 = vmul.u32 %v3521_v34, %v3556_v24 }
  0x98   : > { %v585_v11 = vadd.s32 %v583_v55, %v581_v60  ;;  %v649_v12 = vand.u32 2147483647, %v3394_v25  ;;  %v3573_v56 = vadd.s32 %v580_v38, %v576_v53  ;;  %v669_v59 = vshll.u32 %v3163_v62, %v3543_v5 }
  0x99   : > { %v2602_v51 = vadd.s32 4294967294, %v909_v42  ;;  %v3571_v13 = vadd.s32 %v564_v8, %v555_v43  ;;  %v670_v61 = vshrl.u32 %v3164_v6, %v3562_v45  ;;  %v672_v16 = vshll.u32 %v3164_v6, %v3543_v5 }
  0x9a   : > { %v586_v22 = vadd.s32 %v585_v11, %v575_v35  ;;  %v673_v58 = vshrl.u32 %v3165_v10, %v3562_v45  ;;  %v656_v44 = vand.u32 8388607, %v649_v12  ;;  %v666_v27 = vshll.u32 %v3162_v57, %v3543_v5 }
  0x9b   : > { %vm2603_vm8 = vcmp.lt.s32.totalorder %v2602_v51, 0  ;;  %v667_v7 = vshrl.u32 %v3163_v62, %v3562_v45  ;;  %vm805_vm9 = vcmp.lt.s32.totalorder %v3390_v20, 0  ;;  %vm590_vm10 = vc.u32 %v3571_v13, %v3573_v56 }
  0x9c   : > { %v912_v41 = vsel %vm2603_vm8, 0, %v2602_v51  ;;  %v587_v24 = vadd.s32 %v586_v22, %v577_v9  ;;  %v676_v54 = vshrl.u32 %v3166_v15, %v3562_v45  ;;  %v678_v33 = vshll.u32 %v3166_v15, %v3543_v5 }
  0x9d   : > { %v913_v17 = vsub.s32 32, %v912_v41  ;;  %v914_v34 = vshll.u32 %v905_v18, %v912_v41  ;;  %v917_v2 = vsub.s32 4294967266, %v912_v41  ;;  %v675_v18 = vshll.u32 %v3165_v10, %v3543_v5 }
  0x9e   : > { %v591_v29 = vadd.s32 1, %v587_v24  ;;  %v679_v32 = vshrl.u32 %v3167_v21, %v3562_v45  ;;  %vm3602_vm11 = vcmp.le.f32.partialorder %v803_v48, 0.7853982  ;;  %v671_v43 = vor.u32 %v670_v61, %v669_v59 }
  0x9f   : > { %v915_v28 = vshrl.u32 %v897_v50, %v913_v17  ;;  %v918_v53 = vadd.s32 127, %v917_v2  ;;  %v674_v47 = vor.u32 %v673_v58, %v672_v16  ;;  %v677_v35 = vor.u32 %v676_v54, %v675_v18 }
  0xa0   : > { %v592_v60 = vsel %vm590_vm10, %v591_v29, %v587_v24  ;;  %v680_v50 = vor.u32 %v679_v32, %v678_v33  ;;  %vm681_vm12 = vcmp.lt.s32.totalorder %v3534_v46, 1  ;;  %vm684_vm13 = vcmp.lt.s32.totalorder %v3534_v46, 4 }
  0xa1   : > { %v916_v38 = vor.u32 %v915_v28, %v914_v34  ;;  %v919_v42 = vshll.u32 %v918_v53, 23  ;;  %v593_v8 = vadd.s32 %v592_v60, %v588_v4  ;;  %v927_v55 = vsub.s32 4, %v3541_v63 }
  0xa2   : > { %v657_v48 = vor.u32 8388608, %v656_v44  ;;  %v668_v9 = vor.u32 %v667_v7, %v666_v27  ;;  %vm683_vm14 = vcmp.lt.s32.totalorder %v3534_v46, 3  ;;  %v3611_v11 = vand.u32 31, %v3539_v52 }
  0xa3   : > { %v920_v51 = vor.u32 4788187, %v919_v42  ;;  %v923_v5 = vcvt.s32.f32 %v916_v38  ;;  %v594_v41 = vadd.s32 536870912, %v593_v8  ;;  %vm682_vm15 = vcmp.lt.s32.totalorder %v3534_v46, 2 }
  0xa4   : > { %v3614_v22 = vshrl.u32 %v1277_v49, 5  ;;  %v690_v4 = vsel %vm684_vm13, %v677_v35, 920167782  ;;  %v693_v61 = vsel %vm681_vm12, %v671_v43, %v674_v47  ;;  %v694_v16 = vsel %vm684_vm13, %v680_v50, 1326507024 }
  0xa5   : > { %v921_v59 = vand.u32 2147483647, %v920_v51  ;;  %v3622_v17 = vand.u32 31, %v1277_v49  ;;  %v3624_v52 = vshrl.u32 %v594_v41, 30  ;;  %v695_v2 = vsel %vm683_vm14, %v677_v35, %v694_v16 }
  0xa6   : > { %v928_v58 = vsel %vm805_vm9, %v927_v55, %v3541_v63  ;;  %v689_v24 = vsel %vm681_vm12, %v668_v9, %v671_v43  ;;  %v696_v44 = vsel %vm682_vm15, %v693_v61, %v695_v2  ;;  %v3635_v27 = vshll.u32 %v657_v48, 8 }
  0xa7   : > { %v924_v34 = vmul.f32 %v923_v5, %v921_v59  ;;  %v596_v7 = vshll.u32 %v3624_v52, 30  ;;  %v691_v28 = vsel %vm683_vm14, %v674_v47, %v690_v4  ;;  %v700_v53 = vand.u32 65535, %v696_v44 }
  0xa8   : > { %v665_v18 = vshrl.u32 %v3162_v57, %v3562_v45  ;;  %v698_v63 = vand.u32 65535, %v3635_v27  ;;  %v3644_v29 = vshrl.u32 %v3635_v27, 16  ;;  %v701_v54 = vshrl.u32 %v696_v44, 16 }
  0xa9   : > { %v925_v49 = vxor.u32 2147483648, %v924_v34  ;;  %v930_v32 = vsel %vm3602_vm11, 0, %v928_v58  ;;  %v3650_v38 = vsub.s32 %v593_v8, %v596_v7  ;;  %v686_v42 = vsel %vm684_vm13, %v674_v47, 2102212464 }
  0xaa   : > { %v3655_v60 = vsub.s32 32, %v3622_v17  ;;  %v692_v35 = vsel %vm682_vm15, %v689_v24, %v691_v28  ;;  %v702_v50 = vmul.u32 %v700_v53, %v698_v63  ;;  %v3668_v47 = vmul.u32 %v701_v54, %v698_v63 }
  0xab   : > { %v926_v33 = vsel %vm805_vm9, %v925_v49, %v924_v34  ;;  %vm598_vm0 = vcmp.lt.s32.totalorder %v3650_v38, 0  ;;  %v599_v5 = vsub.s32 0, %v3650_v38  ;;  %v3670_v8 = vand.u32 3, %v930_v32 }
  0xac   : > { %v3660_v45 = vsel %vm3602_vm11, %v3390_v20, %v926_v33  ;;  %v685_v40 = vsel %vm681_vm12, %v665_v18, %v668_v9  ;;  %v687_v55 = vsel %vm683_vm14, %v671_v43, %v686_v42  ;;  %v3677_v48 = vmul.u32 %v700_v53, %v3644_v29 }
  0xad   : > { %v931_v51 = vmul.f32 %v3660_v45, %v3660_v45  ;;  %v600_v4 = vsel %vm598_vm0, %v599_v5, %v3650_v38  ;;  %v706_v61 = vshll.u32 %v3668_v47, 16  ;;  %vm497_vm1 = vcmp.lt.s32.totalorder %v3388_v19, 0 }
  0xae   : > { %v601_v16 = vclz %v600_v4  ;;  %v705_v34 = vmul.u32 %v701_v54, %v3644_v29  ;;  %v708_v2 = vshll.u32 %v3677_v48, 16  ;;  %v723_v9 = vshrl.u32 %v692_v35, 16 }
  0xaf   : > { %v932_v59 = vmul.f32 -0.001358992, %v931_v51  ;;  %v939_v41 = vmul.f32 -0.00019511016, %v931_v51  ;;  %vm710_vm2 = vc.u32 %v702_v50, %v706_v61  ;;  %v712_v43 = vadd.s32 %v706_v61, %v702_v50 }
  0xb0   : > { %vm952_vm3 = vcmp.eq.s32.totalorder %v3670_v8, 2  ;;  %v589_v44 = vadd.s32 %v3573_v56, %v3571_v13  ;;  %v2596_v49 = vadd.s32 4294967294, %v601_v16  ;;  %v711_v7 = vsel %vm710_vm2, 1, %v3160_v0 }
  0xb1   : > { %v933_v58 = vadd.f32 0.041655596, %v932_v59  ;;  %v940_v24 = vadd.f32 0.008332121, %v939_v41  ;;  %v722_v28 = vand.u32 65535, %v692_v35  ;;  %v3690_v54 = vsel %vm682_vm15, %v685_v40, %v687_v55 }
  0xb2   : > { %vm714_vm4 = vc.u32 %v712_v43, %v708_v2  ;;  %vm949_vm5 = vcmp.eq.s32.totalorder %v3670_v8, 0  ;;  %vm2597_vm6 = vcmp.lt.s32.totalorder %v2596_v49, 0  ;;  %v619_v33 = vsub.s32 4, %v3624_v52 }
  0xb3   : > { %v934_v53 = vmul.f32 %v933_v58, %v931_v51  ;;  %v941_v18 = vmul.f32 %v940_v24, %v931_v51  ;;  %v713_v32 = vadd.s32 %v711_v7, %v705_v34  ;;  %v725_v42 = vmul.u32 %v723_v9, %v698_v63 }
  0xb4   : > { %vm948_vm7 = vcmp.lt.s32.totalorder %v3670_v8, 2  ;;  %v604_v56 = vsel %vm2597_vm6, 0, %v2596_v49  ;;  %v715_v35 = vsel %vm714_vm4, 1, %v3160_v0  ;;  %vm946_vm8 = vweird.f32 %v3390_v20 }
  0xb5   : > { %v935_v50 = vadd.f32 -0.4999988, %v934_v53  ;;  %v942_v13 = vadd.f32 -0.16666654, %v941_v18  ;;  %vm3699_vm9 = vcmp.le.f32.partialorder %v495_v36, 0.7853982  ;;  %v606_v40 = vshll.u32 %v3650_v38, %v604_v56 }
  0xb6   : > { %v605_v5 = vsub.s32 32, %v604_v56  ;;  %v609_v55 = vsub.s32 4294967266, %v604_v56  ;;  %v726_v59 = vmul.u32 %v722_v28, %v3644_v29  ;;  %v707_v61 = vshrl.u32 %v3668_v47, 16 }
  0xb7   : > { %v936_v41 = vmul.f32 %v935_v50, %v931_v51  ;;  %v943_v4 = vmul.f32 %v942_v13, %v931_v51  ;;  %v724_v16 = vmul.u32 %v722_v28, %v698_v63  ;;  %v717_v58 = vadd.s32 %v715_v35, %v713_v32 }
  0xb8   : > { %v607_v34 = vshrl.u32 %v589_v44, %v605_v5  ;;  %v610_v2 = vadd.s32 127, %v609_v55  ;;  %v728_v24 = vshll.u32 %v725_v42, 16  ;;  %v3709_v49 = vsel %vm497_vm1, %v619_v33, %v3624_v52 }
  0xb9   : > { %v937_v43 = vadd.f32 1.0, %v936_v41  ;;  %v944_v36 = vadd.f32 1.0, %v943_v4  ;;  %v727_v38 = vmul.u32 %v723_v9, %v3644_v29  ;;  %v709_v51 = vshrl.u32 %v3677_v48, 16 }
  0xba   : > { %v608_v7 = vor.u32 %v607_v34, %v606_v40  ;;  %v611_v53 = vshll.u32 %v610_v2, 23  ;;  %v730_v18 = vshll.u32 %v726_v59, 16  ;;  %vm732_vm10 = vc.u32 %v724_v16, %v728_v24 }
  0xbb   : > { %v945_v63 = vmul.f32 %v944_v36, %v3660_v45  ;;  %v953_v47 = vxor.u32 2147483648, %v937_v43  ;;  %v734_v44 = vadd.s32 %v728_v24, %v724_v16  ;;  %v718_v50 = vadd.s32 %v717_v58, %v707_v61 }
  0xbc   : > { %v612_v28 = vor.u32 4788187, %v611_v53  ;;  %v615_v32 = vcvt.s32.f32 %v608_v7  ;;  %v733_v13 = vsel %vm732_vm10, 1, %v3160_v0  ;;  %v1265_v9 = vand.u32 2147483647, %v3404_v37 }
  0xbd   : > { %v950_v56 = vxor.u32 2147483648, %v945_v63  ;;  %v954_v52 = vsel %vm952_vm3, %v953_v47, %v945_v63  ;;  %v735_v29 = vadd.s32 %v733_v13, %v727_v38  ;;  %vm1589_vm11 = vcmp.lt.f32.partialorder %v3366_v3, 5.0 }
  0xbe   : > { %v613_v48 = vand.u32 2147483647, %v612_v28  ;;  %v729_v33 = vshrl.u32 %v725_v42, 16  ;;  %vm736_vm12 = vc.u32 %v734_v44, %v730_v18  ;;  %v622_v35 = vsel %vm3699_vm9, 0, %v3709_v49 }
  0xbf   : > { %v951_v45 = vsel %vm949_vm5, %v937_v43, %v950_v56  ;;  %v737_v5 = vsel %vm736_vm12, 1, %v3160_v0  ;;  %v742_v40 = vmul.u32 %v3635_v27, %v3690_v54  ;;  %v731_v4 = vshrl.u32 %v726_v59, 16 }
  0xc0   : > { %v955_v55 = vsel %vm948_vm7, %v951_v45, %v954_v52  ;;  %v616_v41 = vmul.f32 %v615_v32, %v613_v48  ;;  %v739_v61 = vadd.s32 %v737_v5, %v735_v29  ;;  %v3731_v16 = vadd.s32 %v718_v50, %v709_v51 }
  0xc1   : > { %v956_v42 = vsel %vm946_vm8, nan, %v955_v55  ;;  %v3733_v34 = vadd.s32 %v734_v44, %v730_v18  ;;  %v1272_v2 = vand.u32 8388607, %v1265_v9  ;;  %vm1122_vm13 = vcmp.gt.s32.totalorder %v3530_v39, 0 }
  0xc2   : > { %v1575_v58 = vadd.f32 1.0, %v956_v42  ;;  %v617_v27 = vxor.u32 2147483648, %v616_v41  ;;  %v740_v54 = vadd.s32 %v739_v61, %v729_v33  ;;  %v1282_v8 = vshll.u32 %v3162_v57, %v3622_v17 }
  0xc3   : > { %v1285_v59 = vshll.u32 %v3163_v62, %v3622_v17  ;;  %v1286_v20 = vshrl.u32 %v3164_v6, %v3655_v60  ;;  %v1288_v24 = vshll.u32 %v3164_v6, %v3622_v17  ;;  %v1289_v43 = vshrl.u32 %v3165_v10, %v3655_v60 }
  0xc4   : > { %v1582_v36 = vmul.f32 0.5, %v1575_v58  ;;  %v618_v49 = vsel %vm497_vm1, %v617_v27, %v616_v41  ;;  %v741_v38 = vadd.s32 %v740_v54, %v731_v4  ;;  %v1291_v7 = vshll.u32 %v3165_v10, %v3622_v17 }
  0xc5   : > { %v3755_v53 = vsel %vm3699_vm9, %v3388_v19, %v618_v49  ;;  %vm744_vm14 = vc.u32 %v3731_v16, %v3733_v34  ;;  %v1283_v51 = vshrl.u32 %v3163_v62, %v3655_v60  ;;  %v1292_v18 = vshrl.u32 %v3166_v15, %v3655_v60 }
  0xc6   : > { %v1596_v63 = vsel %vm1589_vm11, %v1582_v36, 0.0  ;;  %v623_v47 = vmul.f32 %v3755_v53, %v3755_v53  ;;  %v745_v44 = vadd.s32 1, %v741_v38  ;;  %v1294_v46 = vshll.u32 %v3166_v15, %v3622_v17 }
  0xc7   : > { %1613 = vperm.xlu0 %2934, %v1596_v63   ;;  %v1273_v28 = vor.u32 8388608, %v1272_v2  ;;  %v3769_v32 = vor.u32 %v1286_v20, %v1285_v59  ;;  %v3771_v50 = vor.u32 %v1289_v43, %v1288_v24  ;;  %v1295_v13 = vshrl.u32 %v3167_v21, %v3655_v60 }
  0xc8   : > { %v624_v56 = vmul.f32 -0.001358992, %v623_v47  ;;  %v631_v52 = vmul.f32 -0.00019511016, %v623_v47  ;;  %v746_v3 = vsel %vm744_vm14, %v745_v44, %v741_v38  ;;  %v1293_v29 = vor.u32 %v1292_v18, %v1291_v7 }
  0xc9   : > { %v747_v48 = vadd.s32 %v746_v3, %v742_v40  ;;  %v1296_v33 = vor.u32 %v1295_v13, %v1294_v46  ;;  %vm1297_vm15 = vcmp.lt.s32.totalorder %v3614_v22, 1  ;;  %vm1300_vm0 = vcmp.lt.s32.totalorder %v3614_v22, 4 }
  0xca   : > { %v625_v17 = vadd.f32 0.041655596, %v624_v56  ;;  %v632_v45 = vadd.f32 0.008332121, %v631_v52  ;;  %v3777_v5 = vand.u32 3, %v622_v35  ;;  %v1284_v55 = vor.u32 %v1283_v51, %v1282_v8 }
  0xcb   : > { %v3780_v41 = vsub.s32 32, %v3611_v11  ;;  %v748_v4 = vadd.s32 536870912, %v747_v48  ;;  %vm1298_vm1 = vcmp.lt.s32.totalorder %v3614_v22, 2  ;;  %vm1299_vm2 = vcmp.lt.s32.totalorder %v3614_v22, 3 }
  0xcc   : > { %v626_v61 = vmul.f32 %v625_v17, %v623_v47  ;;  %v633_v40 = vmul.f32 %v632_v45, %v623_v47  ;;  %v1306_v42 = vsel %vm1300_vm0, %v1293_v29, 920167782  ;;  %v1309_v35 = vsel %vm1297_vm15, %v3769_v32, %v3771_v50 }
  0xcd   : > { %v3793_v2 = vsel %vm1122_vm13, %v3530_v39, 0  ;;  %v3795_v58 = vshrl.u32 %v748_v4, 30  ;;  %v1310_v27 = vsel %vm1300_vm0, %v1296_v33, 1326507024  ;;  %v3799_v54 = vshll.u32 %v1273_v28, 8 }
  0xce   : > { %v627_v8 = vadd.f32 -0.4999988, %v626_v61  ;;  %v634_v59 = vadd.f32 -0.16666654, %v633_v40  ;;  %vm640_vm3 = vcmp.lt.s32.totalorder %v3777_v5, 2  ;;  %v1305_v20 = vsel %vm1297_vm15, %v1284_v55, %v3769_v32 }
  0xcf   : > { %v1311_v24 = vsel %vm1299_vm2, %v1293_v29, %v1310_v27  ;;  %vm638_vm4 = vweird.f32 %v3388_v19  ;;  %v750_v39 = vshll.u32 %v3795_v58, 30  ;;  %v1307_v43 = vsel %vm1299_vm2, %v3771_v50, %v1306_v42 }
  0xd0   : > { %v1312_v36 = vsel %vm1298_vm1, %v1309_v35, %v1311_v24  ;;  %v1314_v49 = vand.u32 65535, %v3799_v54  ;;  %v628_v38 = vmul.f32 %v627_v8, %v623_v47  ;;  %v635_v7 = vmul.f32 %v634_v59, %v623_v47 }
  0xd1   : > { %v1315_v51 = vshrl.u32 %v3799_v54, 16  ;;  %v1316_v18 = vand.u32 65535, %v1312_v36  ;;  %vm641_vm5 = vcmp.eq.s32.totalorder %v3777_v5, 0  ;;  %vm644_vm6 = vcmp.eq.s32.totalorder %v3777_v5, 2 }
  0xd2   : > { %v751_v63 = vsub.s32 %v747_v48, %v750_v39  ;;  %v1317_v44 = vshrl.u32 %v1312_v36, 16  ;;  %v629_v46 = vadd.f32 1.0, %v628_v38  ;;  %v636_v28 = vadd.f32 1.0, %v635_v7 }
  0xd3   : > { %v1308_v13 = vsel %vm1298_vm1, %v1305_v20, %v1307_v43  ;;  %v1318_v56 = vmul.u32 %v1316_v18, %v1314_v49  ;;  %v3820_v29 = vmul.u32 %v1316_v18, %v1315_v51  ;;  %vm1587_vm8 = vcmp.lt.f32.partialorder %v3360_v1, 5.0 }
  0xd4   : > { %vm752_vm7 = vcmp.lt.s32.totalorder %v751_v63, 0  ;;  %v753_v52 = vsub.s32 0, %v751_v63  ;;  %v1319_v3 = vmul.u32 %v1317_v44, %v1314_v49  ;;  %v637_v47 = vmul.f32 %v636_v28, %v3755_v53 }
  0xd5   : > { %v645_v33 = vxor.u32 2147483648, %v629_v46  ;;  %v1281_v48 = vshrl.u32 %v3162_v57, %v3655_v60  ;;  %v1321_v45 = vmul.u32 %v1317_v44, %v1315_v51  ;;  %v1324_v61 = vshll.u32 %v3820_v29, 16 }
  0xd6   : > { %v754_v17 = vsel %vm752_vm7, %v753_v52, %v751_v63  ;;  %v1322_v4 = vshll.u32 %v1319_v3, 16  ;;  %v642_v40 = vxor.u32 2147483648, %v637_v47  ;;  %v1339_v27 = vshrl.u32 %v1308_v13, 16 }
  0xd7   : > { %v646_v42 = vsel %vm644_vm6, %v645_v33, %v637_v47  ;;  %v755_v35 = vclz %v754_v17  ;;  %v743_v53 = vadd.s32 %v3733_v34, %v3731_v16  ;;  %v1338_v59 = vand.u32 65535, %v1308_v13 }
  0xd8   : > { %vm1326_vm9 = vc.u32 %v1318_v56, %v1322_v4  ;;  %v1328_v8 = vadd.s32 %v1322_v4, %v1318_v56  ;;  %v643_v60 = vsel %vm641_vm5, %v629_v46, %v642_v40  ;;  %vm651_vm10 = vcmp.lt.s32.totalorder %v3394_v25, 0 }
  0xd9   : > { %v2599_v20 = vadd.s32 4294967294, %v755_v35  ;;  %v1301_v24 = vsel %vm1297_vm15, %v1281_v48, %v1284_v55  ;;  %v1327_v39 = vsel %vm1326_vm9, 1, %v3160_v0  ;;  %v647_v43 = vsel %vm640_vm3, %v643_v60, %v646_v42 }
  0xda   : > { %v1302_v16 = vsel %vm1300_vm0, %v3771_v50, 2102212464  ;;  %v1329_v34 = vadd.s32 %v1327_v39, %v1321_v45  ;;  %vm1330_vm11 = vc.u32 %v1328_v8, %v1324_v61  ;;  %v648_v36 = vsel %vm638_vm4, nan, %v647_v43 }
  0xdb   : > { %vm2600_vm12 = vcmp.lt.s32.totalorder %v2599_v20, 0  ;;  %v1323_v38 = vshrl.u32 %v1319_v3, 16  ;;  %v1341_v7 = vmul.u32 %v1339_v27, %v1314_v49  ;;  %v1573_v18 = vadd.f32 1.0, %v648_v36 }
  0xdc   : > { %v758_v44 = vsel %vm2600_vm12, 0, %v2599_v20  ;;  %v1331_v55 = vsel %vm1330_vm11, 1, %v3160_v0  ;;  %v1342_v46 = vmul.u32 %v1338_v59, %v1315_v51  ;;  %v1340_v56 = vmul.u32 %v1338_v59, %v1314_v49 }
  0xdd   : > { %v759_v28 = vsub.s32 32, %v758_v44  ;;  %v760_v5 = vshll.u32 %v751_v63, %v758_v44  ;;  %v763_v13 = vsub.s32 4294967266, %v758_v44  ;;  %v1580_v52 = vmul.f32 0.5, %v1573_v18 }
  0xde   : > { %v773_v50 = vsub.s32 4, %v3795_v58  ;;  %v1303_v19 = vsel %vm1299_vm2, %v3769_v32, %v1302_v16  ;;  %v1333_v47 = vadd.s32 %v1331_v55, %v1329_v34  ;;  %v1343_v48 = vmul.u32 %v1339_v27, %v1315_v51 }
  0xdf   : > { %v761_v33 = vshrl.u32 %v743_v53, %v759_v28  ;;  %v764_v3 = vadd.s32 127, %v763_v13  ;;  %v1344_v17 = vshll.u32 %v1341_v7, 16  ;;  %v1594_v45 = vsel %vm1587_vm8, %v1580_v52, 0.0 }
  0xe0   : > { %v1325_v4 = vshrl.u32 %v3820_v29, 16  ;;  %v1334_v63 = vadd.s32 %v1333_v47, %v1323_v38  ;;  %v1346_v61 = vshll.u32 %v1342_v46, 16  ;;  %1603 = vperm.xlu1 %2935, %v1594_v45   ;;  %v774_v32 = vsel %vm651_vm10, %v773_v50, %v3795_v58 }
  0xe1   : > { %v762_v49 = vor.u32 %v761_v33, %v760_v5  ;;  %v765_v40 = vshll.u32 %v764_v3, 23  ;;  %vm1348_vm13 = vc.u32 %v1340_v56, %v1344_v17  ;;  %v1350_v42 = vadd.s32 %v1344_v17, %v1340_v56 }
  0xe2   : > { %v1304_v51 = vsel %vm1298_vm1, %v1301_v24, %v1303_v19  ;;  %v1345_v35 = vshrl.u32 %v1341_v7, 16  ;;  %v1349_v1 = vsel %vm1348_vm13, 1, %v3160_v0  ;;  %vm3860_vm15 = vcmp.le.f32.partialorder %v649_v12, 0.7853982 }
  0xe3   : > { %v766_v27 = vor.u32 4788187, %v765_v40  ;;  %v769_v53 = vcvt.s32.f32 %v762_v49  ;;  %v1351_v29 = vadd.s32 %v1349_v1, %v1343_v48  ;;  %vm1352_vm14 = vc.u32 %v1350_v42, %v1346_v61 }
  0xe4   : > { %v1347_v59 = vshrl.u32 %v1342_v46, 16  ;;  %v1353_v60 = vsel %vm1352_vm14, 1, %v3160_v0  ;;  %v957_v58 = vand.u32 2147483647, %v3396_v26  ;;  %v3866_v20 = vadd.s32 %v1334_v63, %v1325_v4 }
  0xe5   : > { %v767_v22 = vand.u32 2147483647, %v766_v27  ;;  %v3868_v24 = vadd.s32 %v1350_v42, %v1346_v61  ;;  %v1355_v39 = vadd.s32 %v1353_v60, %v1351_v29  ;;  %v776_v43 = vsel %vm3860_vm15, 0, %v774_v32 }
  0xe6   : > { %v1358_v16 = vmul.u32 %v3799_v54, %v1304_v51  ;;  %v974_v12 = vshll.u32 %v3162_v57, %v3611_v11  ;;  %v975_v34 = vshrl.u32 %v3163_v62, %v3780_v41  ;;  %vm1430_vm0 = vcmp.gt.s32.totalorder %v3502_v23, 0 }
  0xe7   : > { %v770_v36 = vmul.f32 %v769_v53, %v767_v22  ;;  %v1356_v38 = vadd.s32 %v1355_v39, %v1345_v35  ;;  %v977_v7 = vshll.u32 %v3163_v62, %v3611_v11  ;;  %v978_v18 = vshrl.u32 %v3164_v6, %v3780_v41 }
  0xe8   : > { %v964_v44 = vand.u32 8388607, %v957_v58  ;;  %v980_v54 = vshll.u32 %v3164_v6, %v3611_v11  ;;  %v981_v55 = vshrl.u32 %v3165_v10, %v3780_v41  ;;  %v983_v46 = vshll.u32 %v3165_v10, %v3611_v11 }
  0xe9   : > { %v771_v28 = vxor.u32 2147483648, %v770_v36  ;;  %v1357_v5 = vadd.s32 %v1356_v38, %v1347_v59  ;;  %vm1360_vm1 = vc.u32 %v3866_v20, %v3868_v24  ;;  %v984_v13 = vshrl.u32 %v3166_v15, %v3780_v41 }
  0xea   : > { %v3894_v56 = vor.u32 %v975_v34, %v974_v12  ;;  %v3896_v52 = vor.u32 %v978_v18, %v977_v7  ;;  %v986_v50 = vshll.u32 %v3166_v15, %v3611_v11  ;;  %v987_v19 = vshrl.u32 %v3167_v21, %v3780_v41 }
  0xeb   : > { %v772_v47 = vsel %vm651_vm10, %v771_v28, %v770_v36  ;;  %v1361_v33 = vadd.s32 1, %v1357_v5  ;;  %v3904_v3 = vor.u32 %v981_v55, %v980_v54  ;;  %v985_v48 = vor.u32 %v984_v13, %v983_v46 }
  0xec   : > { %v775_v17 = vsel %vm3860_vm15, %v3394_v25, %v772_v47  ;;  %v988_v45 = vor.u32 %v987_v19, %v986_v50  ;;  %vm989_vm2 = vcmp.lt.s32.totalorder %v3552_v14, 1  ;;  %vm992_vm3 = vcmp.lt.s32.totalorder %v3552_v14, 4 }
  0xed   : > { %v777_v11 = vmul.f32 %v775_v17, %v775_v17  ;;  %v1362_v4 = vsel %vm1360_vm1, %v1361_v33, %v1357_v5  ;;  %v965_v63 = vor.u32 8388608, %v964_v44  ;;  %vm991_vm4 = vcmp.lt.s32.totalorder %v3552_v14, 3 }
  0xee   : > { %v3913_v61 = vand.u32 31, %v3793_v2  ;;  %v3915_v49 = vand.u32 3, %v776_v43  ;;  %v1363_v40 = vadd.s32 %v1362_v4, %v1358_v16  ;;  %v998_v42 = vsel %vm992_vm3, %v985_v48, 920167782 }
  0xef   : > { %v778_v32 = vmul.f32 -0.001358992, %v777_v11  ;;  %v785_v51 = vmul.f32 -0.00019511016, %v777_v11  ;;  %vm990_vm5 = vcmp.lt.s32.totalorder %v3552_v14, 2  ;;  %v997_v35 = vsel %vm989_vm2, %v3894_v56, %v3896_v52 }
  0xf0   : > { %v1364_v1 = vadd.s32 536870912, %v1363_v40  ;;  %v999_v27 = vsel %vm991_vm4, %v3904_v3, %v998_v42  ;;  %v1001_v53 = vsel %vm989_vm2, %v3896_v52, %v3904_v3  ;;  %v1002_v29 = vsel %vm992_vm3, %v988_v45, 1326507024 }
  0xf1   : > { %v779_v8 = vadd.f32 0.041655596, %v778_v32  ;;  %v786_v59 = vadd.f32 0.008332121, %v785_v51  ;;  %v1003_v60 = vsel %vm991_vm4, %v985_v48, %v1002_v29  ;;  %v3935_v22 = vshll.u32 %v965_v63, 8  ;;  %v2954_v29 = vld [vmem:[%s4456_s0 + $0x8] sm:$0xff] }
  0xf2   : > { %v3940_v39 = vsel %vm1430_vm0, %v3502_v23, 0  ;;  %v3943_v43 = vshrl.u32 %v3793_v2, 5  ;;  %v3945_v16 = vshrl.u32 %v1364_v1, 30  ;;  %v1004_v12 = vsel %vm990_vm5, %v1001_v53, %v1003_v60 }
  0xf3   : > { %v780_v34 = vmul.f32 %v779_v8, %v777_v11  ;;  %v787_v36 = vmul.f32 %v786_v59, %v777_v11  ;;  %v1006_v38 = vand.u32 65535, %v3935_v22  ;;  %v3951_v7 = vshrl.u32 %v3935_v22, 16 }
  0xf4   : > { %v1366_v18 = vshll.u32 %v3945_v16, 30  ;;  %v1000_v23 = vsel %vm990_vm5, %v997_v35, %v999_v27  ;;  %v1008_v44 = vand.u32 65535, %v1004_v12  ;;  %v1009_v2 = vshrl.u32 %v1004_v12, 16 }
  0xf5   : > { %v3957_v54 = vsub.s32 32, %v3913_v61  ;;  %v781_v55 = vadd.f32 -0.4999988, %v780_v34  ;;  %v788_v46 = vadd.f32 -0.16666654, %v787_v36  ;;  %vm794_vm6 = vcmp.lt.s32.totalorder %v3915_v49, 2 }
  0xf6   : > { %vm792_vm7 = vweird.f32 %v3394_v25  ;;  %vm795_vm8 = vcmp.eq.s32.totalorder %v3915_v49, 0  ;;  %v3962_v28 = vsub.s32 %v1363_v40, %v1366_v18  ;;  %v1010_v5 = vmul.u32 %v1008_v44, %v1006_v38 }
  0xf7   : > { %v1011_v13 = vmul.u32 %v1009_v2, %v1006_v38  ;;  %v782_v50 = vmul.f32 %v781_v55, %v777_v11  ;;  %v789_v19 = vmul.f32 %v788_v46, %v777_v11  ;;  %v3965_v47 = vmul.u32 %v1008_v44, %v3951_v7 }
  0xf8   : > { %v1031_v33 = vshrl.u32 %v1000_v23, 16  ;;  %vm1368_vm9 = vcmp.lt.s32.totalorder %v3962_v28, 0  ;;  %v1369_v48 = vsub.s32 0, %v3962_v28  ;;  %v1013_v45 = vmul.u32 %v1009_v2, %v3951_v7 }
  0xf9   : > { %v1014_v4 = vshll.u32 %v1011_v13, 16  ;;  %v783_v63 = vadd.f32 1.0, %v782_v50  ;;  %v790_v42 = vadd.f32 1.0, %v789_v19  ;;  %vm798_vm10 = vcmp.eq.s32.totalorder %v3915_v49, 2 }
  0xfa   : > { %v1016_v40 = vshll.u32 %v3965_v47, 16  ;;  %v1370_v32 = vsel %vm1368_vm9, %v1369_v48, %v3962_v28  ;;  %v1030_v51 = vand.u32 65535, %v1000_v23  ;;  %vm1588_vm12 = vcmp.lt.f32.partialorder %v2954_v29, 5.0 }
  0xfb   : > { %vm1018_vm11 = vc.u32 %v1010_v5, %v1014_v4  ;;  %v1020_v11 = vadd.s32 %v1014_v4, %v1010_v5  ;;  %v791_v35 = vmul.f32 %v790_v42, %v775_v17  ;;  %v799_v1 = vxor.u32 2147483648, %v783_v63 }
  0xfc   : > { %v1371_v27 = vclz %v1370_v32  ;;  %v1019_v53 = vsel %vm1018_vm11, 1, %v3160_v0  ;;  %v1033_v59 = vmul.u32 %v1031_v33, %v1006_v38  ;;  %v973_v17 = vshrl.u32 %v3162_v57, %v3780_v41 }
  0xfd   : > { %v1021_v8 = vadd.s32 %v1019_v53, %v1013_v45  ;;  %vm1022_vm13 = vc.u32 %v1020_v11, %v1016_v40  ;;  %v796_v60 = vxor.u32 2147483648, %v791_v35  ;;  %v800_v12 = vsel %vm798_vm10, %v799_v1, %v791_v35 }
  0xfe   : > { %v2611_v34 = vadd.s32 4294967294, %v1371_v27  ;;  %v1359_v36 = vadd.s32 %v3868_v24, %v3866_v20  ;;  %v994_v18 = vsel %vm992_vm3, %v3904_v3, 2102212464  ;;  %v1023_v23 = vsel %vm1022_vm13, 1, %v3160_v0 }
  0xff   : > { %v1034_v44 = vmul.u32 %v1030_v51, %v3951_v7  ;;  %v797_v2 = vsel %vm795_vm8, %v783_v63, %v796_v60  ;;  %v1015_v55 = vshrl.u32 %v1011_v13, 16  ;;  %v1032_v46 = vmul.u32 %v1030_v51, %v1006_v38 }
 0x100   : > { %vm2612_vm14 = vcmp.lt.s32.totalorder %v2611_v34, 0  ;;  %v801_v41 = vsel %vm794_vm6, %v797_v2, %v800_v12  ;;  %v1025_v50 = vadd.s32 %v1023_v23, %v1021_v8  ;;  %v1036_v20 = vshll.u32 %v1033_v59, 16 }
 0x101   : > { %v1374_v5 = vsel %vm2612_vm14, 0, %v2611_v34  ;;  %v802_v24 = vsel %vm792_vm7, nan, %v801_v41  ;;  %vm1267_vm15 = vcmp.lt.s32.totalorder %v3404_v37, 0  ;;  %v993_v38 = vsel %vm989_vm2, %v973_v17, %v3894_v56 }
 0x102   : > { %v1375_v3 = vsub.s32 32, %v1374_v5  ;;  %v1376_v19 = vshll.u32 %v3962_v28, %v1374_v5  ;;  %v1379_v48 = vsub.s32 4294967266, %v1374_v5  ;;  %v1574_v45 = vadd.f32 1.0, %v802_v24 }
 0x103   : > { %v1035_v49 = vmul.u32 %v1031_v33, %v3951_v7  ;;  %v1038_v13 = vshll.u32 %v1034_v44, 16  ;;  %v995_v25 = vsel %vm991_vm4, %v3896_v52, %v994_v18  ;;  %v1017_v42 = vshrl.u32 %v3965_v47, 16 }
 0x104   : > { %v1377_v4 = vshrl.u32 %v1359_v36, %v1375_v3  ;;  %v1380_v63 = vadd.s32 127, %v1379_v48  ;;  %v1581_v28 = vmul.f32 0.5, %v1574_v45  ;;  %v1026_v40 = vadd.s32 %v1025_v50, %v1015_v55 }
 0x105   : > { %vm1040_vm0 = vc.u32 %v1032_v46, %v1036_v20  ;;  %v1042_v32 = vadd.s32 %v1036_v20, %v1032_v46  ;;  %vm4006_vm1 = vcmp.le.f32.partialorder %v1265_v9, 0.7853982  ;;  %v1389_v33 = vsub.s32 4, %v3945_v16 }
 0x106   : > { %v1378_v56 = vor.u32 %v1377_v4, %v1376_v19  ;;  %v1381_v7 = vshll.u32 %v1380_v63, 23  ;;  %v1041_v51 = vsel %vm1040_vm0, 1, %v3160_v0  ;;  %v1595_v52 = vsel %vm1588_vm12, %v1581_v28, 0.0 }
 0x107   : > { %v1037_v35 = vshrl.u32 %v1033_v59, 16  ;;  %v1043_v47 = vadd.s32 %v1041_v51, %v1035_v49  ;;  %vm1044_vm2 = vc.u32 %v1042_v32, %v1038_v13  ;;  %1608 = vperm.xlu2 %2936, %v1595_v52   ;;  %v1111_v9 = vand.u32 2147483647, %v3400_v31 }
 0x108   : > { %v1382_v1 = vor.u32 4788187, %v1381_v7  ;;  %v1385_v27 = vcvt.s32.f32 %v1378_v56  ;;  %v1045_v53 = vsel %vm1044_vm2, 1, %v3160_v0  ;;  %v4015_v8 = vadd.s32 %v1026_v40, %v1017_v42 }
 0x109   : > { %v1039_v60 = vshrl.u32 %v1034_v44, 16  ;;  %v4017_v12 = vadd.s32 %v1042_v32, %v1038_v13  ;;  %v1047_v34 = vadd.s32 %v1045_v53, %v1043_v47  ;;  %v996_v29 = vsel %vm990_vm5, %v993_v38, %v995_v25 }
 0x10a   : > { %v1383_v17 = vand.u32 2147483647, %v1382_v1  ;;  %v1118_v59 = vand.u32 8388607, %v1111_v9  ;;  %v1128_v36 = vshll.u32 %v3162_v57, %v3913_v61  ;;  %v1129_v23 = vshrl.u32 %v3163_v62, %v3957_v54 }
 0x10b   : > { %v1048_v18 = vadd.s32 %v1047_v34, %v1037_v35  ;;  %v1131_v44 = vshll.u32 %v3163_v62, %v3913_v61  ;;  %v1132_v2 = vshrl.u32 %v3164_v6, %v3957_v54  ;;  %v1390_v14 = vsel %vm1267_vm15, %v1389_v33, %v3945_v16 }
 0x10c   : > { %v1386_v55 = vmul.f32 %v1385_v27, %v1383_v17  ;;  %v1134_v46 = vshll.u32 %v3164_v6, %v3913_v61  ;;  %v1135_v41 = vshrl.u32 %v3165_v10, %v3957_v54  ;;  %v1050_v50 = vmul.u32 %v3935_v22, %v996_v29 }
 0x10d   : > { %v1049_v5 = vadd.s32 %v1048_v18, %v1039_v60  ;;  %vm1052_vm3 = vc.u32 %v4015_v8, %v4017_v12  ;;  %v1137_v20 = vshll.u32 %v3165_v10, %v3913_v61  ;;  %v1119_v3 = vor.u32 8388608, %v1118_v59 }
 0x10e   : > { %v1387_v24 = vxor.u32 2147483648, %v1386_v55  ;;  %v1138_v16 = vshrl.u32 %v3166_v15, %v3957_v54  ;;  %v1140_v19 = vshll.u32 %v3166_v15, %v3913_v61  ;;  %v4047_v45 = vor.u32 %v1129_v23, %v1128_v36 }
 0x10f   : > { %v1053_v48 = vadd.s32 1, %v1049_v5  ;;  %v4049_v38 = vor.u32 %v1132_v2, %v1131_v44  ;;  %v1141_v22 = vshrl.u32 %v3167_v21, %v3957_v54  ;;  %v1136_v13 = vor.u32 %v1135_v41, %v1134_v46 }
 0x110   : > { %v1388_v49 = vsel %vm1267_vm15, %v1387_v24, %v1386_v55  ;;  %v1139_v4 = vor.u32 %v1138_v16, %v1137_v20  ;;  %vm1146_vm4 = vcmp.lt.s32.totalorder %v3943_v43, 4  ;;  %vm1143_vm5 = vcmp.lt.s32.totalorder %v3943_v43, 1 }
 0x111   : > { %v1391_v63 = vsel %vm4006_vm1, %v3404_v37, %v1388_v49  ;;  %v1054_v61 = vsel %vm1052_vm3, %v1053_v48, %v1049_v5  ;;  %v1142_v25 = vor.u32 %v1141_v22, %v1140_v19  ;;  %v4061_v42 = vand.u32 31, %v3940_v39 }
 0x112   : > { %v1393_v28 = vmul.f32 %v1391_v63, %v1391_v63  ;;  %v1055_v40 = vadd.s32 %v1054_v61, %v1050_v50  ;;  %vm1145_vm6 = vcmp.lt.s32.totalorder %v3943_v43, 3  ;;  %v1392_v32 = vsel %vm4006_vm1, 0, %v1390_v14 }
 0x113   : > { %vm1144_vm7 = vcmp.lt.s32.totalorder %v3943_v43, 2  ;;  %v1152_v56 = vsel %vm1146_vm4, %v1139_v4, 920167782  ;;  %v1156_v7 = vsel %vm1146_vm4, %v1142_v25, 1326507024  ;;  %v1155_v35 = vsel %vm1143_vm5, %v4049_v38, %v1136_v13 }
 0x114   : > { %v1394_v33 = vmul.f32 -0.001358992, %v1393_v28  ;;  %v1401_v51 = vmul.f32 -0.00019511016, %v1393_v28  ;;  %v1056_v52 = vadd.s32 536870912, %v1055_v40  ;;  %v1151_v11 = vsel %vm1143_vm5, %v4047_v45, %v4049_v38 }
 0x115   : > { %v1153_v47 = vsel %vm1145_vm6, %v1136_v13, %v1152_v56  ;;  %v1157_v1 = vsel %vm1145_vm6, %v1139_v4, %v1156_v7  ;;  %v4082_v27 = vshll.u32 %v1119_v3, 8  ;;  %v1409_v34 = vand.u32 3, %v1392_v32 }
 0x116   : > { %v1395_v53 = vadd.f32 0.041655596, %v1394_v33  ;;  %v1402_v60 = vadd.f32 0.008332121, %v1401_v51  ;;  %v4084_v17 = vshrl.u32 %v1056_v52, 30  ;;  %v1158_v29 = vsel %vm1144_vm7, %v1155_v35, %v1157_v1 }
 0x117   : > { %v1160_v59 = vand.u32 65535, %v4082_v27  ;;  %v4090_v36 = vshrl.u32 %v4082_v27, 16  ;;  %v4095_v2 = vsel %vm1144_vm7, %v1151_v11, %v1153_v47  ;;  %v4098_v55 = vshrl.u32 %v3940_v39, 5 }
 0x118   : > { %v1396_v18 = vmul.f32 %v1395_v53, %v1393_v28  ;;  %v1403_v23 = vmul.f32 %v1402_v60, %v1393_v28  ;;  %v1058_v44 = vshll.u32 %v4084_v17, 30  ;;  %v4101_v14 = vsub.s32 32, %v4061_v42 }
 0x119   : > { %v1162_v46 = vand.u32 65535, %v1158_v29  ;;  %v1163_v41 = vshrl.u32 %v1158_v29, 16  ;;  %vm1410_vm8 = vcmp.lt.s32.totalorder %v1409_v34, 2  ;;  %vm1414_vm9 = vcmp.eq.s32.totalorder %v1409_v34, 2 }
 0x11a   : > { %v1397_v5 = vadd.f32 -0.4999988, %v1396_v18  ;;  %v1404_v50 = vadd.f32 -0.16666654, %v1403_v23  ;;  %v1059_v20 = vsub.s32 %v1055_v40, %v1058_v44  ;;  %vm1408_vm10 = vweird.f32 %v3404_v37 }
 0x11b   : > { %v1164_v24 = vmul.u32 %v1162_v46, %v1160_v59  ;;  %v1165_v3 = vmul.u32 %v1163_v41, %v1160_v59  ;;  %v4105_v16 = vmul.u32 %v1162_v46, %v4090_v36  ;;  %v1185_v39 = vshrl.u32 %v4095_v2, 16 }
 0x11c   : > { %v1398_v19 = vmul.f32 %v1397_v5, %v1393_v28  ;;  %v1405_v48 = vmul.f32 %v1404_v50, %v1393_v28  ;;  %vm1060_vm11 = vcmp.lt.s32.totalorder %v1059_v20, 0  ;;  %v1061_v22 = vsub.s32 0, %v1059_v20 }
 0x11d   : > { %v1127_v49 = vshrl.u32 %v3162_v57, %v3957_v54  ;;  %v1148_v4 = vsel %vm1146_vm4, %v1136_v13, 2102212464  ;;  %v1168_v61 = vshll.u32 %v1165_v3, 16  ;;  %v1170_v25 = vshll.u32 %v4105_v16, 16 }
 0x11e   : > { %v1399_v40 = vadd.f32 1.0, %v1398_v19  ;;  %v1406_v32 = vadd.f32 1.0, %v1405_v48  ;;  %v1062_v56 = vsel %vm1060_vm11, %v1061_v22, %v1059_v20  ;;  %v1167_v7 = vmul.u32 %v1163_v41, %v4090_v36 }
 0x11f   : > { %v1063_v33 = vclz %v1062_v56  ;;  %vm1172_vm12 = vc.u32 %v1164_v24, %v1168_v61  ;;  %v1174_v51 = vadd.s32 %v1168_v61, %v1164_v24  ;;  %v1184_v28 = vand.u32 65535, %v4095_v2 }
 0x120   : > { %v1407_v52 = vmul.f32 %v1406_v32, %v1391_v63  ;;  %v1415_v35 = vxor.u32 2147483648, %v1399_v40  ;;  %v1173_v54 = vsel %vm1172_vm12, 1, %v3160_v0  ;;  %v4116_v11 = vmul.u32 %v1185_v39, %v1160_v59 }
 0x121   : > { %vm1411_vm13 = vcmp.eq.s32.totalorder %v1409_v34, 0  ;;  %v1051_v13 = vadd.s32 %v4017_v12, %v4015_v8  ;;  %v2605_v47 = vadd.s32 4294967294, %v1063_v33  ;;  %vm1176_vm14 = vc.u32 %v1174_v51, %v1170_v25  ;;  %v2955_v34 = vld [vmem:[%s4456_s0 + $0x28] sm:$0xff] }
 0x122   : > { %v1412_v1 = vxor.u32 2147483648, %v1407_v52  ;;  %v1416_v53 = vsel %vm1414_vm9, %v1415_v35, %v1407_v52  ;;  %v1147_v60 = vsel %vm1143_vm5, %v1127_v49, %v4047_v45  ;;  %v1175_v29 = vadd.s32 %v1173_v54, %v1167_v7 }
 0x123   : > { %vm2606_vm15 = vcmp.lt.s32.totalorder %v2605_v47, 0  ;;  %v1149_v63 = vsel %vm1145_vm6, %v4049_v38, %v1148_v4  ;;  %v1177_v18 = vsel %vm1176_vm14, 1, %v3160_v0  ;;  %v1186_v23 = vmul.u32 %v1184_v28, %v1160_v59 }
 0x124   : > { %v1413_v44 = vsel %vm1411_vm13, %v1399_v40, %v1412_v1  ;;  %v1066_v8 = vsel %vm2606_vm15, 0, %v2605_v47  ;;  %v1188_v12 = vmul.u32 %v1184_v28, %v4090_v36  ;;  %v1190_v2 = vshll.u32 %v4116_v11, 16 }
 0x125   : > { %v1417_v46 = vsel %vm1410_vm8, %v1413_v44, %v1416_v53  ;;  %v1067_v41 = vsub.s32 32, %v1066_v8  ;;  %v1068_v5 = vshll.u32 %v1059_v20, %v1066_v8  ;;  %v1071_v45 = vsub.s32 4294967266, %v1066_v8 }
 0x126   : > { %v1418_v50 = vsel %vm1408_vm10, nan, %v1417_v46  ;;  %vm959_vm0 = vcmp.lt.s32.totalorder %v3396_v26, 0  ;;  %v1169_v38 = vshrl.u32 %v1165_v3, 16  ;;  %v1179_v24 = vadd.s32 %v1177_v18, %v1175_v29 }
 0x127   : > { %v1578_v19 = vadd.f32 1.0, %v1418_v50  ;;  %v1069_v59 = vshrl.u32 %v1051_v13, %v1067_v41  ;;  %v1072_v48 = vadd.s32 127, %v1071_v45  ;;  %v1189_v22 = vmul.u32 %v1185_v39, %v4090_v36 }
 0x128   : > { %vm1592_vm1 = vcmp.lt.f32.partialorder %v2955_v34, 5.0  ;;  %v1150_v20 = vsel %vm1144_vm7, %v1147_v60, %v1149_v63  ;;  %v1192_v49 = vshll.u32 %v1188_v12, 16  ;;  %vm1194_vm2 = vc.u32 %v1186_v23, %v1190_v2 }
 0x129   : > { %v1585_v37 = vmul.f32 0.5, %v1578_v19  ;;  %v1070_v4 = vor.u32 %v1069_v59, %v1068_v5  ;;  %v1073_v61 = vshll.u32 %v1072_v48, 23  ;;  %v1081_v3 = vsub.s32 4, %v4084_v17 }
 0x12a   : > { %v1171_v25 = vshrl.u32 %v4105_v16, 16  ;;  %v1180_v40 = vadd.s32 %v1179_v24, %v1169_v38  ;;  %v1195_v36 = vsel %vm1194_vm2, 1, %v3160_v0  ;;  %v1196_v39 = vadd.s32 %v1190_v2, %v1186_v23 }
 0x12b   : > { %v1599_v32 = vsel %vm1592_vm1, %v1585_v37, 0.0  ;;  %v1074_v56 = vor.u32 4788187, %v1073_v61  ;;  %v1077_v7 = vcvt.s32.f32 %v1070_v4  ;;  %v1197_v33 = vadd.s32 %v1195_v36, %v1189_v22 }
 0x12c   : > { %1628 = vperm.xlu0 %2934, %v1599_v32   ;;  %vm4145_vm3 = vcmp.le.f32.partialorder %v957_v58, 0.7853982  ;;  %v1191_v51 = vshrl.u32 %v4116_v11, 16  ;;  %vm1198_vm4 = vc.u32 %v1196_v39, %v1192_v49  ;;  %v1419_v16 = vand.u32 2147483647, %v3398_v30 }
 0x12d   : > { %v1075_v28 = vand.u32 2147483647, %v1074_v56  ;;  %v1082_v52 = vsel %vm959_vm0, %v1081_v3, %v4084_v17  ;;  %v1193_v35 = vshrl.u32 %v1188_v12, 16  ;;  %v1199_v54 = vsel %vm1198_vm4, 1, %v3160_v0 }
 0x12e   : > { %v4155_v13 = vadd.s32 %v1180_v40, %v1171_v25  ;;  %v4157_v47 = vadd.s32 %v1196_v39, %v1192_v49  ;;  %v1201_v58 = vadd.s32 %v1199_v54, %v1197_v33  ;;  %v1204_v1 = vmul.u32 %v4082_v27, %v1150_v20 }
 0x12f   : > { %v1078_v53 = vmul.f32 %v1077_v7, %v1075_v28  ;;  %v1439_v11 = vshll.u32 %v3163_v62, %v4061_v42  ;;  %v1440_v60 = vshrl.u32 %v3164_v6, %v4101_v14  ;;  %v1442_v17 = vshll.u32 %v3164_v6, %v4061_v42 }
 0x130   : > { %v1202_v29 = vadd.s32 %v1201_v58, %v1191_v51  ;;  %v1426_v63 = vand.u32 8388607, %v1419_v16  ;;  %v1443_v18 = vshrl.u32 %v3165_v10, %v4101_v14  ;;  %v1445_v27 = vshll.u32 %v3165_v10, %v4061_v42 }
 0x131   : > { %v1079_v23 = vxor.u32 2147483648, %v1078_v53  ;;  %v1436_v44 = vshll.u32 %v3162_v57, %v4061_v42  ;;  %v1446_v8 = vshrl.u32 %v3166_v15, %v4101_v14  ;;  %v1448_v6 = vshll.u32 %v3166_v15, %v4061_v42 }
 0x132   : > { %v1203_v12 = vadd.s32 %v1202_v29, %v1193_v35  ;;  %vm1206_vm5 = vc.u32 %v4155_v13, %v4157_v47  ;;  %v1437_v2 = vshrl.u32 %v3163_v62, %v4101_v14  ;;  %v1449_v10 = vshrl.u32 %v3167_v21, %v4101_v14 }
 0x133   : > { %v1080_v46 = vsel %vm959_vm0, %v1079_v23, %v1078_v53  ;;  %v4186_v41 = vor.u32 %v1440_v60, %v1439_v11  ;;  %v4188_v5 = vor.u32 %v1443_v18, %v1442_v17  ;;  %v1447_v45 = vor.u32 %v1446_v8, %v1445_v27 }
 0x134   : > { %v1083_v15 = vsel %vm4145_vm3, %v3396_v26, %v1080_v46  ;;  %v1207_v42 = vadd.s32 1, %v1203_v12  ;;  %v1450_v50 = vor.u32 %v1449_v10, %v1448_v6  ;;  %vm1454_vm6 = vcmp.lt.s32.totalorder %v4098_v55, 4 }
 0x135   : > { %v1084_v62 = vsel %vm4145_vm3, 0, %v1082_v52  ;;  %v1085_v21 = vmul.f32 %v1083_v15, %v1083_v15  ;;  %vm1451_vm7 = vcmp.lt.s32.totalorder %v4098_v55, 1  ;;  %v1427_v24 = vor.u32 8388608, %v1426_v63 }
 0x136   : > { %v1208_v38 = vsel %vm1206_vm5, %v1207_v42, %v1203_v12  ;;  %v4197_v19 = vor.u32 %v1437_v2, %v1436_v44  ;;  %vm1453_vm8 = vcmp.lt.s32.totalorder %v4098_v55, 3  ;;  %v1460_v34 = vsel %vm1454_vm6, %v1447_v45, 920167782 }
 0x137   : > { %v1086_v59 = vmul.f32 -0.001358992, %v1085_v21  ;;  %v1093_v48 = vmul.f32 -0.00019511016, %v1085_v21  ;;  %v1209_v22 = vadd.s32 %v1208_v38, %v1204_v1  ;;  %vm1452_vm9 = vcmp.lt.s32.totalorder %v4098_v55, 2 }
 0x138   : > { %v1463_v20 = vsel %vm1451_vm7, %v4186_v41, %v4188_v5  ;;  %v1464_v49 = vsel %vm1454_vm6, %v1450_v50, 1326507024  ;;  %v1101_v61 = vand.u32 3, %v1084_v62  ;;  %v1459_v25 = vsel %vm1451_vm7, %v4197_v19, %v4186_v41 }
 0x139   : > { %v1087_v37 = vadd.f32 0.041655596, %v1086_v59  ;;  %v1094_v4 = vadd.f32 0.008332121, %v1093_v48  ;;  %v1210_v3 = vadd.s32 536870912, %v1209_v22  ;;  %v1461_v40 = vsel %vm1453_vm8, %v4188_v5, %v1460_v34 }
 0x13a   : > { %v1465_v36 = vsel %vm1453_vm8, %v1447_v45, %v1464_v49  ;;  %v4218_v39 = vshll.u32 %v1427_v24, 8  ;;  %v1462_v1 = vsel %vm1452_vm9, %v1459_v25, %v1461_v40  ;;  %vm1102_vm10 = vcmp.lt.s32.totalorder %v1101_v61, 2 }
 0x13b   : > { %v1088_v32 = vmul.f32 %v1087_v37, %v1085_v21  ;;  %v1095_v56 = vmul.f32 %v1094_v4, %v1085_v21  ;;  %v4220_v7 = vshrl.u32 %v1210_v3, 30  ;;  %v1466_v33 = vsel %vm1452_vm9, %v1463_v20, %v1465_v36 }
 0x13c   : > { %v1468_v43 = vand.u32 65535, %v4218_v39  ;;  %v1469_v51 = vshrl.u32 %v4218_v39, 16  ;;  %v1470_v28 = vand.u32 65535, %v1466_v33  ;;  %v1471_v52 = vshrl.u32 %v1466_v33, 16 }
 0x13d   : > { %v1089_v35 = vadd.f32 -0.4999988, %v1088_v32  ;;  %v1096_v54 = vadd.f32 -0.16666654, %v1095_v56  ;;  %v1212_v58 = vshll.u32 %v4220_v7, 30  ;;  %v1492_v18 = vand.u32 65535, %v1462_v1 }
 0x13e   : > { %v1472_v53 = vmul.u32 %v1470_v28, %v1468_v43  ;;  %v4229_v11 = vmul.u32 %v1471_v52, %v1468_v43  ;;  %v4231_v60 = vmul.u32 %v1470_v28, %v1469_v51  ;;  %v1475_v27 = vmul.u32 %v1471_v52, %v1469_v51  ;;  %v2956_v28 = vld [vmem:[%s4456_s0 + $0x18] sm:$0xff] }
 0x13f   : > { %v1090_v17 = vmul.f32 %v1089_v35, %v1085_v21  ;;  %v1097_v29 = vmul.f32 %v1096_v54, %v1085_v21  ;;  %v1213_v63 = vsub.s32 %v1209_v22, %v1212_v58  ;;  %v1493_v8 = vshrl.u32 %v1462_v1, 16 }
 0x140   : > { %v1476_v23 = vshll.u32 %v4229_v11, 16  ;;  %v1478_v44 = vshll.u32 %v4231_v60, 16  ;;  %vm1103_vm12 = vcmp.eq.s32.totalorder %v1101_v61, 0  ;;  %vm1106_vm13 = vcmp.eq.s32.totalorder %v1101_v61, 2 }
 0x141   : > { %v1091_v6 = vadd.f32 1.0, %v1090_v17  ;;  %v1098_v12 = vadd.f32 1.0, %v1097_v29  ;;  %vm1214_vm11 = vcmp.lt.s32.totalorder %v1213_v63, 0  ;;  %v1215_v2 = vsub.s32 0, %v1213_v63 }
 0x142   : > { %vm1480_vm14 = vc.u32 %v1472_v53, %v1476_v23  ;;  %v1482_v10 = vadd.s32 %v1476_v23, %v1472_v53  ;;  %v1495_v38 = vmul.u32 %v1493_v8, %v1468_v43  ;;  %v1494_v22 = vmul.u32 %v1492_v18, %v1468_v43 }
 0x143   : > { %v1099_v46 = vmul.f32 %v1098_v12, %v1083_v15  ;;  %v1107_v45 = vxor.u32 2147483648, %v1091_v6  ;;  %v1216_v42 = vsel %vm1214_vm11, %v1215_v2, %v1213_v63  ;;  %v1481_v50 = vsel %vm1480_vm14, 1, %v3160_v0 }
 0x144   : > { %v1217_v62 = vclz %v1216_v42  ;;  %v1483_v21 = vadd.s32 %v1481_v50, %v1475_v27  ;;  %vm1484_vm15 = vc.u32 %v1482_v10, %v1478_v44  ;;  %vm1100_vm0 = vweird.f32 %v3396_v26 }
 0x145   : > { %v1104_v24 = vxor.u32 2147483648, %v1099_v46  ;;  %v1108_v59 = vsel %vm1106_vm13, %v1107_v45, %v1099_v46  ;;  %v1485_v48 = vsel %vm1484_vm15, 1, %v3160_v0  ;;  %v1498_v20 = vshll.u32 %v1495_v38, 16 }
 0x146   : > { %v2608_v34 = vadd.s32 4294967294, %v1217_v62  ;;  %v1205_v15 = vadd.s32 %v4157_v47, %v4155_v13  ;;  %v1496_v37 = vmul.u32 %v1492_v18, %v1469_v51  ;;  %v1477_v3 = vshrl.u32 %v4229_v11, 16 }
 0x147   : > { %v1105_v49 = vsel %vm1103_vm12, %v1091_v6, %v1104_v24  ;;  %v1487_v25 = vadd.s32 %v1485_v48, %v1483_v21  ;;  %v1497_v32 = vmul.u32 %v1493_v8, %v1469_v51  ;;  %vm1502_vm2 = vc.u32 %v1494_v22, %v1498_v20 }
 0x148   : > { %v1109_v4 = vsel %vm1102_vm10, %v1105_v49, %v1108_v59  ;;  %vm2609_vm1 = vcmp.lt.s32.totalorder %v2608_v34, 0  ;;  %vm1590_vm3 = vcmp.lt.f32.partialorder %v2956_v28, 5.0  ;;  %v1435_v13 = vshrl.u32 %v3162_v57, %v4101_v14 }
 0x149   : > { %v1110_v40 = vsel %vm1100_vm0, nan, %v1109_v4  ;;  %v1220_v36 = vsel %vm2609_vm1, 0, %v2608_v34  ;;  %v1500_v47 = vshll.u32 %v1496_v37, 16  ;;  %v1503_v54 = vsel %vm1502_vm2, 1, %v3160_v0 }
 0x14a   : > { %v1576_v56 = vadd.f32 1.0, %v1110_v40  ;;  %v1221_v26 = vsub.s32 32, %v1220_v36  ;;  %v1222_v33 = vshll.u32 %v1213_v63, %v1220_v36  ;;  %v1225_v43 = vsub.s32 4294967266, %v1220_v36 }
 0x14b   : > { %v1456_v51 = vsel %vm1454_vm6, %v4188_v5, 2102212464  ;;  %v1479_v58 = vshrl.u32 %v4231_v60, 16  ;;  %v1504_v1 = vadd.s32 %v1498_v20, %v1494_v22  ;;  %v1505_v53 = vadd.s32 %v1503_v54, %v1497_v32 }
 0x14c   : > { %v1583_v61 = vmul.f32 0.5, %v1576_v56  ;;  %v1223_v52 = vshrl.u32 %v1205_v15, %v1221_v26  ;;  %v1226_v35 = vadd.s32 127, %v1225_v43  ;;  %v1488_v63 = vadd.s32 %v1487_v25, %v1477_v3 }
 0x14d   : > { %v1455_v57 = vsel %vm1451_vm7, %v1435_v13, %v4197_v19  ;;  %v1499_v14 = vshrl.u32 %v1495_v38, 16  ;;  %vm1506_vm4 = vc.u32 %v1504_v1, %v1500_v47  ;;  %v1457_v5 = vsel %vm1453_vm8, %v4186_v41, %v1456_v51 }
 0x14e   : > { %v1597_v11 = vsel %vm1590_vm3, %v1583_v61, 0.0  ;;  %v1224_v17 = vor.u32 %v1223_v52, %v1222_v33  ;;  %v1227_v29 = vshll.u32 %v1226_v35, 23  ;;  %v1507_v60 = vsel %vm1506_vm4, 1, %v3160_v0 }
 0x14f   : > { %1618 = vperm.xlu1 %2935, %v1597_v11   ;;  %v1501_v23 = vshrl.u32 %v1496_v37, 16  ;;  %v1509_v44 = vadd.s32 %v1507_v60, %v1505_v53  ;;  %v1489_v6 = vadd.s32 %v1488_v63, %v1479_v58  ;;  %v1508_v12 = vadd.s32 %v1504_v1, %v1500_v47 }
 0x150   : > { %v1228_v18 = vor.u32 4788187, %v1227_v29  ;;  %v1231_v27 = vcvt.s32.f32 %v1224_v17  ;;  %v1458_v2 = vsel %vm1452_vm9, %v1455_v57, %v1457_v5  ;;  %vm1113_vm5 = vcmp.lt.s32.totalorder %v3400_v31, 0 }
 0x151   : > { %v1510_v10 = vadd.s32 %v1509_v44, %v1499_v14  ;;  %vm4265_vm6 = vcmp.le.f32.partialorder %v1111_v9, 0.7853982  ;;  %v1512_v41 = vmul.u32 %v4218_v39, %v1458_v2  ;;  %vm1514_vm7 = vc.u32 %v1489_v6, %v1508_v12  ;;  %v404_v2 = vpop.permute.xlu0 %403 }
 0x152   : > { %v1229_v8 = vand.u32 2147483647, %v1228_v18  ;;  %v1235_v50 = vsub.s32 4, %v4220_v7  ;;  %vm1254_vm12 = vweird.f32 %v3400_v31  ;;  %v1513_v54 = vadd.s32 %v1508_v12, %v1489_v6  ;;  %v2957_v18 = vld [vmem:[%s4456_s0 + $0x20] sm:$0xff] }
 0x153   : > { %v1511_v46 = vadd.s32 %v1510_v10, %v1501_v23  ;;  %vm1591_vm14 = vcmp.lt.f32.partialorder %v2957_v18, 5.0  ;;  %v4291_v12 = vld [vmem:[%s4457_s1] ss:$0 sm:$0xff]  ;;  %vm1421_vm15 = vcmp.lt.s32.totalorder %v3398_v30, 0  ;;  %v424_v10 = vpop.permute.xlu2 %423  ;;  %vm4296_vm0 = vcmp.le.f32.partialorder %v1419_v16, 0.7853982 }
 0x154   : > { %v1232_v19 = vmul.f32 %v1231_v27, %v1229_v8  ;;  %v1236_v39 = vsel %vm1113_vm5, %v1235_v50, %v4220_v7  ;;  %v4301_v45 = vsub.f32 %v424_v10, %v4291_v12  ;;  %vm1562_vm4 = vweird.f32 %v3398_v30 }
 0x155   : > { %v1515_v42 = vadd.s32 1, %v1511_v46  ;;  %v1238_v49 = vsel %vm4265_vm6, 0, %v1236_v39 }
 0x156   : > { %v1233_v0 = vxor.u32 2147483648, %v1232_v19  ;;  %v1255_v36 = vand.u32 3, %v1238_v49 }
 0x157   : > { %v1516_v21 = vsel %vm1514_vm7, %v1515_v42, %v1511_v46  ;;  %vm1652_vm7 = vcmask 261120  }
 0x158   : > { %v1234_v55 = vsel %vm1113_vm5, %v1233_v0, %v1232_v19  ;;  %v1517_v9 = vadd.s32 %v1516_v21, %v1512_v41  ;;  %vm1260_vm9 = vcmp.eq.s32.totalorder %v1255_v36, 2  ;;  %vm1257_vm10 = vcmp.eq.s32.totalorder %v1255_v36, 0 }
 0x159   : > { %v1237_v62 = vsel %vm4265_vm6, %v3400_v31, %v1234_v55  ;;  %vm1256_vm11 = vcmp.lt.s32.totalorder %v1255_v36, 2  ;;  %v409_v21 = vpop.permute.xlu0 %408  ;;  %vm1643_vm5 = vcmask 130048  }
 0x15a   : > { %v1239_v38 = vmul.f32 %v1237_v62, %v1237_v62  ;;  %v1518_v48 = vadd.s32 536870912, %v1517_v9 }
 0x15b   : > { %v429_v49 = vpop.permute.xlu2 %428 }
 0x15c   : > { %v1240_v24 = vmul.f32 -0.001358992, %v1239_v38  ;;  %v1247_v59 = vmul.f32 -0.00019511016, %v1239_v38  ;;  %v4279_v20 = vshrl.u32 %v1518_v48, 30 }
 0x15e   : > { %v1241_v22 = vadd.f32 0.041655596, %v1240_v24  ;;  %v1248_v34 = vadd.f32 0.008332121, %v1247_v59  ;;  %v1520_v4 = vshll.u32 %v4279_v20, 30  ;;  %v1543_v41 = vsub.s32 4, %v4279_v20 }
 0x160   : > { %v1242_v15 = vmul.f32 %v1241_v22, %v1239_v38  ;;  %v1249_v37 = vmul.f32 %v1248_v34, %v1239_v38  ;;  %v1521_v40 = vsub.s32 %v1517_v9, %v1520_v4  ;;  %v1544_v16 = vsel %vm1421_vm15, %v1543_v41, %v4279_v20 }
 0x161   : > { %v1546_v48 = vsel %vm4296_vm0, 0, %v1544_v16  ;;  %v434_v36 = vpop.permute.xlu0 %433 }
 0x162   : > { %v1243_v3 = vadd.f32 -0.4999988, %v1242_v15  ;;  %v1250_v25 = vadd.f32 -0.16666654, %v1249_v37  ;;  %vm1522_vm8 = vcmp.lt.s32.totalorder %v1521_v40, 0  ;;  %v1523_v26 = vsub.s32 0, %v1521_v40 }
 0x163   : > { %v1563_v4 = vand.u32 3, %v1546_v48  ;;  %v4312_v20 = vsub.f32 %v434_v36, %v4291_v12 }
 0x164   : > { %v1244_v32 = vmul.f32 %v1243_v3, %v1239_v38  ;;  %v1251_v56 = vmul.f32 %v1250_v25, %v1239_v38  ;;  %v1524_v43 = vsel %vm1522_vm8, %v1523_v26, %v1521_v40  ;;  %v440_v38 = vsub.f32 %v409_v21, %v4291_v12 }
 0x165   : > { %v1525_v28 = vclz %v1524_v43  ;;  %vm1568_vm1 = vcmp.eq.s32.totalorder %v1563_v4, 2  ;;  %vm1565_vm2 = vcmp.eq.s32.totalorder %v1563_v4, 0  ;;  %vm1564_vm3 = vcmp.lt.s32.totalorder %v1563_v4, 2 }
 0x166   : > { %v1245_v7 = vadd.f32 1.0, %v1244_v32  ;;  %v1252_v33 = vadd.f32 1.0, %v1251_v56  ;;  %v447_v59 = vmul.f32 -4.4999995, %v440_v38 }
 0x167   : > { %v2614_v61 = vadd.s32 4294967294, %v1525_v28 }
 0x168   : > { %v1253_v13 = vmul.f32 %v1252_v33, %v1237_v62  ;;  %v1261_v47 = vxor.u32 2147483648, %v1245_v7  ;;  %v454_v34 = vmul.f32 %v447_v59, %v440_v38 }
 0x169   : > { %vm2615_vm13 = vcmp.lt.s32.totalorder %v2614_v61, 0  ;;  %v1614_v10 = vpop.permute.xlu0 %1613 }
 0x16a   : > { %v1258_v52 = vxor.u32 2147483648, %v1253_v13  ;;  %v1262_v35 = vsel %vm1260_vm9, %v1261_v47, %v1253_v13  ;;  %v1528_v58 = vsel %vm2615_vm13, 0, %v2614_v61  ;;  %v462_v3 = vmul.f32 1.442695, %v454_v34  ;;  %v1609_v13 = vpop.permute.xlu2 %1608 }
 0x16b   : > { %v1529_v53 = vsub.s32 32, %v1528_v58  ;;  %v1530_v11 = vshll.u32 %v1521_v40, %v1528_v58  ;;  %v1533_v17 = vsub.s32 4294967266, %v1528_v58 }
 0x16c   : > { %v1259_v51 = vsel %vm1257_vm10, %v1245_v7, %v1258_v52  ;;  %2940 = vpow2.f32 %v462_v3 }
 0x16d   : > { %v1263_v1 = vsel %vm1256_vm11, %v1259_v51, %v1262_v35  ;;  %v1531_v57 = vshrl.u32 %v1513_v54, %v1529_v53  ;;  %v1534_v14 = vadd.s32 127, %v1533_v17  ;;  %v2958_v51 = vld [vmem:[%s4456_s0 + $0x30] sm:$0xff]  ;;  %v439_v53 = vsub.f32 %v404_v2, %v4291_v12 }
 0x16e   : > { %v1264_v29 = vsel %vm1254_vm12, nan, %v1263_v1  ;;  %vm1593_vm6 = vcmp.lt.f32.partialorder %v2958_v51, 5.0 }
 0x16f   : > { %v1577_v63 = vadd.f32 1.0, %v1264_v29  ;;  %v1532_v5 = vor.u32 %v1531_v57, %v1530_v11  ;;  %v1535_v31 = vshll.u32 %v1534_v14, 23  ;;  %v446_v17 = vmul.f32 -4.4999995, %v439_v53 }
 0x170   : > { %v444_v14 = vsub.f32 %v429_v49, %v4291_v12 }
 0x171   : > { %v1584_v27 = vmul.f32 0.5, %v1577_v63  ;;  %v1536_v23 = vor.u32 4788187, %v1535_v31  ;;  %v1539_v44 = vcvt.s32.f32 %v1532_v5  ;;  %v453_v63 = vmul.f32 %v446_v17, %v439_v53 }
 0x172   : > { %v2941_v28 = vpop.eup %2940  ;;  %v451_v5 = vmul.f32 -4.4999995, %v444_v14 }
 0x173   : > { %v1598_v60 = vsel %vm1591_vm14, %v1584_v27, 0.0  ;;  %v1537_v8 = vand.u32 2147483647, %v1536_v23  ;;  %v1637_v61 = vmul.f32 %v2941_v28, %v1609_v13  ;;  %v460_v18 = vmul.f32 1.442695, %v453_v63 }
 0x174   : > { %1623 = vperm.xlu2 %2936, %v1598_v60   ;;  %v458_v60 = vmul.f32 %v451_v5, %v444_v14 }
 0x175   : > { %v1540_v6 = vmul.f32 %v1539_v44, %v1537_v8  ;;  %1645 = vst.msk [vmem:[#allocation2 + $0x8] sm:$0xff] %vm1643_vm5, %v1637_v61  ;;  %2942 = vpow2.f32 %v460_v18 }
 0x176   : > { %v470_v44 = vmul.f32 1.442695, %v458_v60 }
 0x177   : > { %v1541_v46 = vxor.u32 2147483648, %v1540_v6 }
 0x179   : > { %v1542_v0 = vsel %vm1421_vm15, %v1541_v46, %v1540_v6 }
 0x17a   : > { %v1545_v42 = vsel %vm4296_vm0, %v3398_v30, %v1542_v0  ;;  %v414_v30 = vpop.permute.xlu1 %413 }
 0x17b   : > { %v1547_v55 = vmul.f32 %v1545_v42, %v1545_v42  ;;  %v441_v11 = vsub.f32 %v414_v30, %v4291_v12  ;;  %v2943_v6 = vpop.eup %2942 }
 0x17d   : > { %v1548_v50 = vmul.f32 -0.001358992, %v1547_v55  ;;  %v1555_v62 = vmul.f32 -0.00019511016, %v1547_v55  ;;  %v448_v29 = vmul.f32 -4.4999995, %v441_v11 }
 0x17f   : > { %v1549_v9 = vadd.f32 0.041655596, %v1548_v50  ;;  %v1556_v24 = vadd.f32 0.008332121, %v1555_v62  ;;  %v455_v57 = vmul.f32 %v448_v29, %v441_v11  ;;  %v450_v62 = vmul.f32 -4.4999995, %v4301_v45 }
 0x181   : > { %v1550_v39 = vmul.f32 %v1549_v9, %v1547_v55  ;;  %v1557_v22 = vmul.f32 %v1556_v24, %v1547_v55  ;;  %v464_v27 = vmul.f32 1.442695, %v455_v57  ;;  %v457_v21 = vmul.f32 %v450_v62, %v4301_v45 }
 0x182   : > { %v419_v31 = vpop.permute.xlu1 %418  ;;  %v452_v45 = vmul.f32 -4.4999995, %v4312_v20 }
 0x183   : > { %v1551_v15 = vadd.f32 -0.4999988, %v1550_v39  ;;  %v1558_v37 = vadd.f32 -0.16666654, %v1557_v22  ;;  %2944 = vpow2.f32 %v464_v27  ;;  %v442_v23 = vsub.f32 %v419_v31, %v4291_v12  ;;  %v1651_v22 = vld [vmem:[%s4460_s4] sm:$0xff] }
 0x184   : > { %2946 = vpow2.f32 %v470_v44  ;;  %v468_v9 = vmul.f32 1.442695, %v457_v21  ;;  %1653 = vst.msk [vmem:[#allocation3] sm:$0xff] %vm1652_vm7, %v1651_v22  ;;  %v459_v34 = vmul.f32 %v452_v45, %v4312_v20 }
 0x185   : > { %v1552_v25 = vmul.f32 %v1551_v15, %v1547_v55  ;;  %v1559_v40 = vmul.f32 %v1558_v37, %v1547_v55  ;;  %v449_v8 = vmul.f32 -4.4999995, %v442_v23 }
 0x186   : > { %v472_v49 = vmul.f32 1.442695, %v459_v34 }
 0x187   : > { %v1553_v32 = vadd.f32 1.0, %v1552_v25  ;;  %v1560_v56 = vadd.f32 1.0, %v1559_v40  ;;  %v456_v41 = vmul.f32 %v449_v8, %v442_v23 }
 0x189   : > { %v1561_v26 = vmul.f32 %v1560_v56, %v1545_v42  ;;  %v1569_v7 = vxor.u32 2147483648, %v1553_v32  ;;  %v2945_v2 = vpop.eup %2944  ;;  %v466_v42 = vmul.f32 1.442695, %v456_v41 }
 0x18a   : > { %v1604_v19 = vpop.permute.xlu1 %1603  ;;  %v1638_v46 = vmul.f32 %v2945_v2, %v1614_v10  ;;  %v2947_v55 = vpop.eup %2946 }
 0x18b   : > { %v1566_v33 = vxor.u32 2147483648, %v1561_v26  ;;  %v1570_v43 = vsel %vm1568_vm1, %v1569_v7, %v1561_v26  ;;  %v1636_v0 = vmul.f32 %v2943_v6, %v1604_v19  ;;  %2948 = vpow2.f32 %v466_v42 }
 0x18c   : > { %1646 = vst.msk [vmem:[#allocation2 + $0x10] sm:$0xff] %vm1643_vm5, %v1638_v46  ;;  %2950 = vpow2.f32 %v468_v9 }
 0x18d   : > { %v1567_v47 = vsel %vm1565_vm2, %v1553_v32, %v1566_v33  ;;  %1644 = vst.msk [vmem:[#allocation2] sm:$0xff] %vm1643_vm5, %v1636_v0  ;;  %2952 = vpow2.f32 %v472_v49 }
 0x18e   : > { %v1571_v52 = vsel %vm1564_vm3, %v1567_v47, %v1570_v43 }
 0x18f   : > { %v1572_v35 = vsel %vm1562_vm4, nan, %v1571_v52 }
 0x190   : > { %v1579_v54 = vadd.f32 1.0, %v1572_v35 }
 0x191   : > { %v2949_v16 = vpop.eup %2948 }
 0x192   : > { %v1586_v58 = vmul.f32 0.5, %v1579_v54  ;;  %v2951_v59 = vpop.eup %2950 }
 0x193   : > { %v2953_v15 = vpop.eup %2952 }
 0x194   : > { %v1600_v1 = vsel %vm1593_vm6, %v1586_v58, 0.0 }
 0x195   : > { %1633 = vperm.xlu1 %2935, %v1600_v1  }
 0x19e   : > { %v1629_v50 = vpop.permute.xlu0 %1628 }
 0x19f   : > { %v1641_v12 = vmul.f32 %v2947_v55, %v1629_v50 }
 0x1a1   : > { %1649 = vst.msk [vmem:[#allocation2 + $0x28] sm:$0xff] %vm1643_vm5, %v1641_v12 }
 0x1c1   : > { %v1619_v38 = vpop.permute.xlu1 %1618 }
 0x1c2   : > { %v1639_v24 = vmul.f32 %v2949_v16, %v1619_v38 }
 0x1c4   : > { %1647 = vst.msk [vmem:[#allocation2 + $0x18] sm:$0xff] %vm1643_vm5, %v1639_v24 }
 0x1ce   : > { %v1624_v48 = vpop.permute.xlu2 %1623 }
 0x1cf   : > { %v1640_v39 = vmul.f32 %v2951_v59, %v1624_v48 }
 0x1d1   : > { %1648 = vst.msk [vmem:[#allocation2 + $0x20] sm:$0xff] %vm1643_vm5, %v1640_v39 }
 0x207   : > { %v1634_v37 = vpop.permute.xlu1 %1633 }
 0x208   : > { %v1642_v4 = vmul.f32 %v2953_v15, %v1634_v37 }
 0x20a   : > { %1650 = vst.msk [vmem:[#allocation2 + $0x30] sm:$0xff] %vm1643_vm5, %v1642_v4 }
 0x20b PF: > { %v2841_v3 = vld [vmem:[%s3340_s30 + $0x18] sm:$0xff]  ;;  %v4337_v25 = vld [vmem:[#allocation3] sm:$0xff]  ;;  %v2840_v32 = vld [vmem:[%s3340_s30 + $0x10] sm:$0xff]  ;;  %vm1691_vm8 = vcmask 261120   ;;  %vm1823_vm9 = vcmask 130048   ;;  %vm1779_vm10 = vcmask 1043456  }
 0x20c   : > { %v1663_v40 = vand.u32 2147483647, %v4337_v25  ;;  %v2845_v36 = vld [vmem:[%s3332_s22] sm:$0xff]  ;;  %1733 = vmatpush.bf16.msra.mxu1 %v2841_v3  ;;  %v1662_v33 = vmax.f32 %v4337_v25, 0.0  ;;  %v1657_v51 = vld [vmem:[#allocation2 + $0x10] sm:$0xff]  ;;  %v1658_v58 = vld [vmem:[#allocation2 + $0x18] sm:$0xff] }
 0x20d   : > { %1843 = vmatpush.bf16.msra.mxu3 %v2845_v36  ;;  %v1655_v52 = vld [vmem:[#allocation2] sm:$0xff]  ;;  %v1656_v35 = vld [vmem:[#allocation2 + $0x8] sm:$0xff]  ;;  %v1814_v1 = vpack.c.bf16 %v1658_v58, %v1657_v51  ;;  %vm1766_vm11 = vcmask 64512   ;;  %v2844_v23 = vld [vmem:[%s4459_s3 + $0x10] sm:$0xff]  ;;  %vm1876_vm12 = vcmask 457728   ;;  %s2474_s27 = sshll.u32 %s3353_s15, 4  ;;  %s2475_s27 = int_to_ptr.vmem [resolvable:$true] %s2474_s27 }
 0x20e   : > { %v1664_v20 = vsub.f32 0.0, %v1663_v40  ;;  %v1813_v54 = vpack.c.bf16 %v1656_v35, %v1655_v52  ;;  %v1659_v53 = vld [vmem:[#allocation2 + $0x20] sm:$0xff]  ;;  %v1660_v30 = vld [vmem:[#allocation2 + $0x28] sm:$0xff]  ;;  %v1746_v44 = vld [vmem:[%s4459_s3 + $0x18] sm:$0xf]  ;;  %s2462_s18 = scalar_lea.sflag [#allocation6], %s3328_s19 }
 0x20f   : > { %v2959_v11 = vld [vmem:[%s3351_s26 + $0x1] ss:$0 sm:$0xff]  ;;  %v1815_v17 = vpack.c.bf16 %v1660_v30, %v1659_v53  ;;  %v2843_v60 = vld [vmem:[%s4459_s3 + $0x8] sm:$0xff]  ;;  %v1761_v8 = vunpack.c.l.b16 %v1746_v44  ;;  %v2839_v55 = vld [vmem:[%s3340_s30 + $0x8] sm:$0xff] }
 0x210   : > { %v1665_v56 = vmul.f32 1.442695, %v1664_v20  ;;  %1734 = vmatpush.bf16.msra.mxu1 %v2840_v32  ;;  %2659 = vmatmul.msk.bf16.vlgmr.msra.gmra.mxu3 %vm1823_vm9, %v1813_v54  ;;  %v2842_v18 = vld [vmem:[%s4459_s3] sm:$0xff]  ;;  %v2838_v12 = vld [vmem:[%s3340_s30] sm:$0xff] }
 0x211   : > { %v1661_v5 = vld [vmem:[#allocation2 + $0x30] sm:$0xff]  ;;  %v1765_v6 = vpack.c.b16 %v1761_v8, %v1761_v8  ;;  %1701 = vmatpush.bf16.msra.mxu0 %v2839_v55  ;;  %v1871_v20 = vld [vmem:[%s4458_s2] sm:$0xf] }
 0x212   : > { %2974 = vpow2.f32 %v1665_v56  ;;  %v1816_v31 = vpack.c.bf16 %v1661_v5, %v1661_v5  ;;  %v2850_v55 = vld [vmem:[%s3340_s30 + $0x40] sm:$0xff] }
 0x215   : > { %1702 = vmatpush.bf16.msra.mxu0 %v2838_v12 }
 0x218   : > { %v2975_v26 = vpop.eup %2974 }
 0x219   : > { %v1667_v7 = vadd.f32 1.0, %v2975_v26 }
 0x21b   : > { %2976 = vlog2.f32 %v1667_v7  ;;  %v2847_v7 = vld [vmem:[%s3340_s30 + $0x28] sm:$0xff] }
 0x21c   : > { %1942 = vmatpush.bf16.msrb.mxu1 %v2847_v7 }
 0x220   : > { %2660 = vmatmul.msk.bf16.gmra.mxu3 %vm1823_vm9, %v1814_v1 }
 0x221   : > { %v2977_v43 = vpop.eup %2976 }
 0x222   : > { %v1669_v28 = vmul.f32 0.6931472, %v2977_v43  ;;  %v2846_v43 = vld [vmem:[%s3340_s30 + $0x20] sm:$0xff] }
 0x223   : > { %1943 = vmatpush.bf16.msrb.mxu1 %v2846_v43 }
 0x224   : > { %v1670_v13 = vadd.f32 %v1669_v28, %v1662_v33  ;;  %v2960_v33 = vld [vmem:[%s3351_s26] ss:$0 sm:$0xff] }
 0x226   : > { %v2616_v47 = vadd.f32 -0.6931472, %v1670_v13 }
 0x228   : > { %v1676_v61 = vpack.c.bf16 %v2616_v47, %v2616_v47 }
 0x22a   : > { %2638 = vmatmul.msk.bf16.vlgmr.msra.gmra.mxu1 %vm1691_vm8, %v1676_v61  ;;  %2625 = vmatmul.msk.bf16.vlgmr.msra.gmra.mxu0 %vm1691_vm8, %v1676_v61 }
 0x230   : > { %2661 = vmatmul.msk.bf16.gmra.mxu3 %vm1823_vm9, %v1815_v17 }
 0x240   : > { %2662 = vmatmul.msk.bf16.gmra.mxu3 %vm1823_vm9, %v1816_v31 }
 0x293   : > { %v1845_v2 = vpop.f32.mrf.mxu3 }
 0x29b   : > { %v1847_v10 = vpop.f32.mrf.mxu3 }
 0x2a3   : > { %v1850_v19 = vpop.f32.mrf.mxu3 }
 0x2a7   : > { %v1736_v29 = vpop.f32.mrf.mxu1  ;;  %v1704_v56 = vpop.f32.mrf.mxu0 }
 0x2a8   : > { %v1737_v63 = vadd.f32 %v2959_v11, %v1736_v29  ;;  %v1705_v28 = vadd.f32 %v2960_v33, %v1704_v56 }
 0x2aa   : > { %v1747_v57 = vpack.c.bf16 %v1737_v63, %v1737_v63  ;;  %v2849_v63 = vld [vmem:[%s3340_s30 + $0x38] sm:$0xff] }
 0x2ab   : > { %v1852_v46 = vpop.f32.mrf.mxu3 }
 0x2ac   : > { %v1781_v14 = vsel %vm1779_vm10, %v1747_v57, 0  ;;  %v2848_v57 = vld [vmem:[%s3340_s30 + $0x30] sm:$0xff] }
 0x2ad   : > { %1790 = vmatpush.bf16.msra.mxu2 %v1781_v14  ;;  %v2961_v14 = vld [vmem:[%s3351_s26 + $0x2] ss:$0 sm:$0xff] }
 0x2af   : > { %v1738_v27 = vpop.f32.mrf.mxu1  ;;  %v1706_v26 = vpop.f32.mrf.mxu0 }
 0x2b0   : > { %2651 = vmatmul.msk.bf16.vlgmr.msra.gmra.mxu2 %vm1766_vm11, %v2842_v18 }
 0x2b3   : > { %v1855_v0 = vpop.f32.mrf.mxu3 }
 0x2bb   : > { %v1857_v42 = vpop.f32.mrf.mxu3 }
 0x2c0   : > { %2652 = vmatmul.msk.bf16.gmra.mxu2 %vm1766_vm11, %v2843_v60 }
 0x2c3   : > { %v1860_v62 = vpop.f32.mrf.mxu3 }
 0x2cb   : > { %v1862_v24 = vpop.f32.mrf.mxu3 }
 0x2d0   : > { %2653 = vmatmul.msk.bf16.gmra.mxu2 %vm1766_vm11, %v2844_v23 }
 0x2e0   : > { %2654 = vmatmul.msk.bf16.gmra.mxu2 %vm1766_vm11, %v1765_v6 }
 0x333   : > { %v1792_v41 = vpop.f32.mrf.mxu2 }
 0x334   : > { %v1864_v21 = vmul.f32 %v1845_v2, %v1792_v41  ;;  %v2851_v41 = vld [vmem:[%s3340_s30 + $0x48] sm:$0xff] }
 0x335   : > { %2035 = vmatpush.bf16.msra.mxu1 %v2851_v41 }
 0x339   : > { %2036 = vmatpush.bf16.msra.mxu1 %v2850_v55 }
 0x33b   : > { %v1794_v50 = vpop.f32.mrf.mxu2 }
 0x33c   : > { %v1865_v16 = vmul.f32 %v1847_v10, %v1794_v50 }
 0x33e   : > { %v1872_v38 = vpack.c.bf16 %v1865_v16, %v1864_v21 }
 0x343   : > { %v1797_v9 = vpop.f32.mrf.mxu2 }
 0x344   : > { %v1866_v48 = vmul.f32 %v1850_v19, %v1797_v9 }
 0x34b   : > { %v1799_v59 = vpop.f32.mrf.mxu2 }
 0x34c   : > { %v1867_v39 = vmul.f32 %v1852_v46, %v1799_v59 }
 0x34e   : > { %v1873_v22 = vpack.c.bf16 %v1867_v39, %v1866_v48 }
 0x353   : > { %v1802_v45 = vpop.f32.mrf.mxu2 }
 0x354   : > { %v1868_v40 = vmul.f32 %v1855_v0, %v1802_v45 }
 0x35b   : > { %v1804_v34 = vpop.f32.mrf.mxu2 }
 0x35c   : > { %v1869_v4 = vmul.f32 %v1857_v42, %v1804_v34  ;;  %v2962_v42 = vld [vmem:[%s3351_s26 + $0x3] ss:$0 sm:$0xff] }
 0x35e   : > { %v1874_v32 = vpack.c.bf16 %v1869_v4, %v1868_v40  ;;  %v2963_v4 = vld [vmem:[%s3351_s26 + $0x4] ss:$0 sm:$0xff] }
 0x363   : > { %v1807_v49 = vpop.f32.mrf.mxu2 }
 0x364   : > { %v1870_v15 = vmul.f32 %v1860_v62, %v1807_v49 }
 0x366   : > { %v1875_v37 = vpack.c.bf16 %v1870_v15, %v1870_v15  ;;  %v2853_v15 = vld [vmem:[%s3340_s30 + $0x58] sm:$0xff] }
 0x368   : > { %v1881_v3 = vsel %vm1779_vm10, %v1875_v37, 0  ;;  %v2852_v37 = vld [vmem:[%s3340_s30 + $0x50] sm:$0xff] }
 0x369   : > { %1887 = vmatpush.bf16.msrb.mxu0 %v1881_v3 }
 0x36b   : > { %v1809_v36 = vpop.f32.mrf.mxu2 }
 0x36d   : > { %1888 = vmatpush.bf16.msrb.mxu0 %v1874_v32 }
 0x371   : > { %1889 = vmatpush.bf16.msrb.mxu0 %v1873_v22 }
 0x375   : > { %1890 = vmatpush.bf16.msrb.mxu0 %v1872_v38 }
 0x378   : > { %2663 = vmatmul.msk.bf16.vlgmr.msrb.gmra.mxu0 %vm1876_vm12, %v1871_v20 }
 0x379   : > { %1982 = vmatpush.bf16.msra.mxu0 %v2849_v63 }
 0x37d   : > { %1983 = vmatpush.bf16.msra.mxu0 %v2848_v57 }
 0x381   : > { %2075 = vmatpush.bf16.msrb.mxu0 %v2853_v15 }
 0x385   : > { %2076 = vmatpush.bf16.msrb.mxu0 %v2852_v37 }
 0x3f5   : > { %v1892_v13 = vpop.f32.mrf.mxu0 }
 0x3f6   : > { %v1896_v47 = vadd.f32 %v1892_v13, %v1705_v28 }
 0x3f8   : > { %v1910_v61 = vand.u32 2147483647, %v1896_v47  ;;  %v1909_v53 = vmax.f32 %v1896_v47, 0.0 }
 0x3fa   : > { %v1911_v52 = vsub.f32 0.0, %v1910_v61 }
 0x3fc   : > { %v1912_v35 = vmul.f32 1.442695, %v1911_v52  ;;  %v2855_v52 = vld [vmem:[%s3340_s30 + $0x68] sm:$0xff] }
 0x3fd   : > { %v1894_v54 = vpop.f32.mrf.mxu0 }
 0x3fe   : > { %2978 = vpow2.f32 %v1912_v35  ;;  %v2964_v35 = vld [vmem:[%s3351_s26 + $0x5] ss:$0 sm:$0xff]  ;;  %v2854_v54 = vld [vmem:[%s3340_s30 + $0x60] sm:$0xff] }
 0x404   : > { %v2979_v51 = vpop.eup %2978 }
 0x405   : > { %v1914_v58 = vadd.f32 1.0, %v2979_v51 }
 0x407   : > { %2980 = vlog2.f32 %v1914_v58 }
 0x40d   : > { %v2981_v1 = vpop.eup %2980 }
 0x40e   : > { %v1916_v30 = vmul.f32 0.6931472, %v2981_v1 }
 0x410   : > { %v1917_v11 = vadd.f32 %v1916_v30, %v1909_v53  ;;  %v2857_v53 = vld [vmem:[%s3340_s30 + $0x78] sm:$0xff] }
 0x411   : > { %2179 = vmatpush.bf16.msrb.mxu2 %v2857_v53 }
 0x412   : > { %v2672_v17 = vadd.f32 -0.6931472, %v1917_v11 }
 0x414   : > { %v1919_v29 = vpack.c.bf16 %v2672_v17, %v2672_v17 }
 0x416   : > { %2681 = vmatmul.msk.bf16.vlgmr.msrb.gmra.mxu1 %vm1691_vm8, %v1919_v29 }
 0x417   : > { %2123 = vmatpush.bf16.msrb.mxu1 %v2855_v52 }
 0x41b   : > { %2124 = vmatpush.bf16.msrb.mxu1 %v2854_v54 }
 0x493   : > { %v1945_v18 = vpop.f32.mrf.mxu1 }
 0x494   : > { %v1946_v27 = vadd.f32 %v2961_v14, %v1945_v18 }
 0x496   : > { %v1950_v5 = vand.u32 2147483647, %v1946_v27  ;;  %v1949_v2 = vmax.f32 %v1946_v27, 0.0 }
 0x498   : > { %v1951_v31 = vsub.f32 0.0, %v1950_v5 }
 0x49a   : > { %v1952_v60 = vmul.f32 1.442695, %v1951_v31 }
 0x49b   : > { %v1947_v23 = vpop.f32.mrf.mxu1 }
 0x49c   : > { %2982 = vpow2.f32 %v1952_v60  ;;  %v2856_v23 = vld [vmem:[%s3340_s30 + $0x70] sm:$0xff] }
 0x49d   : > { %2180 = vmatpush.bf16.msrb.mxu2 %v2856_v23 }
 0x4a2   : > { %v2983_v44 = vpop.eup %2982 }
 0x4a3   : > { %v1954_v8 = vadd.f32 1.0, %v2983_v44  ;;  %v2965_v44 = vld [vmem:[%s3351_s26 + $0x6] ss:$0 sm:$0xff] }
 0x4a5   : > { %2984 = vlog2.f32 %v1954_v8  ;;  %v2085_v8 = vmul.f32 %v2965_v44, %v4337_v25 }
 0x4ab   : > { %v2985_v6 = vpop.eup %2984 }
 0x4ac   : > { %v1956_v10 = vmul.f32 0.6931472, %v2985_v6  ;;  %v2966_v6 = vld [vmem:[%s3351_s26 + $0x7] ss:$0 sm:$0xff] }
 0x4ae   : > { %v1957_v19 = vadd.f32 %v1956_v10, %v1949_v2 }
 0x4b0   : > { %v2682_v46 = vadd.f32 -0.6931472, %v1957_v19 }
 0x4b2   : > { %v1959_v0 = vpack.c.bf16 %v2682_v46, %v2682_v46  ;;  %v2859_v46 = vld [vmem:[%s3340_s30 + $0x88] sm:$0xff] }
 0x4b3   : > { %2219 = vmatpush.bf16.msrb.mxu3 %v2859_v46  ;;  %v2865_v46 = vld [vmem:[%s3340_s30 + $0xb8] sm:$0xff] }
 0x4b4   : > { %2691 = vmatmul.msk.bf16.vlgmr.msra.gmra.mxu0 %vm1691_vm8, %v1959_v0  ;;  %2366 = vmatpush.bf16.msra.mxu2 %v2865_v46 }
 0x531   : > { %v1985_v50 = vpop.f32.mrf.mxu0 }
 0x532   : > { %v1986_v62 = vadd.f32 %v2962_v42, %v1985_v50 }
 0x534   : > { %v1989_v12 = vadd.f32 %v1986_v62, %v1896_v47 }
 0x536   : > { %v2003_v21 = vand.u32 2147483647, %v1989_v12  ;;  %v2002_v39 = vmax.f32 %v1989_v12, 0.0 }
 0x538   : > { %v2004_v16 = vsub.f32 0.0, %v2003_v21 }
 0x539   : > { %v1987_v38 = vpop.f32.mrf.mxu0 }
 0x53a   : > { %v2005_v9 = vmul.f32 1.442695, %v2004_v16 }
 0x53c   : > { %2986 = vpow2.f32 %v2005_v9 }
 0x542   : > { %v2987_v24 = vpop.eup %2986 }
 0x543   : > { %v2007_v59 = vadd.f32 1.0, %v2987_v24  ;;  %v2858_v24 = vld [vmem:[%s3340_s30 + $0x80] sm:$0xff] }
 0x544   : > { %2220 = vmatpush.bf16.msrb.mxu3 %v2858_v24 }
 0x545   : > { %2988 = vlog2.f32 %v2007_v59  ;;  %v2967_v59 = vld [vmem:[%s3351_s26 + $0x8] ss:$0 sm:$0xff] }
 0x54b   : > { %v2989_v48 = vpop.eup %2988 }
 0x54c   : > { %v2009_v22 = vmul.f32 0.6931472, %v2989_v48 }
 0x54e   : > { %v2010_v45 = vadd.f32 %v2009_v22, %v2002_v39 }
 0x550   : > { %v2700_v34 = vadd.f32 -0.6931472, %v2010_v45 }
 0x552   : > { %v2012_v49 = vpack.c.bf16 %v2700_v34, %v2700_v34 }
 0x554   : > { %2709 = vmatmul.msk.bf16.vlgmr.msra.gmra.mxu1 %vm1691_vm8, %v2012_v49 }
 0x5d1   : > { %v2038_v3 = vpop.f32.mrf.mxu1 }
 0x5d2   : > { %v2039_v40 = vadd.f32 %v2963_v4, %v2038_v3 }
 0x5d4   : > { %v2043_v36 = vand.u32 2147483647, %v2039_v40  ;;  %v2042_v43 = vmax.f32 %v2039_v40, 0.0 }
 0x5d6   : > { %v2044_v32 = vsub.f32 0.0, %v2043_v36 }
 0x5d8   : > { %v2045_v20 = vmul.f32 1.442695, %v2044_v32 }
 0x5d9   : > { %v2040_v56 = vpop.f32.mrf.mxu1 }
 0x5da   : > { %2990 = vpow2.f32 %v2045_v20  ;;  %v2861_v56 = vld [vmem:[%s3340_s30 + $0x98] sm:$0xff] }
 0x5db   : > { %2272 = vmatpush.bf16.msra.mxu0 %v2861_v56 }
 0x5e0   : > { %v2991_v26 = vpop.eup %2990 }
 0x5e1   : > { %v2047_v7 = vadd.f32 1.0, %v2991_v26  ;;  %v2968_v26 = vld [vmem:[%s3351_s26 + $0x9] ss:$0 sm:$0xff] }
 0x5e3   : > { %2992 = vlog2.f32 %v2047_v7  ;;  %v2860_v7 = vld [vmem:[%s3340_s30 + $0x90] sm:$0xff] }
 0x5e4   : > { %2273 = vmatpush.bf16.msra.mxu0 %v2860_v7 }
 0x5e9   : > { %v2993_v33 = vpop.eup %2992 }
 0x5ea   : > { %v2049_v28 = vmul.f32 0.6931472, %v2993_v33 }
 0x5ec   : > { %v2050_v13 = vadd.f32 %v2049_v28, %v2042_v43 }
 0x5ee   : > { %v2710_v47 = vadd.f32 -0.6931472, %v2050_v13 }
 0x5f0   : > { %v2052_v61 = vpack.c.bf16 %v2710_v47, %v2710_v47 }
 0x5f2   : > { %2719 = vmatmul.msk.bf16.vlgmr.msrb.gmra.mxu0 %vm1691_vm8, %v2052_v61 }
 0x66f   : > { %v2078_v51 = vpop.f32.mrf.mxu0 }
 0x670   : > { %v2079_v58 = vadd.f32 %v2964_v35, %v2078_v51 }
 0x672   : > { %v2082_v1 = vadd.f32 %v2079_v58, %v1989_v12 }
 0x674   : > { %v2087_v30 = vand.u32 2147483647, %v2082_v1  ;;  %v2086_v18 = vmax.f32 %v2082_v1, 0.0 }
 0x676   : > { %v2088_v11 = vsub.f32 0.0, %v2087_v30 }
 0x677   : > { %v2080_v17 = vpop.f32.mrf.mxu0 }
 0x678   : > { %v2089_v29 = vmul.f32 1.442695, %v2088_v11  ;;  %v2863_v17 = vld [vmem:[%s3340_s30 + $0xa8] sm:$0xff] }
 0x679   : > { %2312 = vmatpush.bf16.msra.mxu1 %v2863_v17 }
 0x67a   : > { %2994 = vpow2.f32 %v2089_v29  ;;  %v2862_v29 = vld [vmem:[%s3340_s30 + $0xa0] sm:$0xff] }
 0x67d   : > { %2313 = vmatpush.bf16.msra.mxu1 %v2862_v29 }
 0x680   : > { %v2995_v63 = vpop.eup %2994 }
 0x681   : > { %v2091_v57 = vadd.f32 1.0, %v2995_v63  ;;  %v2969_v63 = vld [vmem:[%s3351_s26 + $0xa] ss:$0 sm:$0xff] }
 0x683   : > { %2996 = vlog2.f32 %v2091_v57 }
 0x689   : > { %v2997_v14 = vpop.eup %2996 }
 0x68a   : > { %v2093_v27 = vmul.f32 0.6931472, %v2997_v14 }
 0x68c   : > { %v2094_v5 = vadd.f32 %v2093_v27, %v2086_v18 }
 0x68e   : > { %v2720_v31 = vadd.f32 -0.6931472, %v2094_v5 }
 0x690   : > { %v2101_v60 = vpack.c.bf16 %v2720_v31, %v2720_v31 }
 0x692   : > { %2733 = vmatmul.msk.bf16.vlgmr.msrb.gmra.mxu1 %vm1691_vm8, %v2101_v60 }
 0x70f   : > { %v2126_v2 = vpop.f32.mrf.mxu1 }
 0x710   : > { %v2130_v10 = vadd.f32 %v2126_v2, %v2085_v8 }
 0x712   : > { %v2133_v19 = vadd.f32 %v2966_v6, %v2130_v10 }
 0x714   : > { %v2147_v0 = vand.u32 2147483647, %v2133_v19  ;;  %v2146_v21 = vmax.f32 %v2133_v19, 0.0 }
 0x716   : > { %v2148_v41 = vsub.f32 0.0, %v2147_v0  ;;  %v2970_v0 = vld [vmem:[%s3351_s26 + $0xb] ss:$0 sm:$0xff] }
 0x717   : > { %v2128_v42 = vpop.f32.mrf.mxu1 }
 0x718   : > { %v2149_v55 = vmul.f32 1.442695, %v2148_v41  ;;  %v2864_v41 = vld [vmem:[%s3340_s30 + $0xb0] sm:$0xff] }
 0x719   : > { %2367 = vmatpush.bf16.msra.mxu2 %v2864_v41 }
 0x71a   : > { %2998 = vpow2.f32 %v2149_v55 }
 0x720   : > { %v2999_v50 = vpop.eup %2998 }
 0x721   : > { %v2151_v62 = vadd.f32 1.0, %v2999_v50 }
 0x723   : > { %3000 = vlog2.f32 %v2151_v62 }
 0x729   : > { %v3001_v12 = vpop.eup %3000 }
 0x72a   : > { %v2153_v16 = vmul.f32 0.6931472, %v3001_v12 }
 0x72c   : > { %v2154_v25 = vadd.f32 %v2153_v16, %v2146_v21 }
 0x72e   : > { %v2742_v38 = vadd.f32 -0.6931472, %v2154_v25 }
 0x730   : > { %v2156_v9 = vpack.c.bf16 %v2742_v38, %v2742_v38 }
 0x732   : > { %2751 = vmatmul.msk.bf16.vlgmr.msrb.gmra.mxu2 %vm1691_vm8, %v2156_v9 }
 0x7b5   : > { %v2182_v48 = vpop.f32.mrf.mxu2 }
 0x7b6   : > { %v2183_v39 = vadd.f32 %v2967_v59, %v2182_v48 }
 0x7b8   : > { %v2187_v22 = vand.u32 2147483647, %v2183_v39  ;;  %v2186_v3 = vmax.f32 %v2183_v39, 0.0 }
 0x7ba   : > { %v2188_v45 = vsub.f32 0.0, %v2187_v22 }
 0x7bc   : > { %v2189_v34 = vmul.f32 1.442695, %v2188_v45  ;;  %v2867_v45 = vld [vmem:[%s3340_s30 + $0xc8] sm:$0xff] }
 0x7bd   : > { %v2184_v49 = vpop.f32.mrf.mxu2  ;;  %2406 = vmatpush.bf16.msra.mxu3 %v2867_v45 }
 0x7be   : > { %3002 = vpow2.f32 %v2189_v34  ;;  %v2866_v34 = vld [vmem:[%s3340_s30 + $0xc0] sm:$0xff]  ;;  %v2971_v49 = vld [vmem:[%s3351_s26 + $0xc] ss:$0 sm:$0xff] }
 0x7c1   : > { %2407 = vmatpush.bf16.msra.mxu3 %v2866_v34 }
 0x7c4   : > { %v3003_v15 = vpop.eup %3002 }
 0x7c5   : > { %v2191_v37 = vadd.f32 1.0, %v3003_v15 }
 0x7c7   : > { %3004 = vlog2.f32 %v2191_v37 }
 0x7cd   : > { %v3005_v4 = vpop.eup %3004 }
 0x7ce   : > { %v2193_v40 = vmul.f32 0.6931472, %v3005_v4 }
 0x7d0   : > { %v2194_v36 = vadd.f32 %v2193_v40, %v2186_v3 }
 0x7d2   : > { %v2752_v32 = vadd.f32 -0.6931472, %v2194_v36 }
 0x7d4   : > { %v2196_v20 = vpack.c.bf16 %v2752_v32, %v2752_v32 }
 0x7d6   : > { %2761 = vmatmul.msk.bf16.vlgmr.msrb.gmra.mxu3 %vm1691_vm8, %v2196_v20 }
 0x859   : > { %v2222_v33 = vpop.f32.mrf.mxu3 }
 0x85a   : > { %v2223_v43 = vadd.f32 %v2968_v26, %v2222_v33 }
 0x85c   : > { %v2226_v28 = vadd.f32 %v2223_v43, %v2133_v19 }
 0x85e   : > { %v2240_v13 = vand.u32 2147483647, %v2226_v28  ;;  %v2239_v58 = vmax.f32 %v2226_v28, 0.0 }
 0x860   : > { %v2241_v47 = vsub.f32 0.0, %v2240_v13  ;;  %v2869_v13 = vld [vmem:[%s3340_s30 + $0xd8] sm:$0xff] }
 0x861   : > { %v2224_v61 = vpop.f32.mrf.mxu3  ;;  %2453 = vmatpush.bf16.msrb.mxu0 %v2869_v13 }
 0x862   : > { %v2242_v52 = vmul.f32 1.442695, %v2241_v47  ;;  %v2972_v47 = vld [vmem:[%s3351_s26 + $0xd] ss:$0 sm:$0xff]  ;;  %v2868_v61 = vld [vmem:[%s3340_s30 + $0xd0] sm:$0xff]  ;;  %s2833_s30 = sshll.u32 %s3234_s9, 3 }
 0x863   : > { %s2472_s5 = scalar_lea.hbm %s4464_s8, %s2833_s30 }
 0x864   : > { %3006 = vpow2.f32 %v2242_v52  ;;  %s2476_s11 = sshll.u32 %s2472_s5, 4  ;;  %s2477_s11 = int_to_ptr.hbm [resolvable:$true] %s2476_s11 }
 0x865   : > { %2454 = vmatpush.bf16.msrb.mxu0 %v2868_v61  ;;  %s3100_s22 = sshra.s32 %s2477_s11, 4  ;;  %s3101_s22 = int_to_ptr.hbm [resolvable:$true] %s3100_s22 }
 0x866   : > { %s3102_s12 = scalar_lea.hbm %s3101_s22, 8  ;;  %p3107_p3 = scmp.lt.s32.totalorder %s3101_s22, %s4464_s8 }
 0x867   : > { %p3103_p6 = scmp.ne.s32.totalorder %s3101_s22, %s3102_s12 }
 0x869   : > { %p3104_p9 = pnand %p3103_p6, %p3262_p10 }
 0x86a   : > { %v3007_v35 = vpop.eup %3006 }
 0x86b   : > { %v2244_v54 = vadd.f32 1.0, %v3007_v35  ;;  %p3105_p1 = pneg %p3104_p9 }
 0x86d   : > { %3008 = vlog2.f32 %v2244_v54 }
 0x873   : > { %v3009_v51 = vpop.eup %3008 }
 0x874   : > { %v2246_v1 = vmul.f32 0.6931472, %v3009_v51 }
 0x876   : > { %v2247_v53 = vadd.f32 %v2246_v1, %v2239_v58 }
 0x878   : > { %v2770_v30 = vadd.f32 -0.6931472, %v2247_v53 }
 0x87a   : > { %v2249_v11 = vpack.c.bf16 %v2770_v30, %v2770_v30 }
 0x87c   : > { %2779 = vmatmul.msk.bf16.vlgmr.msra.gmra.mxu0 %vm1691_vm8, %v2249_v11 }
 0x8f9   : > { %v2275_v57 = vpop.f32.mrf.mxu0 }
 0x8fa   : > { %v2276_v14 = vadd.f32 %v2969_v63, %v2275_v57 }
 0x8fc   : > { %v2280_v18 = vand.u32 2147483647, %v2276_v14  ;;  %v2279_v8 = vmax.f32 %v2276_v14, 0.0 }
 0x8fe   : > { %v2281_v27 = vsub.f32 0.0, %v2280_v18 }
 0x900   : > { %v2282_v5 = vmul.f32 1.442695, %v2281_v27  ;;  %v2973_v27 = vld [vmem:[%s3351_s26 + $0xe] ss:$0 sm:$0xff]  ;;  %s3106_s26 = scalar_lea.hbm %s4464_s8, 40 }
 0x901   : > { %v2277_v31 = vpop.f32.mrf.mxu0  ;;  %p3108_p13 = scmp.lt.s32.totalorder %s3106_s26, %s3102_s12 }
 0x902   : > { %3010 = vpow2.f32 %v2282_v5 }
 0x903   : > { %p3109_p0 = por %p3108_p13, %p3107_p3 }
 0x905   : > { %p3110_p4 = pnand %p3109_p0, %p3105_p1 }
 0x908   : > { %v3011_v60 = vpop.eup %3010 }
 0x909   : > { %v2284_v23 = vadd.f32 1.0, %v3011_v60 }
 0x90b   : > { %3012 = vlog2.f32 %v2284_v23 }
 0x911   : > { %v3013_v44 = vpop.eup %3012 }
 0x912   : > { %v2286_v6 = vmul.f32 0.6931472, %v3013_v44 }
 0x914   : > { %v2287_v2 = vadd.f32 %v2286_v6, %v2279_v8 }
 0x916   : > { %v2780_v10 = vadd.f32 -0.6931472, %v2287_v2 }
 0x918   : > { %v2289_v19 = vpack.c.bf16 %v2780_v10, %v2780_v10 }
 0x91a   : > { %2789 = vmatmul.msk.bf16.vlgmr.msra.gmra.mxu1 %vm1691_vm8, %v2289_v19 }
 0x997   : > { %v2315_v42 = vpop.f32.mrf.mxu1 }
 0x998   : > { %v2316_v55 = vadd.f32 %v2970_v0, %v2315_v42 }
 0x99a   : > { %v2319_v50 = vadd.f32 %v2316_v55, %v2226_v28 }
 0x99c   : > { %2320 = vst.msk [vmem:[#allocation3] sm:$0xff] %vm1691_vm8, %v2319_v50  ;;  %v2334_v62 = vand.u32 2147483647, %v2319_v50  ;;  %v2333_v24 = vmax.f32 %v2319_v50, 0.0 }
 0x99e   : > { %v2335_v12 = vsub.f32 0.0, %v2334_v62 }
 0x99f   : > { %v2317_v21 = vpop.f32.mrf.mxu1 }
 0x9a0   : > { %v2336_v16 = vmul.f32 1.442695, %v2335_v12 }
 0x9a2   : > { %3014 = vpow2.f32 %v2336_v16 }
 0x9a8   : > { %v3015_v25 = vpop.eup %3014 }
 0x9a9   : > { %v2338_v38 = vadd.f32 1.0, %v3015_v25 }
 0x9ab   : > { %3016 = vlog2.f32 %v2338_v38 }
 0x9b1   : > { %v3017_v9 = vpop.eup %3016 }
 0x9b2   : > { %v2340_v59 = vmul.f32 0.6931472, %v3017_v9 }
 0x9b4   : > { %v2341_v48 = vadd.f32 %v2340_v59, %v2333_v24 }
 0x9b6   : > { %v2798_v39 = vadd.f32 -0.6931472, %v2341_v48 }
 0x9b8   : > { %v2343_v22 = vpack.c.bf16 %v2798_v39, %v2798_v39 }
 0x9ba   : > { %2807 = vmatmul.msk.bf16.vlgmr.msra.gmra.mxu2 %vm1691_vm8, %v2343_v22 }
 0xa3d   : > { %v2369_v15 = vpop.f32.mrf.mxu2 }
 0xa3e   : > { %v2370_v37 = vadd.f32 %v2971_v49, %v2369_v15 }
 0xa40   : > { %v2374_v4 = vand.u32 2147483647, %v2370_v37  ;;  %v2373_v26 = vmax.f32 %v2370_v37, 0.0 }
 0xa42   : > { %v2375_v3 = vsub.f32 0.0, %v2374_v4 }
 0xa44   : > { %v2376_v40 = vmul.f32 1.442695, %v2375_v3 }
 0xa45   : > { %v2371_v36 = vpop.f32.mrf.mxu2 }
 0xa46   : > { %3018 = vpow2.f32 %v2376_v40 }
 0xa4c   : > { %v3019_v32 = vpop.eup %3018 }
 0xa4d   : > { %v2378_v20 = vadd.f32 1.0, %v3019_v32 }
 0xa4f   : > { %3020 = vlog2.f32 %v2378_v20 }
 0xa55   : > { %v3021_v56 = vpop.eup %3020 }
 0xa56   : > { %v2380_v7 = vmul.f32 0.6931472, %v3021_v56 }
 0xa58   : > { %v2381_v33 = vadd.f32 %v2380_v7, %v2373_v26 }
 0xa5a   : > { %v2808_v43 = vadd.f32 -0.6931472, %v2381_v33 }
 0xa5c   : > { %v2383_v28 = vpack.c.bf16 %v2808_v43, %v2808_v43 }
 0xa5e   : > { %2817 = vmatmul.msk.bf16.vlgmr.msra.gmra.mxu3 %vm1691_vm8, %v2383_v28 }
 0xae1   : > { %v2409_v52 = vpop.f32.mrf.mxu3 }
 0xae2   : > { %v2410_v35 = vadd.f32 %v2972_v47, %v2409_v52 }
 0xae4   : > { %v2413_v54 = vadd.f32 %v2410_v35, %v2319_v50 }
 0xae6   : > { %v2415_v51 = vand.u32 2147483647, %v2413_v54  ;;  %v2414_v29 = vmax.f32 %v2413_v54, 0.0 }
 0xae8   : > { %v2416_v58 = vsub.f32 0.0, %v2415_v51 }
 0xae9   : > { %v2411_v1 = vpop.f32.mrf.mxu3 }
 0xaea   : > { %v2417_v53 = vmul.f32 1.442695, %v2416_v58 }
 0xaec   : > { %3022 = vpow2.f32 %v2417_v53 }
 0xaf2   : > { %v3023_v30 = vpop.eup %3022 }
 0xaf3   : > { %v2419_v11 = vadd.f32 1.0, %v3023_v30 }
 0xaf5   : > { %3024 = vlog2.f32 %v2419_v11 }
 0xafb   : > { %v3025_v17 = vpop.eup %3024 }
 0xafc   : > { %v2421_v63 = vmul.f32 0.6931472, %v3025_v17 }
 0xafe   : > { %v2422_v57 = vadd.f32 %v2421_v63, %v2414_v29 }
 0xb00   : > { %v2818_v14 = vadd.f32 -0.6931472, %v2422_v57 }
 0xb02   : > { %v2429_v18 = vpack.c.bf16 %v2818_v14, %v2818_v14 }
 0xb04   : > { %2831 = vmatmul.msk.bf16.vlgmr.msrb.gmra.mxu0 %vm1691_vm8, %v2429_v18 }
 0xb81   : > { %v2456_v5 = vpop.f32.mrf.mxu0 }
 0xb82   : > { %v2457_v31 = vadd.f32 %v2973_v27, %v2456_v5 }
 0xb84   : > { %2460 = vst.msk [vmem:[%s3353_s15] sm:$0xff] %vm1691_vm8, %v2457_v31 }
 0xb85   : > { %3113 = shalt.err (!%p3110_p4)
}
 0xb86   : > { %2877 = dma.vmem_to_hbm [thread:$0]  (%p3262_p10), %s2475_s27, 128, %s2477_s11, %s2462_s18  }
 0xb89   : > { %v2458_v60 = vpop.f32.mrf.mxu0 }
 0xb8a PF: > { %s4499_s19 = sld [smem:[#allocation15_spill]] }
 0xb8b   : > { %s4500_s15 = sld [smem:[#allocation13_spill]] }
 0xb90   : > { %p2891_p5 = scmp.ge.s32.totalorder %s4499_s19, 2 }
 0xb91   : > { %s2488_s10 = sand.u32 1, %s4500_s15  }
 0xb92   : > { %p2887_p7 = pnand %p2891_p5, %p3266_p11  ;;  %s2489_s13 = scalar_lea.sflag [#allocation6], %s2488_s10 }
 0xb94   : > { %p2888_p8 = pneg %p2887_p7 }
 0xb96   : > { %3139 = dma.done.wait (%p2888_p8), %s2489_s13, 128  }
 0xb97   : > { %3141 = vsyncadd (%p2888_p8), %s2489_s13, 4294967168  ;;  %s4502_s30 = sld [smem:[#allocation16_spill]]  ;;  %s4505_s27 = smov %s3148_s28 }
 0xb98   : > { %s4503_s20 = sld [smem:[#allocation14_spill]] }
 0xb99   : > { %s4504_s29 = sld [smem:[#allocation17_spill]] }
 0xb9d   : > { %p24_p12 = scmp.ge.s32.totalorder %s4502_s30, 7  }
 0xb9e   : > { %s4506_s28 = smov %s4503_s20 }
 0xb9f   :  { %26 = sbr.rel (!%p24_p12) target bundleno = 9 (0x9), region = 130 }
 0xba4   :  { %2495 = vsyncpa [#allocation5], 1 }
 0xba5   :  { %2497 = vsyncpa [#allocation5 + $0x1], 1 }
 0xba6   :  { %2498 = vsyncpa [#allocation8], 1 }
 0xba7   :  { %2500 = vsyncpa [#allocation8 + $0x1], 1 }
 0xba8   :  { %2501 = vsyncpa [#allocation6], 1 }
 0xba9   :  { %2503 = vsyncpa [#allocation6 + $0x1], 1 }

</bundles_post_ra>
